<compile_context>
chip_gen: v7x
topology: tpu7x:2x2x1
jax: 0.10.0
libtpu: 0.0.40
codegen_flags: <defaults>
</compile_context>

<pallas_src>
import functools

import jax
import jax.numpy as jnp
import numpy as np
from jax.experimental import pallas as pl
from jax.experimental.pallas import tpu as pltpu

EPS = 1e-5


def _round_up(x, m):
    return (x + m - 1) // m * m


def _largest_divisor_leq(n, cap):
    cap = max(1, min(n, cap))
    for d in range(cap, 0, -1):
        if n % d == 0:
            return d
    return 1


# ---------------------------------------------------------------------------
# Pass A: 3x3 "same" conv as ONE wide-K MXU matmul per tile + partial BN stats
# ---------------------------------------------------------------------------
def conv_stats_kernel(xm_ref, xt_ref, xb_ref, w_ref, y_ref, st_ref, *,
                      TR, W, n_tiles):
    # xm_ref: (TR, W, Cin_p) bf16   this tile's image rows (no spatial halo in HBM)
    # xt_ref: (1,  W, Cin_p) bf16   row above the tile (ignored when j == 0)
    # xb_ref: (1,  W, Cin_p) bf16   row below the tile (ignored when j == last)
    # w_ref:  (9*Cin_p, Cout_p) bf16 tap-major packed weights
    # y_ref:  (TR, W, Cout_p) bf16  raw conv output
    # st_ref: (1, 8, Cout_p) f32    rows 0/1 = per-tile [sum, sum_sq], rest zero
    j = pl.program_id(1)
    cin_p = xm_ref.shape[-1]
    cout_p = y_ref.shape[-1]
    dt = xm_ref.dtype

    # Conv halo rows: zero at the image top/bottom (tiles never straddle images
    # because TR divides H, so only the j==0 / j==last rows need masking).
    xt = xt_ref[...]
    xb = xb_ref[...]
    top = jnp.where(j > 0, xt, jnp.zeros_like(xt))
    bot = jnp.where(j < n_tiles - 1, xb, jnp.zeros_like(xb))

    x = jnp.concatenate([top, xm_ref[...], bot], axis=0)           # (TR+2, W, Cin_p)
    zcol = jnp.zeros((TR + 2, 1, cin_p), dt)
    xpad = jnp.concatenate([zcol, x, zcol], axis=1)                # (TR+2, W+2, Cin_p)

    # Pack the 9 taps along the contraction dim -> one (TR*W, 9*Cin_p) patch and a
    # single wide-K matmul (MXU does the tap accumulation; no VALU add chain).
    taps = [xpad[dy:dy + TR, dx:dx + W, :] for dy in range(3) for dx in range(3)]
    patch = jnp.concatenate(taps, axis=-1).reshape(TR * W, 9 * cin_p)
    acc = jnp.dot(patch, w_ref[...], preferred_element_type=jnp.float32)

    # bf16 intermediate (stats below are taken from the f32 accumulator).
    y_ref[...] = acc.reshape(TR, W, cout_p).astype(y_ref.dtype)

    # Partial statistics on the (otherwise idle) XLU; stored as a full 8-sublane tile.
    s1 = jnp.sum(acc, axis=0, keepdims=True)
    s2 = jnp.sum(acc * acc, axis=0, keepdims=True)
    st_ref[0] = jnp.concatenate(
        [s1, s2, jnp.zeros((6, cout_p), jnp.float32)], axis=0)


# ---------------------------------------------------------------------------
# Pass B: BatchNorm (folded per-channel scale/bias) + ReLU, big HBM-bound blocks
# ---------------------------------------------------------------------------
def bn_relu_kernel(y_ref, scale_ref, bias_ref, out_ref):
    y = y_ref[...].astype(jnp.float32)                             # (TRB, W, Cout_p)
    z = jnp.maximum(y * scale_ref[...] + bias_ref[...], 0.0)
    out_ref[...] = z.astype(out_ref.dtype)


# ---------------------------------------------------------------------------
# One Conv3x3 (no bias) + BatchNorm(train) + ReLU stage
# ---------------------------------------------------------------------------
def conv_bn_relu_stage(a, w_oihw, gamma, beta, N, H, W, out_dtype):
    # a: (N*H, W, Cin_p) bf16 conv-ready activation, channel padding exactly zero.
    M, _, Cin_p = a.shape
    C_out, C_in = int(w_oihw.shape[0]), int(w_oihw.shape[1])
    Cout_p = _round_up(C_out, 8)       # true channel count rounded to 8, NOT 128

    # Weights: (O, I, 3, 3) -> (ky, kx, I, O), zero-pad channels, -> (9*Cin_p, Cout_p)
    # tap-major rows so they line up with the in-kernel patch packing.
    w = jnp.transpose(w_oihw, (2, 3, 1, 0))
    w = jnp.pad(w, ((0, 0), (0, 0), (0, Cin_p - C_in), (0, Cout_p - C_out)))
    w = w.reshape(9 * Cin_p, Cout_p).astype(jnp.bfloat16)

    # Row tiling: bounds per-step VMEM at real resolutions and feeds megacore.
    TR = _largest_divisor_leq(H, max(1, 2048 // W))
    nt = H // TR
    # TODO(synk): for odd/prime H the divisor constraint can force small tiles; a
    # remainder-tile path (masked trailing rows) would lift that restriction.

    kern = functools.partial(conv_stats_kernel, TR=TR, W=W, n_tiles=nt)
    y_raw, stats = pl.pallas_call(
        kern,
        grid=(N, nt),
        out_shape=(
            jax.ShapeDtypeStruct((M, W, Cout_p), jnp.bfloat16),
            jax.ShapeDtypeStruct((N * nt, 8, Cout_p), jnp.float32),
        ),
        in_specs=[
            pl.BlockSpec((TR, W, Cin_p), lambda n, j: (n * nt + j, 0, 0)),
            # 1-row halo blocks above / below the tile (clamped; masked in-kernel).
            pl.BlockSpec((1, W, Cin_p),
                         lambda n, j: (jnp.maximum(n * H + j * TR - 1, 0), 0, 0)),
            pl.BlockSpec((1, W, Cin_p),
                         lambda n, j: (jnp.minimum(n * H + (j + 1) * TR, M - 1), 0, 0)),
            pl.BlockSpec((9 * Cin_p, Cout_p), lambda n, j: (0, 0)),
        ],
        out_specs=(
            pl.BlockSpec((TR, W, Cout_p), lambda n, j: (n * nt + j, 0, 0)),
            pl.BlockSpec((1, 8, Cout_p), lambda n, j: (n * nt + j, 0, 0)),
        ),
        compiler_params=pltpu.CompilerParams(
            dimension_semantics=("parallel", "parallel")),
    )(a, a, a, w)

    # Tiny XLA glue: reduce per-tile stats, biased variance (train mode), fold
    # gamma/beta/mean/var into per-channel scale/bias once.  Padded channels get
    # scale = bias = 0, so the next stage's channel padding stays exactly zero.
    count = float(N * H * W)
    tot = jnp.sum(stats, axis=0)                                   # (8, Cout_p)
    mean = tot[0] / count
    var = jnp.maximum(tot[1] / count - mean * mean, 0.0)
    # TODO(synk): E[x^2]-E[x]^2 cancels badly for large-mean activations; switch to a
    # shifted / Welford-style combine if this kernel is reused beyond the input stage.
    inv_std = jax.lax.rsqrt(var + EPS)
    g = jnp.pad(gamma.astype(jnp.float32), (0, Cout_p - C_out))
    b = jnp.pad(beta.astype(jnp.float32), (0, Cout_p - C_out))
    scale = (g * inv_std).reshape(1, Cout_p)
    bias = (b - mean * g * inv_std).reshape(1, Cout_p)

    # Pass B: purely HBM-bound, so use big (multi-image when possible) blocks.  Its
    # output IS the next stage's conv-ready activation (no inter-stage wrapper ops).
    TRB = _largest_divisor_leq(M, max(1, 4096 // W))
    out = pl.pallas_call(
        bn_relu_kernel,
        grid=(M // TRB,),
        out_shape=jax.ShapeDtypeStruct((M, W, Cout_p), out_dtype),
        in_specs=[
            pl.BlockSpec((TRB, W, Cout_p), lambda i: (i, 0, 0)),
            pl.BlockSpec((1, Cout_p), lambda i: (0, 0)),
            pl.BlockSpec((1, Cout_p), lambda i: (0, 0)),
        ],
        out_specs=pl.BlockSpec((TRB, W, Cout_p), lambda i: (i, 0, 0)),
        compiler_params=pltpu.CompilerParams(
            dimension_semantics=("parallel",)),
    )(y_raw, scale, bias)
    return out


# ---------------------------------------------------------------------------
# InDoubleConv forward (NCHW in, NCHW out — mirrors the PyTorch module)
# ---------------------------------------------------------------------------
@jax.jit
def in_double_conv(x_nchw, w1, g1, b1, w2, g2, b2):
    N, C_in, H, W = x_nchw.shape
    C2 = int(w2.shape[0])
    Cin_p = _round_up(int(C_in), 8)

    # Input-side plumbing (once): NCHW -> NHWC, cast to bf16 BEFORE padding, channel
    # pad to a multiple of 8, flatten batch*height so both stages share one layout.
    a0 = jnp.transpose(x_nchw, (0, 2, 3, 1)).astype(jnp.bfloat16)
    a0 = jnp.pad(a0, ((0, 0), (0, 0), (0, 0), (0, Cin_p - int(C_in))))
    a0 = a0.reshape(N * H, W, Cin_p)

    a1 = conv_bn_relu_stage(a0, w1, g1, b1, N, H, W, jnp.bfloat16)  # feeds stage 2
    a2 = conv_bn_relu_stage(a1, w2, g2, b2, N, H, W, jnp.float32)   # final, f32

    out = a2[..., :C2].reshape(N, H, W, C2)
    return jnp.transpose(out, (0, 3, 1, 2))


# ---------------------------------------------------------------------------
# Pure-JAX reference (bf16 conv operands, f32 accumulate, train-mode BN)
# ---------------------------------------------------------------------------
def reference(x_nchw, w1, g1, b1, w2, g2, b2):
    def conv(x, w):
        return jax.lax.conv_general_dilated(
            x.astype(jnp.bfloat16), w.astype(jnp.bfloat16),
            window_strides=(1, 1), padding="SAME",
            dimension_numbers=("NCHW", "OIHW", "NCHW"),
            preferred_element_type=jnp.float32)

    def bn_relu(y, g, b):
        mean = y.mean(axis=(0, 2, 3), keepdims=True)
        var = ((y - mean) ** 2).mean(axis=(0, 2, 3), keepdims=True)
        yn = (y - mean) * jax.lax.rsqrt(var + EPS)
        yn = yn * g.reshape(1, -1, 1, 1) + b.reshape(1, -1, 1, 1)
        return jnp.maximum(yn, 0.0)

    y1 = bn_relu(conv(x_nchw, w1), g1, b1)
    return bn_relu(conv(y1, w2), g2, b2)


if __name__ == "__main__":
    key = jax.random.PRNGKey(0)
    N, C_in, C_out, H, W = 2, 4, 8, 16, 16

    k_x, k_w1, k_w2, k_g1, k_b1, k_g2, k_b2 = jax.random.split(key, 7)
    x = jax.random.normal(k_x, (N, C_in, H, W), dtype=jnp.float32)

    w1 = jax.random.normal(k_w1, (C_out, C_in, 3, 3), jnp.float32) / np.sqrt(C_in * 9)
    w2 = jax.random.normal(k_w2, (C_out, C_out, 3, 3), jnp.float32) / np.sqrt(C_out * 9)
    g1 = 1.0 + 0.1 * jax.random.normal(k_g1, (C_out,), jnp.float32)
    b1 = 0.1 * jax.random.normal(k_b1, (C_out,), jnp.float32)
    g2 = 1.0 + 0.1 * jax.random.normal(k_g2, (C_out,), jnp.float32)
    b2 = 0.1 * jax.random.normal(k_b2, (C_out,), jnp.float32)

    out = jax.block_until_ready(in_double_conv(x, w1, g1, b1, w2, g2, b2))
    assert out.shape == (N, C_out, H, W), out.shape

    ref = jax.block_until_ready(jax.jit(reference)(x, w1, g1, b1, w2, g2, b2))
    # Tolerance covers the bf16 storage of the stage-1 conv output (requested by the
    # perf review) plus bf16-operand rounding differences between the packed-tap
    # matmul and XLA's conv; typical max |diff| lands well under 1e-2.
    np.testing.assert_allclose(np.asarray(out), np.asarray(ref),
                               rtol=2e-2, atol=2e-2)
    print("KERNEL_OK")
</pallas_src>

<mosaic_0001>
module attributes {stable_mosaic.version = 11 : i64} {
  func.func @bn_relu_kernel(%arg0: i32, %arg1: memref<32x16x8xbf16, #tpu.memory_space<vmem>>, %arg2: memref<1x8xf32, #tpu.memory_space<vmem>>, %arg3: memref<1x8xf32, #tpu.memory_space<vmem>>, %arg4: memref<32x16x8xf32, #tpu.memory_space<vmem>>) attributes {dimension_semantics = [#tpu.dimension_semantics<parallel>], iteration_bounds = array<i64: 1>, scalar_prefetch = 0 : i64, scratch_operands = 0 : i64, tpu.core_type = #tpu.core_type<tc>, window_params = [{transform_indices = @transform_0, window_bounds = array<i64: 32, 16, 8>}, {pipeline_mode = #tpu.pipeline_mode<synchronous>, transform_indices = @transform_1, window_bounds = array<i64: 1, 8>}, {pipeline_mode = #tpu.pipeline_mode<synchronous>, transform_indices = @transform_2, window_bounds = array<i64: 1, 8>}, {transform_indices = @transform_3, window_bounds = array<i64: 32, 16, 8>}]} {
    %c0 = arith.constant 0 : index
    %c0_0 = arith.constant 0 : index
    %c0_1 = arith.constant 0 : index
    %0 = vector.load %arg1[%c0, %c0_0, %c0_1] : memref<32x16x8xbf16, #tpu.memory_space<vmem>>, vector<32x16x8xbf16>
    %1 = arith.extf %0 : vector<32x16x8xbf16> to vector<32x16x8xf32>
    %c0_2 = arith.constant 0 : index
    %c0_3 = arith.constant 0 : index
    %2 = vector.load %arg2[%c0_2, %c0_3] : memref<1x8xf32, #tpu.memory_space<vmem>>, vector<1x8xf32>
    %3 = vector.shape_cast %2 : vector<1x8xf32> to vector<1x1x8xf32>
    %4 = vector.broadcast %3 : vector<1x1x8xf32> to vector<32x16x8xf32>
    %5 = arith.mulf %1, %4 : vector<32x16x8xf32>
    %c0_4 = arith.constant 0 : index
    %c0_5 = arith.constant 0 : index
    %6 = vector.load %arg3[%c0_4, %c0_5] : memref<1x8xf32, #tpu.memory_space<vmem>>, vector<1x8xf32>
    %7 = vector.shape_cast %6 : vector<1x8xf32> to vector<1x1x8xf32>
    %8 = vector.broadcast %7 : vector<1x1x8xf32> to vector<32x16x8xf32>
    %9 = arith.addf %5, %8 : vector<32x16x8xf32>
    %cst = arith.constant 0.000000e+00 : f32
    %10 = vector.broadcast %cst : f32 to vector<32x16x8xf32>
    %11 = arith.maximumf %9, %10 : vector<32x16x8xf32>
    %c0_6 = arith.constant 0 : index
    %c0_7 = arith.constant 0 : index
    %c0_8 = arith.constant 0 : index
    %12 = vector.load %arg4[%c0_6, %c0_7, %c0_8] : memref<32x16x8xf32, #tpu.memory_space<vmem>>, vector<32x16x8xf32>
    tpu.vector_store %arg4[%c0_6, %c0_7, %c0_8], %11 {strides = array<i32>} : memref<32x16x8xf32, #tpu.memory_space<vmem>>, vector<32x16x8xf32>,
    return
  }
  func.func @transform_0(%arg0: i32) -> (i32, i32, i32) {
    %c0_i32 = arith.constant 0 : i32
    %c0_i32_0 = arith.constant 0 : i32
    %c0_i32_1 = arith.constant 0 : i32
    return %arg0, %c0_i32, %c0_i32_0 : i32, i32, i32
  }
  func.func @transform_1(%arg0: i32) -> (i32, i32) {
    %c0_i32 = arith.constant 0 : i32
    %c0_i32_0 = arith.constant 0 : i32
    %c0_i32_1 = arith.constant 0 : i32
    return %c0_i32, %c0_i32_0 : i32, i32
  }
  func.func @transform_2(%arg0: i32) -> (i32, i32) {
    %c0_i32 = arith.constant 0 : i32
    %c0_i32_0 = arith.constant 0 : i32
    %c0_i32_1 = arith.constant 0 : i32
    return %c0_i32, %c0_i32_0 : i32, i32
  }
  func.func @transform_3(%arg0: i32) -> (i32, i32, i32) {
    %c0_i32 = arith.constant 0 : i32
    %c0_i32_0 = arith.constant 0 : i32
    %c0_i32_1 = arith.constant 0 : i32
    return %arg0, %c0_i32, %c0_i32_0 : i32, i32, i32
  }
}

module attributes {stable_mosaic.version = 11 : i64} {
  func.func @conv_stats_kernel(%arg0: i32, %arg1: i32, %arg2: memref<16x16x8xbf16, #tpu.memory_space<vmem>>, %arg3: memref<1x16x8xbf16, #tpu.memory_space<vmem>>, %arg4: memref<1x16x8xbf16, #tpu.memory_space<vmem>>, %arg5: memref<72x8xbf16, #tpu.memory_space<vmem>>, %arg6: memref<16x16x8xbf16, #tpu.memory_space<vmem>>, %arg7: memref<1x8x8xf32, #tpu.memory_space<vmem>>) attributes {dimension_semantics = [#tpu.dimension_semantics<parallel>, #tpu.dimension_semantics<parallel>], iteration_bounds = array<i64: 2, 1>, scalar_prefetch = 0 : i64, scratch_operands = 0 : i64, tpu.core_type = #tpu.core_type<tc>, window_params = [{transform_indices = @transform_0, window_bounds = array<i64: 16, 16, 8>}, {transform_indices = @transform_1, window_bounds = array<i64: 1, 16, 8>}, {transform_indices = @transform_2, window_bounds = array<i64: 1, 16, 8>}, {pipeline_mode = #tpu.pipeline_mode<synchronous>, transform_indices = @transform_3, window_bounds = array<i64: 72, 8>}, {transform_indices = @transform_4, window_bounds = array<i64: 16, 16, 8>}, {transform_indices = @transform_5, window_bounds = array<i64: 1, 8, 8>}]} {
    %c0 = arith.constant 0 : index
    %c0_0 = arith.constant 0 : index
    %c0_1 = arith.constant 0 : index
    %0 = vector.load %arg3[%c0, %c0_0, %c0_1] : memref<1x16x8xbf16, #tpu.memory_space<vmem>>, vector<1x16x8xbf16>
    %c0_2 = arith.constant 0 : index
    %c0_3 = arith.constant 0 : index
    %c0_4 = arith.constant 0 : index
    %1 = vector.load %arg4[%c0_2, %c0_3, %c0_4] : memref<1x16x8xbf16, #tpu.memory_space<vmem>>, vector<1x16x8xbf16>
    %c0_i32 = arith.constant 0 : i32
    %2 = arith.cmpi sgt, %arg1, %c0_i32 : i32
    %cst = arith.constant 0.000000e+00 : bf16
    %3 = vector.broadcast %cst : bf16 to vector<1x16x8xbf16>
    %4 = arith.select %2, %0, %3 : vector<1x16x8xbf16>
    %c0_i32_5 = arith.constant 0 : i32
    %5 = arith.cmpi slt, %arg1, %c0_i32_5 : i32
    %cst_6 = arith.constant 0.000000e+00 : bf16
    %6 = vector.broadcast %cst_6 : bf16 to vector<1x16x8xbf16>
    %7 = arith.select %5, %1, %6 : vector<1x16x8xbf16>
    %c0_7 = arith.constant 0 : index
    %c0_8 = arith.constant 0 : index
    %c0_9 = arith.constant 0 : index
    %8 = vector.load %arg2[%c0_7, %c0_8, %c0_9] : memref<16x16x8xbf16, #tpu.memory_space<vmem>>, vector<16x16x8xbf16>
    %9 = tpu.concatenate %4, %8, %7 in 0 : vector<1x16x8xbf16>, vector<16x16x8xbf16>, vector<1x16x8xbf16> -> vector<18x16x8xbf16>
    %cst_10 = arith.constant 0.000000e+00 : bf16
    %10 = vector.broadcast %cst_10 : bf16 to vector<18x1x8xbf16>
    %11 = tpu.concatenate %10, %9, %10 in 1 : vector<18x1x8xbf16>, vector<18x16x8xbf16>, vector<18x1x8xbf16> -> vector<18x18x8xbf16>
    %12 = vector.extract_strided_slice %11 {offsets = [0, 0, 0], sizes = [16, 16, 8], strides = [1, 1, 1]} : vector<18x18x8xbf16> to vector<16x16x8xbf16>
    %13 = vector.extract_strided_slice %11 {offsets = [0, 1, 0], sizes = [16, 16, 8], strides = [1, 1, 1]} : vector<18x18x8xbf16> to vector<16x16x8xbf16>
    %14 = vector.extract_strided_slice %11 {offsets = [0, 2, 0], sizes = [16, 16, 8], strides = [1, 1, 1]} : vector<18x18x8xbf16> to vector<16x16x8xbf16>
    %15 = vector.extract_strided_slice %11 {offsets = [1, 0, 0], sizes = [16, 16, 8], strides = [1, 1, 1]} : vector<18x18x8xbf16> to vector<16x16x8xbf16>
    %16 = vector.extract_strided_slice %11 {offsets = [1, 1, 0], sizes = [16, 16, 8], strides = [1, 1, 1]} : vector<18x18x8xbf16> to vector<16x16x8xbf16>
    %17 = vector.extract_strided_slice %11 {offsets = [1, 2, 0], sizes = [16, 16, 8], strides = [1, 1, 1]} : vector<18x18x8xbf16> to vector<16x16x8xbf16>
    %18 = vector.extract_strided_slice %11 {offsets = [2, 0, 0], sizes = [16, 16, 8], strides = [1, 1, 1]} : vector<18x18x8xbf16> to vector<16x16x8xbf16>
    %19 = vector.extract_strided_slice %11 {offsets = [2, 1, 0], sizes = [16, 16, 8], strides = [1, 1, 1]} : vector<18x18x8xbf16> to vector<16x16x8xbf16>
    %20 = vector.extract_strided_slice %11 {offsets = [2, 2, 0], sizes = [16, 16, 8], strides = [1, 1, 1]} : vector<18x18x8xbf16> to vector<16x16x8xbf16>
    %21 = tpu.concatenate %12, %13, %14, %15, %16, %17, %18, %19, %20 in 2 : vector<16x16x8xbf16>, vector<16x16x8xbf16>, vector<16x16x8xbf16>, vector<16x16x8xbf16>, vector<16x16x8xbf16>, vector<16x16x8xbf16>, vector<16x16x8xbf16>, vector<16x16x8xbf16>, vector<16x16x8xbf16> -> vector<16x16x72xbf16>
    %22 = vector.shape_cast %21 : vector<16x16x72xbf16> to vector<256x72xbf16>
    %c0_11 = arith.constant 0 : index
    %c0_12 = arith.constant 0 : index
    %23 = vector.load %arg5[%c0_11, %c0_12] : memref<72x8xbf16, #tpu.memory_space<vmem>>, vector<72x8xbf16>
    %cst_13 = arith.constant dense<0.000000e+00> : vector<256x8xf32>
    %24 = tpu.matmul %22, %23, %cst_13 {dimension_numbers = #tpu.dot_dimension_numbers<[1], [0], [0], [1], [0, 0, 1, 1], [], []>} : vector<256x72xbf16>, vector<72x8xbf16>, vector<256x8xf32> -> vector<256x8xf32>
    %25 = vector.shape_cast %24 : vector<256x8xf32> to vector<16x16x8xf32>
    %26 = arith.truncf %25 : vector<16x16x8xf32> to vector<16x16x8xbf16>
    %c0_14 = arith.constant 0 : index
    %c0_15 = arith.constant 0 : index
    %c0_16 = arith.constant 0 : index
    %27 = vector.load %arg6[%c0_14, %c0_15, %c0_16] : memref<16x16x8xbf16, #tpu.memory_space<vmem>>, vector<16x16x8xbf16>
    tpu.vector_store %arg6[%c0_14, %c0_15, %c0_16], %26 {strides = array<i32>} : memref<16x16x8xbf16, #tpu.memory_space<vmem>>, vector<16x16x8xbf16>,
    %cst_17 = arith.constant dense<0.000000e+00> : vector<8xf32>
    %28 = vector.multi_reduction <add>, %24, %cst_17 [0] : vector<256x8xf32> to vector<8xf32>
    %29 = vector.shape_cast %28 : vector<8xf32> to vector<1x8xf32>
    %30 = arith.mulf %24, %24 : vector<256x8xf32>
    %cst_18 = arith.constant dense<0.000000e+00> : vector<8xf32>
    %31 = vector.multi_reduction <add>, %30, %cst_18 [0] : vector<256x8xf32> to vector<8xf32>
    %32 = vector.shape_cast %31 : vector<8xf32> to vector<1x8xf32>
    %cst_19 = arith.constant 0.000000e+00 : f32
    %33 = vector.broadcast %cst_19 : f32 to vector<6x8xf32>
    %34 = tpu.concatenate %29, %32, %33 in 0 : vector<1x8xf32>, vector<1x8xf32>, vector<6x8xf32> -> vector<8x8xf32>
    %c0_20 = arith.constant 0 : index
    %c0_21 = arith.constant 0 : index
    %c0_22 = arith.constant 0 : index
    %35 = vector.load %arg7[%c0_20, %c0_21, %c0_22] : memref<1x8x8xf32, #tpu.memory_space<vmem>>, vector<1x8x8xf32>
    %36 = vector.shape_cast %35 : vector<1x8x8xf32> to vector<8x8xf32>
    %37 = vector.shape_cast %34 : vector<8x8xf32> to vector<1x8x8xf32>
    tpu.vector_store %arg7[%c0_20, %c0_21, %c0_22], %37 {strides = array<i32>} : memref<1x8x8xf32, #tpu.memory_space<vmem>>, vector<1x8x8xf32>,
    return
  }
  func.func @transform_0(%arg0: i32, %arg1: i32) -> (i32, i32, i32) {
    %c1_i32 = arith.constant 1 : i32
    %0 = arith.muli %arg0, %c1_i32 : i32
    %1 = arith.addi %0, %arg1 : i32
    %c0_i32 = arith.constant 0 : i32
    %c0_i32_0 = arith.constant 0 : i32
    %c0_i32_1 = arith.constant 0 : i32
    return %1, %c0_i32, %c0_i32_0 : i32, i32, i32
  }
  func.func @transform_1(%arg0: i32, %arg1: i32) -> (i32, i32, i32) {
    %c16_i32 = arith.constant 16 : i32
    %0 = arith.muli %arg0, %c16_i32 : i32
    %c16_i32_0 = arith.constant 16 : i32
    %1 = arith.muli %arg1, %c16_i32_0 : i32
    %2 = arith.addi %0, %1 : i32
    %c1_i32 = arith.constant 1 : i32
    %3 = arith.subi %2, %c1_i32 : i32
    %c0_i32 = arith.constant 0 : i32
    %4 = arith.maxsi %3, %c0_i32 : i32
    %c0_i32_1 = arith.constant 0 : i32
    %c0_i32_2 = arith.constant 0 : i32
    %c0_i32_3 = arith.constant 0 : i32
    return %4, %c0_i32_1, %c0_i32_2 : i32, i32, i32
  }
  func.func @transform_2(%arg0: i32, %arg1: i32) -> (i32, i32, i32) {
    %c16_i32 = arith.constant 16 : i32
    %0 = arith.muli %arg0, %c16_i32 : i32
    %c1_i32 = arith.constant 1 : i32
    %1 = arith.addi %arg1, %c1_i32 : i32
    %c16_i32_0 = arith.constant 16 : i32
    %2 = arith.muli %1, %c16_i32_0 : i32
    %3 = arith.addi %0, %2 : i32
    %c31_i32 = arith.constant 31 : i32
    %4 = arith.minsi %3, %c31_i32 : i32
    %c0_i32 = arith.constant 0 : i32
    %c0_i32_1 = arith.constant 0 : i32
    %c0_i32_2 = arith.constant 0 : i32
    return %4, %c0_i32, %c0_i32_1 : i32, i32, i32
  }
  func.func @transform_3(%arg0: i32, %arg1: i32) -> (i32, i32) {
    %c0_i32 = arith.constant 0 : i32
    %c0_i32_0 = arith.constant 0 : i32
    %c0_i32_1 = arith.constant 0 : i32
    return %c0_i32, %c0_i32_0 : i32, i32
  }
  func.func @transform_4(%arg0: i32, %arg1: i32) -> (i32, i32, i32) {
    %c1_i32 = arith.constant 1 : i32
    %0 = arith.muli %arg0, %c1_i32 : i32
    %1 = arith.addi %0, %arg1 : i32
    %c0_i32 = arith.constant 0 : i32
    %c0_i32_0 = arith.constant 0 : i32
    %c0_i32_1 = arith.constant 0 : i32
    return %1, %c0_i32, %c0_i32_0 : i32, i32, i32
  }
  func.func @transform_5(%arg0: i32, %arg1: i32) -> (i32, i32, i32) {
    %c1_i32 = arith.constant 1 : i32
    %0 = arith.muli %arg0, %c1_i32 : i32
    %1 = arith.addi %0, %arg1 : i32
    %c0_i32 = arith.constant 0 : i32
    %c0_i32_0 = arith.constant 0 : i32
    %c0_i32_1 = arith.constant 0 : i32
    return %1, %c0_i32, %c0_i32_0 : i32, i32, i32
  }
}

module attributes {stable_mosaic.version = 11 : i64} {
  func.func @bn_relu_kernel(%arg0: i32, %arg1: memref<32x16x8xbf16, #tpu.memory_space<vmem>>, %arg2: memref<1x8xf32, #tpu.memory_space<vmem>>, %arg3: memref<1x8xf32, #tpu.memory_space<vmem>>, %arg4: memref<32x16x8xbf16, #tpu.memory_space<vmem>>) attributes {dimension_semantics = [#tpu.dimension_semantics<parallel>], iteration_bounds = array<i64: 1>, scalar_prefetch = 0 : i64, scratch_operands = 0 : i64, tpu.core_type = #tpu.core_type<tc>, window_params = [{transform_indices = @transform_0, window_bounds = array<i64: 32, 16, 8>}, {pipeline_mode = #tpu.pipeline_mode<synchronous>, transform_indices = @transform_1, window_bounds = array<i64: 1, 8>}, {pipeline_mode = #tpu.pipeline_mode<synchronous>, transform_indices = @transform_2, window_bounds = array<i64: 1, 8>}, {transform_indices = @transform_3, window_bounds = array<i64: 32, 16, 8>}]} {
    %c0 = arith.constant 0 : index
    %c0_0 = arith.constant 0 : index
    %c0_1 = arith.constant 0 : index
    %0 = vector.load %arg1[%c0, %c0_0, %c0_1] : memref<32x16x8xbf16, #tpu.memory_space<vmem>>, vector<32x16x8xbf16>
    %1 = arith.extf %0 : vector<32x16x8xbf16> to vector<32x16x8xf32>
    %c0_2 = arith.constant 0 : index
    %c0_3 = arith.constant 0 : index
    %2 = vector.load %arg2[%c0_2, %c0_3] : memref<1x8xf32, #tpu.memory_space<vmem>>, vector<1x8xf32>
    %3 = vector.shape_cast %2 : vector<1x8xf32> to vector<1x1x8xf32>
    %4 = vector.broadcast %3 : vector<1x1x8xf32> to vector<32x16x8xf32>
    %5 = arith.mulf %1, %4 : vector<32x16x8xf32>
    %c0_4 = arith.constant 0 : index
    %c0_5 = arith.constant 0 : index
    %6 = vector.load %arg3[%c0_4, %c0_5] : memref<1x8xf32, #tpu.memory_space<vmem>>, vector<1x8xf32>
    %7 = vector.shape_cast %6 : vector<1x8xf32> to vector<1x1x8xf32>
    %8 = vector.broadcast %7 : vector<1x1x8xf32> to vector<32x16x8xf32>
    %9 = arith.addf %5, %8 : vector<32x16x8xf32>
    %cst = arith.constant 0.000000e+00 : f32
    %10 = vector.broadcast %cst : f32 to vector<32x16x8xf32>
    %11 = arith.maximumf %9, %10 : vector<32x16x8xf32>
    %12 = arith.truncf %11 : vector<32x16x8xf32> to vector<32x16x8xbf16>
    %c0_6 = arith.constant 0 : index
    %c0_7 = arith.constant 0 : index
    %c0_8 = arith.constant 0 : index
    %13 = vector.load %arg4[%c0_6, %c0_7, %c0_8] : memref<32x16x8xbf16, #tpu.memory_space<vmem>>, vector<32x16x8xbf16>
    tpu.vector_store %arg4[%c0_6, %c0_7, %c0_8], %12 {strides = array<i32>} : memref<32x16x8xbf16, #tpu.memory_space<vmem>>, vector<32x16x8xbf16>,
    return
  }
  func.func @transform_0(%arg0: i32) -> (i32, i32, i32) {
    %c0_i32 = arith.constant 0 : i32
    %c0_i32_0 = arith.constant 0 : i32
    %c0_i32_1 = arith.constant 0 : i32
    return %arg0, %c0_i32, %c0_i32_0 : i32, i32, i32
  }
  func.func @transform_1(%arg0: i32) -> (i32, i32) {
    %c0_i32 = arith.constant 0 : i32
    %c0_i32_0 = arith.constant 0 : i32
    %c0_i32_1 = arith.constant 0 : i32
    return %c0_i32, %c0_i32_0 : i32, i32
  }
  func.func @transform_2(%arg0: i32) -> (i32, i32) {
    %c0_i32 = arith.constant 0 : i32
    %c0_i32_0 = arith.constant 0 : i32
    %c0_i32_1 = arith.constant 0 : i32
    return %c0_i32, %c0_i32_0 : i32, i32
  }
  func.func @transform_3(%arg0: i32) -> (i32, i32, i32) {
    %c0_i32 = arith.constant 0 : i32
    %c0_i32_0 = arith.constant 0 : i32
    %c0_i32_1 = arith.constant 0 : i32
    return %arg0, %c0_i32, %c0_i32_0 : i32, i32, i32
  }
}

</mosaic_0001>

<bundles_post_ra>
// kernel: in_double_conv.5
= control target key start
LH: loop header
LB: loop body
LE: loop exit
PB: predicated region body
PF: predicated region fallthrough
CT: control target
= control target key end

     0   :  { %vm604_vm0 = vcmask 60416   ;;  %s1472_s0 = inlined_call_operand.vmem [shape: bf16[32,16,8], index: 0, kind: input, shape index: {}]   ;;  %s1473_s1 = inlined_call_operand.vmem [shape: f32[1,8], index: 1, kind: input, shape index: {}]   ;;  %s1474_s2 = inlined_call_operand.vmem [shape: f32[1,8], index: 2, kind: input, shape index: {}]   ;;  %s1475_s3 = inlined_call_operand.vmem [shape: bf16[32,16,8], index: 3, kind: output, shape index: {}]  }
   0x1   :  { %v804_v0 = vld [vmem:[%s1472_s0] sm:$0xff]   ;;  %v931_v4 = vld [vmem:[%s1472_s0 + $0x8] sm:$0xff]   ;;  %v932_v5 = vld [vmem:[%s1472_s0 + $0x10] sm:$0xff]  }
   0x2   :  { %v988_v1 = vld [vmem:[%s1473_s1] ss:$0 sm:$0xff]  ;;  %v805_v2 = vunpack.c.l.bf16 %v804_v0  ;;  %v806_v3 = vunpack.c.h.bf16 %v804_v0  ;;  %v933_v6 = vld [vmem:[%s1472_s0 + $0x18] sm:$0xff]   ;;  %v809_v8 = vunpack.c.l.bf16 %v931_v4  ;;  %v810_v9 = vunpack.c.h.bf16 %v931_v4  ;;  %v935_v41 = vld [vmem:[%s1472_s0 + $0x28] sm:$0xff]  }
   0x3   :  { %v1002_v7 = vld [vmem:[%s1474_s2] ss:$0 sm:$0xff]  ;;  %v813_v10 = vunpack.c.l.bf16 %v932_v5  ;;  %v814_v11 = vunpack.c.h.bf16 %v932_v5  ;;  %v817_v14 = vunpack.c.l.bf16 %v933_v6  ;;  %v818_v15 = vunpack.c.h.bf16 %v933_v6  ;;  %v936_v42 = vld [vmem:[%s1472_s0 + $0x30] sm:$0xff]   ;;  %v937_v47 = vld [vmem:[%s1472_s0 + $0x38] sm:$0xff]  }
   0x4   :  { %v149_v12 = vmul.f32 %v805_v2, %v988_v1  ;;  %v150_v13 = vmul.f32 %v806_v3, %v988_v1  ;;  %v151_v16 = vmul.f32 %v809_v8, %v988_v1  ;;  %v152_v17 = vmul.f32 %v810_v9, %v988_v1  ;;  %v934_v36 = vld [vmem:[%s1472_s0 + $0x20] sm:$0xff]  }
   0x5   :  { %v153_v18 = vmul.f32 %v813_v10, %v988_v1  ;;  %v154_v19 = vmul.f32 %v814_v11, %v988_v1  ;;  %v155_v22 = vmul.f32 %v817_v14, %v988_v1  ;;  %v156_v23 = vmul.f32 %v818_v15, %v988_v1 }
   0x6   :  { %v220_v20 = vadd.f32 %v1002_v7, %v149_v12  ;;  %v221_v21 = vadd.f32 %v1002_v7, %v150_v13  ;;  %v222_v24 = vadd.f32 %v1002_v7, %v151_v16  ;;  %v223_v25 = vadd.f32 %v1002_v7, %v152_v17 }
   0x7   :  { %v224_v26 = vadd.f32 %v1002_v7, %v153_v18  ;;  %v225_v27 = vadd.f32 %v1002_v7, %v154_v19  ;;  %v226_v30 = vadd.f32 %v1002_v7, %v155_v22  ;;  %v227_v31 = vadd.f32 %v1002_v7, %v156_v23  ;;  %v938_v18 = vld [vmem:[%s1472_s0 + $0x40] sm:$0xff]   ;;  %v939_v23 = vld [vmem:[%s1472_s0 + $0x48] sm:$0xff]  }
   0x8   :  { %v284_v28 = vmax.f32 %v220_v20, 0.0  ;;  %v285_v29 = vmax.f32 %v221_v21, 0.0  ;;  %v286_v32 = vmax.f32 %v222_v24, 0.0  ;;  %v287_v33 = vmax.f32 %v223_v25, 0.0  ;;  %v940_v24 = vld [vmem:[%s1472_s0 + $0x50] sm:$0xff]  }
   0x9   :  { %v288_v34 = vmax.f32 %v224_v26, 0.0  ;;  %v289_v35 = vmax.f32 %v225_v27, 0.0  ;;  %v290_v39 = vmax.f32 %v226_v30, 0.0  ;;  %v291_v40 = vmax.f32 %v227_v31, 0.0 }
   0xa   :  { %v739_v37 = vpack.c.bf16 %v284_v28, %v284_v28  ;;  %v740_v38 = vpack.c.bf16 %v285_v29, %v285_v29  ;;  %v741_v43 = vpack.c.bf16 %v286_v32, %v286_v32  ;;  %v742_v44 = vpack.c.bf16 %v287_v33, %v287_v33  ;;  %v941_v29 = vld [vmem:[%s1472_s0 + $0x58] sm:$0xff]  }
   0xb   :  { %v743_v45 = vpack.c.bf16 %v288_v34, %v288_v34  ;;  %v744_v46 = vpack.c.bf16 %v289_v35, %v289_v35  ;;  %v745_v48 = vpack.c.bf16 %v290_v39, %v290_v39  ;;  %v746_v49 = vpack.c.bf16 %v291_v40, %v291_v40 }
   0xc   :  { %605 = vst.msk [vmem:[%s1475_s3] sm:$0xf] %vm604_vm0, %v739_v37  ;;  %606 = vst.msk [vmem:[%s1475_s3 + $0x4] sm:$0xf] %vm604_vm0, %v740_v38  ;;  %v821_v50 = vunpack.c.l.bf16 %v934_v36  ;;  %v822_v51 = vunpack.c.h.bf16 %v934_v36  ;;  %v825_v52 = vunpack.c.l.bf16 %v935_v41  ;;  %v826_v53 = vunpack.c.h.bf16 %v935_v41 }
   0xd   :  { %607 = vst.msk [vmem:[%s1475_s3 + $0x8] sm:$0xf] %vm604_vm0, %v741_v43  ;;  %608 = vst.msk [vmem:[%s1475_s3 + $0xc] sm:$0xf] %vm604_vm0, %v742_v44  ;;  %v829_v54 = vunpack.c.l.bf16 %v936_v42  ;;  %v830_v55 = vunpack.c.h.bf16 %v936_v42  ;;  %v833_v58 = vunpack.c.l.bf16 %v937_v47  ;;  %v834_v59 = vunpack.c.h.bf16 %v937_v47 }
   0xe   :  { %609 = vst.msk [vmem:[%s1475_s3 + $0x10] sm:$0xf] %vm604_vm0, %v743_v45  ;;  %610 = vst.msk [vmem:[%s1475_s3 + $0x14] sm:$0xf] %vm604_vm0, %v744_v46  ;;  %v157_v56 = vmul.f32 %v821_v50, %v988_v1  ;;  %v158_v57 = vmul.f32 %v822_v51, %v988_v1  ;;  %v159_v60 = vmul.f32 %v825_v52, %v988_v1  ;;  %v837_v32 = vunpack.c.l.bf16 %v938_v18 }
   0xf   :  { %611 = vst.msk [vmem:[%s1475_s3 + $0x18] sm:$0xf] %vm604_vm0, %v745_v48  ;;  %612 = vst.msk [vmem:[%s1475_s3 + $0x1c] sm:$0xf] %vm604_vm0, %v746_v49  ;;  %v160_v61 = vmul.f32 %v826_v53, %v988_v1  ;;  %v161_v62 = vmul.f32 %v829_v54, %v988_v1  ;;  %v162_v63 = vmul.f32 %v830_v55, %v988_v1  ;;  %v838_v33 = vunpack.c.h.bf16 %v938_v18 }
  0x10   :  { %v228_v0 = vadd.f32 %v1002_v7, %v157_v56  ;;  %v229_v2 = vadd.f32 %v1002_v7, %v158_v57  ;;  %v163_v3 = vmul.f32 %v833_v58, %v988_v1  ;;  %v164_v4 = vmul.f32 %v834_v59, %v988_v1 }
  0x11   :  { %v230_v5 = vadd.f32 %v1002_v7, %v159_v60  ;;  %v231_v6 = vadd.f32 %v1002_v7, %v160_v61  ;;  %v232_v8 = vadd.f32 %v1002_v7, %v161_v62  ;;  %v233_v9 = vadd.f32 %v1002_v7, %v162_v63  ;;  %v942_v62 = vld [vmem:[%s1472_s0 + $0x60] sm:$0xff]  }
  0x12   :  { %v292_v10 = vmax.f32 %v228_v0, 0.0  ;;  %v293_v11 = vmax.f32 %v229_v2, 0.0  ;;  %v234_v12 = vadd.f32 %v1002_v7, %v163_v3  ;;  %v235_v13 = vadd.f32 %v1002_v7, %v164_v4  ;;  %v943_v4 = vld [vmem:[%s1472_s0 + $0x68] sm:$0xff]  }
  0x13   :  { %v294_v14 = vmax.f32 %v230_v5, 0.0  ;;  %v295_v15 = vmax.f32 %v231_v6, 0.0  ;;  %v296_v16 = vmax.f32 %v232_v8, 0.0  ;;  %v297_v17 = vmax.f32 %v233_v9, 0.0  ;;  %v944_v5 = vld [vmem:[%s1472_s0 + $0x70] sm:$0xff]  }
  0x14   :  { %v747_v19 = vpack.c.bf16 %v292_v10, %v292_v10  ;;  %v748_v20 = vpack.c.bf16 %v293_v11, %v293_v11  ;;  %v298_v21 = vmax.f32 %v234_v12, 0.0  ;;  %v299_v22 = vmax.f32 %v235_v13, 0.0  ;;  %v945_v11 = vld [vmem:[%s1472_s0 + $0x78] sm:$0xff]  }
  0x15   :  { %v749_v25 = vpack.c.bf16 %v294_v14, %v294_v14  ;;  %v750_v26 = vpack.c.bf16 %v295_v15, %v295_v15  ;;  %v751_v27 = vpack.c.bf16 %v296_v16, %v296_v16  ;;  %v752_v28 = vpack.c.bf16 %v297_v17, %v297_v17 }
  0x16   :  { %613 = vst.msk [vmem:[%s1475_s3 + $0x20] sm:$0xf] %vm604_vm0, %v747_v19  ;;  %614 = vst.msk [vmem:[%s1475_s3 + $0x24] sm:$0xf] %vm604_vm0, %v748_v20  ;;  %v753_v30 = vpack.c.bf16 %v298_v21, %v298_v21  ;;  %v754_v31 = vpack.c.bf16 %v299_v22, %v299_v22  ;;  %v841_v34 = vunpack.c.l.bf16 %v939_v23  ;;  %v842_v35 = vunpack.c.h.bf16 %v939_v23 }
  0x17   :  { %615 = vst.msk [vmem:[%s1475_s3 + $0x28] sm:$0xf] %vm604_vm0, %v749_v25  ;;  %616 = vst.msk [vmem:[%s1475_s3 + $0x2c] sm:$0xf] %vm604_vm0, %v750_v26  ;;  %v845_v36 = vunpack.c.l.bf16 %v940_v24  ;;  %v846_v37 = vunpack.c.h.bf16 %v940_v24  ;;  %v165_v38 = vmul.f32 %v837_v32, %v988_v1  ;;  %v166_v39 = vmul.f32 %v838_v33, %v988_v1 }
  0x18   :  { %617 = vst.msk [vmem:[%s1475_s3 + $0x30] sm:$0xf] %vm604_vm0, %v751_v27  ;;  %618 = vst.msk [vmem:[%s1475_s3 + $0x34] sm:$0xf] %vm604_vm0, %v752_v28  ;;  %v849_v40 = vunpack.c.l.bf16 %v941_v29  ;;  %v850_v41 = vunpack.c.h.bf16 %v941_v29  ;;  %v167_v42 = vmul.f32 %v841_v34, %v988_v1  ;;  %v168_v43 = vmul.f32 %v842_v35, %v988_v1 }
  0x19   :  { %619 = vst.msk [vmem:[%s1475_s3 + $0x38] sm:$0xf] %vm604_vm0, %v753_v30  ;;  %620 = vst.msk [vmem:[%s1475_s3 + $0x3c] sm:$0xf] %vm604_vm0, %v754_v31  ;;  %v169_v44 = vmul.f32 %v845_v36, %v988_v1  ;;  %v170_v45 = vmul.f32 %v846_v37, %v988_v1  ;;  %v236_v46 = vadd.f32 %v1002_v7, %v165_v38  ;;  %v853_v14 = vunpack.c.l.bf16 %v942_v62 }
  0x1a   :  { %v237_v47 = vadd.f32 %v1002_v7, %v166_v39  ;;  %v171_v48 = vmul.f32 %v849_v40, %v988_v1  ;;  %v172_v49 = vmul.f32 %v850_v41, %v988_v1  ;;  %v238_v50 = vadd.f32 %v1002_v7, %v167_v42 }
  0x1b   :  { %v239_v51 = vadd.f32 %v1002_v7, %v168_v43  ;;  %v240_v52 = vadd.f32 %v1002_v7, %v169_v44  ;;  %v241_v53 = vadd.f32 %v1002_v7, %v170_v45  ;;  %v300_v54 = vmax.f32 %v236_v46, 0.0  ;;  %v946_v44 = vld [vmem:[%s1472_s0 + $0x80] sm:$0xff]  }
  0x1c   :  { %v301_v55 = vmax.f32 %v237_v47, 0.0  ;;  %v242_v56 = vadd.f32 %v1002_v7, %v171_v48  ;;  %v243_v57 = vadd.f32 %v1002_v7, %v172_v49  ;;  %v302_v58 = vmax.f32 %v238_v50, 0.0  ;;  %v947_v49 = vld [vmem:[%s1472_s0 + $0x88] sm:$0xff]   ;;  %v948_v50 = vld [vmem:[%s1472_s0 + $0x90] sm:$0xff]  }
  0x1d   :  { %v303_v59 = vmax.f32 %v239_v51, 0.0  ;;  %v304_v60 = vmax.f32 %v240_v52, 0.0  ;;  %v305_v61 = vmax.f32 %v241_v53, 0.0  ;;  %v755_v63 = vpack.c.bf16 %v300_v54, %v300_v54 }
  0x1e   :  { %v756_v0 = vpack.c.bf16 %v301_v55, %v301_v55  ;;  %v306_v2 = vmax.f32 %v242_v56, 0.0  ;;  %v307_v3 = vmax.f32 %v243_v57, 0.0  ;;  %v757_v6 = vpack.c.bf16 %v302_v58, %v302_v58  ;;  %v949_v55 = vld [vmem:[%s1472_s0 + $0x98] sm:$0xff]  }
  0x1f   :  { %v758_v8 = vpack.c.bf16 %v303_v59, %v303_v59  ;;  %v759_v9 = vpack.c.bf16 %v304_v60, %v304_v60  ;;  %v760_v10 = vpack.c.bf16 %v305_v61, %v305_v61  ;;  %621 = vst.msk [vmem:[%s1475_s3 + $0x40] sm:$0xf] %vm604_vm0, %v755_v63  ;;  %v854_v15 = vunpack.c.h.bf16 %v942_v62 }
  0x20   :  { %622 = vst.msk [vmem:[%s1475_s3 + $0x44] sm:$0xf] %vm604_vm0, %v756_v0  ;;  %v761_v12 = vpack.c.bf16 %v306_v2, %v306_v2  ;;  %v762_v13 = vpack.c.bf16 %v307_v3, %v307_v3  ;;  %623 = vst.msk [vmem:[%s1475_s3 + $0x48] sm:$0xf] %vm604_vm0, %v757_v6  ;;  %v857_v16 = vunpack.c.l.bf16 %v943_v4  ;;  %v858_v17 = vunpack.c.h.bf16 %v943_v4 }
  0x21   :  { %624 = vst.msk [vmem:[%s1475_s3 + $0x4c] sm:$0xf] %vm604_vm0, %v758_v8  ;;  %625 = vst.msk [vmem:[%s1475_s3 + $0x50] sm:$0xf] %vm604_vm0, %v759_v9  ;;  %v861_v18 = vunpack.c.l.bf16 %v944_v5  ;;  %v862_v19 = vunpack.c.h.bf16 %v944_v5  ;;  %v173_v20 = vmul.f32 %v853_v14, %v988_v1  ;;  %v174_v21 = vmul.f32 %v854_v15, %v988_v1 }
  0x22   :  { %626 = vst.msk [vmem:[%s1475_s3 + $0x54] sm:$0xf] %vm604_vm0, %v760_v10  ;;  %627 = vst.msk [vmem:[%s1475_s3 + $0x58] sm:$0xf] %vm604_vm0, %v761_v12  ;;  %v865_v22 = vunpack.c.l.bf16 %v945_v11  ;;  %v866_v23 = vunpack.c.h.bf16 %v945_v11  ;;  %v175_v24 = vmul.f32 %v857_v16, %v988_v1  ;;  %v176_v25 = vmul.f32 %v858_v17, %v988_v1 }
  0x23   :  { %628 = vst.msk [vmem:[%s1475_s3 + $0x5c] sm:$0xf] %vm604_vm0, %v762_v13  ;;  %v177_v26 = vmul.f32 %v861_v18, %v988_v1  ;;  %v178_v27 = vmul.f32 %v862_v19, %v988_v1  ;;  %v244_v28 = vadd.f32 %v1002_v7, %v173_v20  ;;  %v245_v29 = vadd.f32 %v1002_v7, %v174_v21 }
  0x24   :  { %v179_v30 = vmul.f32 %v865_v22, %v988_v1  ;;  %v180_v31 = vmul.f32 %v866_v23, %v988_v1  ;;  %v246_v32 = vadd.f32 %v1002_v7, %v175_v24  ;;  %v247_v33 = vadd.f32 %v1002_v7, %v176_v25 }
  0x25   :  { %v248_v34 = vadd.f32 %v1002_v7, %v177_v26  ;;  %v249_v35 = vadd.f32 %v1002_v7, %v178_v27  ;;  %v308_v36 = vmax.f32 %v244_v28, 0.0  ;;  %v309_v37 = vmax.f32 %v245_v29, 0.0  ;;  %v950_v26 = vld [vmem:[%s1472_s0 + $0xa0] sm:$0xff]  }
  0x26   :  { %v250_v38 = vadd.f32 %v1002_v7, %v179_v30  ;;  %v251_v39 = vadd.f32 %v1002_v7, %v180_v31  ;;  %v310_v40 = vmax.f32 %v246_v32, 0.0  ;;  %v311_v41 = vmax.f32 %v247_v33, 0.0  ;;  %v951_v31 = vld [vmem:[%s1472_s0 + $0xa8] sm:$0xff]   ;;  %v952_v32 = vld [vmem:[%s1472_s0 + $0xb0] sm:$0xff]  }
  0x27   :  { %v312_v42 = vmax.f32 %v248_v34, 0.0  ;;  %v313_v43 = vmax.f32 %v249_v35, 0.0  ;;  %v763_v45 = vpack.c.bf16 %v308_v36, %v308_v36  ;;  %v764_v46 = vpack.c.bf16 %v309_v37, %v309_v37  ;;  %v953_v37 = vld [vmem:[%s1472_s0 + $0xb8] sm:$0xff]  }
  0x28   :  { %v314_v47 = vmax.f32 %v250_v38, 0.0  ;;  %v315_v48 = vmax.f32 %v251_v39, 0.0  ;;  %v765_v51 = vpack.c.bf16 %v310_v40, %v310_v40  ;;  %v766_v52 = vpack.c.bf16 %v311_v41, %v311_v41 }
  0x29   :  { %v767_v53 = vpack.c.bf16 %v312_v42, %v312_v42  ;;  %v768_v54 = vpack.c.bf16 %v313_v43, %v313_v43  ;;  %629 = vst.msk [vmem:[%s1475_s3 + $0x60] sm:$0xf] %vm604_vm0, %v763_v45  ;;  %630 = vst.msk [vmem:[%s1475_s3 + $0x64] sm:$0xf] %vm604_vm0, %v764_v46  ;;  %v869_v58 = vunpack.c.l.bf16 %v946_v44  ;;  %v870_v59 = vunpack.c.h.bf16 %v946_v44 }
  0x2a   :  { %v769_v56 = vpack.c.bf16 %v314_v47, %v314_v47  ;;  %v770_v57 = vpack.c.bf16 %v315_v48, %v315_v48  ;;  %631 = vst.msk [vmem:[%s1475_s3 + $0x68] sm:$0xf] %vm604_vm0, %v765_v51  ;;  %632 = vst.msk [vmem:[%s1475_s3 + $0x6c] sm:$0xf] %vm604_vm0, %v766_v52  ;;  %v873_v60 = vunpack.c.l.bf16 %v947_v49  ;;  %v874_v61 = vunpack.c.h.bf16 %v947_v49 }
  0x2b   :  { %633 = vst.msk [vmem:[%s1475_s3 + $0x70] sm:$0xf] %vm604_vm0, %v767_v53  ;;  %634 = vst.msk [vmem:[%s1475_s3 + $0x74] sm:$0xf] %vm604_vm0, %v768_v54  ;;  %v877_v62 = vunpack.c.l.bf16 %v948_v50  ;;  %v878_v63 = vunpack.c.h.bf16 %v948_v50  ;;  %v181_v0 = vmul.f32 %v869_v58, %v988_v1  ;;  %v182_v2 = vmul.f32 %v870_v59, %v988_v1 }
  0x2c   :  { %635 = vst.msk [vmem:[%s1475_s3 + $0x78] sm:$0xf] %vm604_vm0, %v769_v56  ;;  %636 = vst.msk [vmem:[%s1475_s3 + $0x7c] sm:$0xf] %vm604_vm0, %v770_v57  ;;  %v881_v3 = vunpack.c.l.bf16 %v949_v55  ;;  %v882_v4 = vunpack.c.h.bf16 %v949_v55  ;;  %v183_v5 = vmul.f32 %v873_v60, %v988_v1  ;;  %v184_v6 = vmul.f32 %v874_v61, %v988_v1 }
  0x2d   :  { %v185_v8 = vmul.f32 %v877_v62, %v988_v1  ;;  %v186_v9 = vmul.f32 %v878_v63, %v988_v1  ;;  %v252_v10 = vadd.f32 %v1002_v7, %v181_v0  ;;  %v253_v11 = vadd.f32 %v1002_v7, %v182_v2 }
  0x2e   :  { %v187_v12 = vmul.f32 %v881_v3, %v988_v1  ;;  %v188_v13 = vmul.f32 %v882_v4, %v988_v1  ;;  %v254_v14 = vadd.f32 %v1002_v7, %v183_v5  ;;  %v255_v15 = vadd.f32 %v1002_v7, %v184_v6 }
  0x2f   :  { %v256_v16 = vadd.f32 %v1002_v7, %v185_v8  ;;  %v257_v17 = vadd.f32 %v1002_v7, %v186_v9  ;;  %v316_v18 = vmax.f32 %v252_v10, 0.0  ;;  %v317_v19 = vmax.f32 %v253_v11, 0.0  ;;  %v954_v8 = vld [vmem:[%s1472_s0 + $0xc0] sm:$0xff]  }
  0x30   :  { %v258_v20 = vadd.f32 %v1002_v7, %v187_v12  ;;  %v259_v21 = vadd.f32 %v1002_v7, %v188_v13  ;;  %v318_v22 = vmax.f32 %v254_v14, 0.0  ;;  %v319_v23 = vmax.f32 %v255_v15, 0.0  ;;  %v955_v13 = vld [vmem:[%s1472_s0 + $0xc8] sm:$0xff]   ;;  %v956_v14 = vld [vmem:[%s1472_s0 + $0xd0] sm:$0xff]  }
  0x31   :  { %v320_v24 = vmax.f32 %v256_v16, 0.0  ;;  %v321_v25 = vmax.f32 %v257_v17, 0.0  ;;  %v771_v27 = vpack.c.bf16 %v316_v18, %v316_v18  ;;  %v772_v28 = vpack.c.bf16 %v317_v19, %v317_v19  ;;  %v957_v19 = vld [vmem:[%s1472_s0 + $0xd8] sm:$0xff]  }
  0x32   :  { %v322_v29 = vmax.f32 %v258_v20, 0.0  ;;  %v323_v30 = vmax.f32 %v259_v21, 0.0  ;;  %v773_v33 = vpack.c.bf16 %v318_v22, %v318_v22  ;;  %v774_v34 = vpack.c.bf16 %v319_v23, %v319_v23 }
  0x33   :  { %v775_v35 = vpack.c.bf16 %v320_v24, %v320_v24  ;;  %v776_v36 = vpack.c.bf16 %v321_v25, %v321_v25  ;;  %637 = vst.msk [vmem:[%s1475_s3 + $0x80] sm:$0xf] %vm604_vm0, %v771_v27  ;;  %638 = vst.msk [vmem:[%s1475_s3 + $0x84] sm:$0xf] %vm604_vm0, %v772_v28  ;;  %v885_v40 = vunpack.c.l.bf16 %v950_v26  ;;  %v886_v41 = vunpack.c.h.bf16 %v950_v26 }
  0x34   :  { %v777_v38 = vpack.c.bf16 %v322_v29, %v322_v29  ;;  %v778_v39 = vpack.c.bf16 %v323_v30, %v323_v30  ;;  %639 = vst.msk [vmem:[%s1475_s3 + $0x88] sm:$0xf] %vm604_vm0, %v773_v33  ;;  %640 = vst.msk [vmem:[%s1475_s3 + $0x8c] sm:$0xf] %vm604_vm0, %v774_v34  ;;  %v889_v42 = vunpack.c.l.bf16 %v951_v31  ;;  %v890_v43 = vunpack.c.h.bf16 %v951_v31 }
  0x35   :  { %641 = vst.msk [vmem:[%s1475_s3 + $0x90] sm:$0xf] %vm604_vm0, %v775_v35  ;;  %642 = vst.msk [vmem:[%s1475_s3 + $0x94] sm:$0xf] %vm604_vm0, %v776_v36  ;;  %v893_v44 = vunpack.c.l.bf16 %v952_v32  ;;  %v894_v45 = vunpack.c.h.bf16 %v952_v32  ;;  %v189_v46 = vmul.f32 %v885_v40, %v988_v1  ;;  %v190_v47 = vmul.f32 %v886_v41, %v988_v1 }
  0x36   :  { %643 = vst.msk [vmem:[%s1475_s3 + $0x98] sm:$0xf] %vm604_vm0, %v777_v38  ;;  %644 = vst.msk [vmem:[%s1475_s3 + $0x9c] sm:$0xf] %vm604_vm0, %v778_v39  ;;  %v897_v48 = vunpack.c.l.bf16 %v953_v37  ;;  %v898_v49 = vunpack.c.h.bf16 %v953_v37  ;;  %v191_v50 = vmul.f32 %v889_v42, %v988_v1  ;;  %v192_v51 = vmul.f32 %v890_v43, %v988_v1 }
  0x37   :  { %v193_v52 = vmul.f32 %v893_v44, %v988_v1  ;;  %v194_v53 = vmul.f32 %v894_v45, %v988_v1  ;;  %v260_v54 = vadd.f32 %v1002_v7, %v189_v46  ;;  %v261_v55 = vadd.f32 %v1002_v7, %v190_v47 }
  0x38   :  { %v195_v56 = vmul.f32 %v897_v48, %v988_v1  ;;  %v196_v57 = vmul.f32 %v898_v49, %v988_v1  ;;  %v262_v58 = vadd.f32 %v1002_v7, %v191_v50  ;;  %v263_v59 = vadd.f32 %v1002_v7, %v192_v51 }
  0x39   :  { %v264_v60 = vadd.f32 %v1002_v7, %v193_v52  ;;  %v265_v61 = vadd.f32 %v1002_v7, %v194_v53  ;;  %v324_v62 = vmax.f32 %v260_v54, 0.0  ;;  %v325_v63 = vmax.f32 %v261_v55, 0.0  ;;  %v958_v52 = vld [vmem:[%s1472_s0 + $0xe0] sm:$0xff]  }
  0x3a   :  { %v266_v0 = vadd.f32 %v1002_v7, %v195_v56  ;;  %v267_v2 = vadd.f32 %v1002_v7, %v196_v57  ;;  %v326_v3 = vmax.f32 %v262_v58, 0.0  ;;  %v327_v4 = vmax.f32 %v263_v59, 0.0  ;;  %v959_v57 = vld [vmem:[%s1472_s0 + $0xe8] sm:$0xff]   ;;  %v960_v58 = vld [vmem:[%s1472_s0 + $0xf0] sm:$0xff]  }
  0x3b   :  { %v328_v5 = vmax.f32 %v264_v60, 0.0  ;;  %v329_v6 = vmax.f32 %v265_v61, 0.0  ;;  %v779_v9 = vpack.c.bf16 %v324_v62, %v324_v62  ;;  %v780_v10 = vpack.c.bf16 %v325_v63, %v325_v63  ;;  %v961_v63 = vld [vmem:[%s1472_s0 + $0xf8] sm:$0xff]  }
  0x3c   :  { %v330_v11 = vmax.f32 %v266_v0, 0.0  ;;  %v331_v12 = vmax.f32 %v267_v2, 0.0  ;;  %v781_v15 = vpack.c.bf16 %v326_v3, %v326_v3  ;;  %v782_v16 = vpack.c.bf16 %v327_v4, %v327_v4 }
  0x3d   :  { %v783_v17 = vpack.c.bf16 %v328_v5, %v328_v5  ;;  %v784_v18 = vpack.c.bf16 %v329_v6, %v329_v6  ;;  %645 = vst.msk [vmem:[%s1475_s3 + $0xa0] sm:$0xf] %vm604_vm0, %v779_v9  ;;  %646 = vst.msk [vmem:[%s1475_s3 + $0xa4] sm:$0xf] %vm604_vm0, %v780_v10  ;;  %v901_v22 = vunpack.c.l.bf16 %v954_v8  ;;  %v902_v23 = vunpack.c.h.bf16 %v954_v8 }
  0x3e   :  { %v785_v20 = vpack.c.bf16 %v330_v11, %v330_v11  ;;  %v786_v21 = vpack.c.bf16 %v331_v12, %v331_v12  ;;  %647 = vst.msk [vmem:[%s1475_s3 + $0xa8] sm:$0xf] %vm604_vm0, %v781_v15  ;;  %648 = vst.msk [vmem:[%s1475_s3 + $0xac] sm:$0xf] %vm604_vm0, %v782_v16  ;;  %v905_v24 = vunpack.c.l.bf16 %v955_v13  ;;  %v906_v25 = vunpack.c.h.bf16 %v955_v13 }
  0x3f   :  { %649 = vst.msk [vmem:[%s1475_s3 + $0xb0] sm:$0xf] %vm604_vm0, %v783_v17  ;;  %650 = vst.msk [vmem:[%s1475_s3 + $0xb4] sm:$0xf] %vm604_vm0, %v784_v18  ;;  %v909_v26 = vunpack.c.l.bf16 %v956_v14  ;;  %v910_v27 = vunpack.c.h.bf16 %v956_v14  ;;  %v197_v28 = vmul.f32 %v901_v22, %v988_v1  ;;  %v198_v29 = vmul.f32 %v902_v23, %v988_v1 }
  0x40   :  { %651 = vst.msk [vmem:[%s1475_s3 + $0xb8] sm:$0xf] %vm604_vm0, %v785_v20  ;;  %652 = vst.msk [vmem:[%s1475_s3 + $0xbc] sm:$0xf] %vm604_vm0, %v786_v21  ;;  %v913_v30 = vunpack.c.l.bf16 %v957_v19  ;;  %v914_v31 = vunpack.c.h.bf16 %v957_v19  ;;  %v199_v32 = vmul.f32 %v905_v24, %v988_v1  ;;  %v200_v33 = vmul.f32 %v906_v25, %v988_v1 }
  0x41   :  { %v201_v34 = vmul.f32 %v909_v26, %v988_v1  ;;  %v202_v35 = vmul.f32 %v910_v27, %v988_v1  ;;  %v268_v36 = vadd.f32 %v1002_v7, %v197_v28  ;;  %v269_v37 = vadd.f32 %v1002_v7, %v198_v29 }
  0x42   :  { %v203_v38 = vmul.f32 %v913_v30, %v988_v1  ;;  %v204_v39 = vmul.f32 %v914_v31, %v988_v1  ;;  %v270_v40 = vadd.f32 %v1002_v7, %v199_v32  ;;  %v271_v41 = vadd.f32 %v1002_v7, %v200_v33 }
  0x43   :  { %v272_v42 = vadd.f32 %v1002_v7, %v201_v34  ;;  %v273_v43 = vadd.f32 %v1002_v7, %v202_v35  ;;  %v332_v44 = vmax.f32 %v268_v36, 0.0  ;;  %v333_v45 = vmax.f32 %v269_v37, 0.0 }
  0x44   :  { %v274_v46 = vadd.f32 %v1002_v7, %v203_v38  ;;  %v275_v47 = vadd.f32 %v1002_v7, %v204_v39  ;;  %v334_v48 = vmax.f32 %v270_v40, 0.0  ;;  %v335_v49 = vmax.f32 %v271_v41, 0.0 }
  0x45   :  { %v336_v50 = vmax.f32 %v272_v42, 0.0  ;;  %v337_v51 = vmax.f32 %v273_v43, 0.0  ;;  %v787_v53 = vpack.c.bf16 %v332_v44, %v332_v44  ;;  %v788_v54 = vpack.c.bf16 %v333_v45, %v333_v45 }
  0x46   :  { %v338_v55 = vmax.f32 %v274_v46, 0.0  ;;  %v339_v56 = vmax.f32 %v275_v47, 0.0  ;;  %v789_v59 = vpack.c.bf16 %v334_v48, %v334_v48  ;;  %v790_v60 = vpack.c.bf16 %v335_v49, %v335_v49 }
  0x47   :  { %v791_v61 = vpack.c.bf16 %v336_v50, %v336_v50  ;;  %v792_v62 = vpack.c.bf16 %v337_v51, %v337_v51  ;;  %653 = vst.msk [vmem:[%s1475_s3 + $0xc0] sm:$0xf] %vm604_vm0, %v787_v53  ;;  %654 = vst.msk [vmem:[%s1475_s3 + $0xc4] sm:$0xf] %vm604_vm0, %v788_v54  ;;  %v917_v3 = vunpack.c.l.bf16 %v958_v52  ;;  %v918_v4 = vunpack.c.h.bf16 %v958_v52 }
  0x48   :  { %v793_v0 = vpack.c.bf16 %v338_v55, %v338_v55  ;;  %v794_v2 = vpack.c.bf16 %v339_v56, %v339_v56  ;;  %655 = vst.msk [vmem:[%s1475_s3 + $0xc8] sm:$0xf] %vm604_vm0, %v789_v59  ;;  %656 = vst.msk [vmem:[%s1475_s3 + $0xcc] sm:$0xf] %vm604_vm0, %v790_v60  ;;  %v921_v5 = vunpack.c.l.bf16 %v959_v57  ;;  %v922_v6 = vunpack.c.h.bf16 %v959_v57 }
  0x49   :  { %657 = vst.msk [vmem:[%s1475_s3 + $0xd0] sm:$0xf] %vm604_vm0, %v791_v61  ;;  %658 = vst.msk [vmem:[%s1475_s3 + $0xd4] sm:$0xf] %vm604_vm0, %v792_v62  ;;  %v925_v8 = vunpack.c.l.bf16 %v960_v58  ;;  %v926_v9 = vunpack.c.h.bf16 %v960_v58  ;;  %v205_v10 = vmul.f32 %v917_v3, %v988_v1  ;;  %v206_v11 = vmul.f32 %v918_v4, %v988_v1 }
  0x4a   :  { %659 = vst.msk [vmem:[%s1475_s3 + $0xd8] sm:$0xf] %vm604_vm0, %v793_v0  ;;  %660 = vst.msk [vmem:[%s1475_s3 + $0xdc] sm:$0xf] %vm604_vm0, %v794_v2  ;;  %v929_v12 = vunpack.c.l.bf16 %v961_v63  ;;  %v930_v13 = vunpack.c.h.bf16 %v961_v63  ;;  %v207_v14 = vmul.f32 %v921_v5, %v988_v1  ;;  %v208_v15 = vmul.f32 %v922_v6, %v988_v1 }
  0x4b   :  { %v209_v16 = vmul.f32 %v925_v8, %v988_v1  ;;  %v210_v17 = vmul.f32 %v926_v9, %v988_v1  ;;  %v276_v18 = vadd.f32 %v1002_v7, %v205_v10  ;;  %v277_v19 = vadd.f32 %v1002_v7, %v206_v11 }
  0x4c   :  { %v211_v20 = vmul.f32 %v929_v12, %v988_v1  ;;  %v212_v21 = vmul.f32 %v930_v13, %v988_v1  ;;  %v278_v22 = vadd.f32 %v1002_v7, %v207_v14  ;;  %v279_v23 = vadd.f32 %v1002_v7, %v208_v15 }
  0x4d   :  { %v280_v24 = vadd.f32 %v1002_v7, %v209_v16  ;;  %v281_v25 = vadd.f32 %v1002_v7, %v210_v17  ;;  %v340_v26 = vmax.f32 %v276_v18, 0.0  ;;  %v341_v27 = vmax.f32 %v277_v19, 0.0 }
  0x4e   :  { %v282_v28 = vadd.f32 %v1002_v7, %v211_v20  ;;  %v283_v29 = vadd.f32 %v1002_v7, %v212_v21  ;;  %v342_v30 = vmax.f32 %v278_v22, 0.0  ;;  %v343_v31 = vmax.f32 %v279_v23, 0.0 }
  0x4f   :  { %v344_v32 = vmax.f32 %v280_v24, 0.0  ;;  %v345_v33 = vmax.f32 %v281_v25, 0.0  ;;  %v795_v34 = vpack.c.bf16 %v340_v26, %v340_v26  ;;  %v796_v1 = vpack.c.bf16 %v341_v27, %v341_v27 }
  0x50   :  { %v346_v35 = vmax.f32 %v282_v28, 0.0  ;;  %v347_v36 = vmax.f32 %v283_v29, 0.0  ;;  %v797_v37 = vpack.c.bf16 %v342_v30, %v342_v30  ;;  %v798_v38 = vpack.c.bf16 %v343_v31, %v343_v31 }
  0x51   :  { %v799_v39 = vpack.c.bf16 %v344_v32, %v344_v32  ;;  %v800_v40 = vpack.c.bf16 %v345_v33, %v345_v33  ;;  %661 = vst.msk [vmem:[%s1475_s3 + $0xe0] sm:$0xf] %vm604_vm0, %v795_v34  ;;  %662 = vst.msk [vmem:[%s1475_s3 + $0xe4] sm:$0xf] %vm604_vm0, %v796_v1 }
  0x52   :  { %v801_v7 = vpack.c.bf16 %v346_v35, %v346_v35  ;;  %v802_v41 = vpack.c.bf16 %v347_v36, %v347_v36  ;;  %663 = vst.msk [vmem:[%s1475_s3 + $0xe8] sm:$0xf] %vm604_vm0, %v797_v37  ;;  %664 = vst.msk [vmem:[%s1475_s3 + $0xec] sm:$0xf] %vm604_vm0, %v798_v38 }
  0x53   :  { %665 = vst.msk [vmem:[%s1475_s3 + $0xf0] sm:$0xf] %vm604_vm0, %v799_v39  ;;  %666 = vst.msk [vmem:[%s1475_s3 + $0xf4] sm:$0xf] %vm604_vm0, %v800_v40 }
  0x54   :  { %667 = vst.msk [vmem:[%s1475_s3 + $0xf8] sm:$0xf] %vm604_vm0, %v801_v7  ;;  %668 = vst.msk [vmem:[%s1475_s3 + $0xfc] sm:$0xf] %vm604_vm0, %v802_v41 }

// kernel: in_double_conv.7
= control target key start
LH: loop header
LB: loop body
LE: loop exit
PB: predicated region body
PF: predicated region fallthrough
CT: control target
= control target key end

     0   :  { %vm348_vm0 = vcmask 64512   ;;  %s1088_s0 = inlined_call_operand.vmem [shape: bf16[32,16,8], index: 0, kind: input, shape index: {}]   ;;  %s1089_s1 = inlined_call_operand.vmem [shape: f32[1,8], index: 1, kind: input, shape index: {}]   ;;  %s1090_s2 = inlined_call_operand.vmem [shape: f32[1,8], index: 2, kind: input, shape index: {}]   ;;  %s1091_s3 = inlined_call_operand.vmem [shape: f32[32,16,8], index: 3, kind: output, shape index: {}]  }
   0x1   :  { %v420_v0 = vld [vmem:[%s1088_s0] sm:$0xff]   ;;  %v547_v4 = vld [vmem:[%s1088_s0 + $0x8] sm:$0xff]   ;;  %v548_v5 = vld [vmem:[%s1088_s0 + $0x10] sm:$0xff]  }
   0x2   :  { %v604_v1 = vld [vmem:[%s1089_s1] ss:$0 sm:$0xff]  ;;  %v421_v2 = vunpack.c.l.bf16 %v420_v0  ;;  %v422_v3 = vunpack.c.h.bf16 %v420_v0  ;;  %v549_v6 = vld [vmem:[%s1088_s0 + $0x18] sm:$0xff]   ;;  %v425_v8 = vunpack.c.l.bf16 %v547_v4  ;;  %v426_v9 = vunpack.c.h.bf16 %v547_v4  ;;  %v551_v33 = vld [vmem:[%s1088_s0 + $0x28] sm:$0xff]  }
   0x3   :  { %v618_v7 = vld [vmem:[%s1090_s2] ss:$0 sm:$0xff]  ;;  %v429_v10 = vunpack.c.l.bf16 %v548_v5  ;;  %v430_v11 = vunpack.c.h.bf16 %v548_v5  ;;  %v433_v14 = vunpack.c.l.bf16 %v549_v6  ;;  %v434_v15 = vunpack.c.h.bf16 %v549_v6  ;;  %v552_v34 = vld [vmem:[%s1088_s0 + $0x30] sm:$0xff]   ;;  %v553_v39 = vld [vmem:[%s1088_s0 + $0x38] sm:$0xff]  }
   0x4   :  { %v149_v12 = vmul.f32 %v421_v2, %v604_v1  ;;  %v150_v13 = vmul.f32 %v422_v3, %v604_v1  ;;  %v151_v16 = vmul.f32 %v425_v8, %v604_v1  ;;  %v152_v17 = vmul.f32 %v426_v9, %v604_v1  ;;  %v550_v28 = vld [vmem:[%s1088_s0 + $0x20] sm:$0xff]   ;;  %v555_v6 = vld [vmem:[%s1088_s0 + $0x48] sm:$0xff]   ;;  %v556_v8 = vld [vmem:[%s1088_s0 + $0x50] sm:$0xff]  }
   0x5   :  { %v153_v18 = vmul.f32 %v429_v10, %v604_v1  ;;  %v154_v19 = vmul.f32 %v430_v11, %v604_v1  ;;  %v155_v22 = vmul.f32 %v433_v14, %v604_v1  ;;  %v156_v23 = vmul.f32 %v434_v15, %v604_v1  ;;  %v554_v0 = vld [vmem:[%s1088_s0 + $0x40] sm:$0xff]  }
   0x6   :  { %v220_v20 = vadd.f32 %v618_v7, %v149_v12  ;;  %v221_v21 = vadd.f32 %v618_v7, %v150_v13  ;;  %v222_v24 = vadd.f32 %v618_v7, %v151_v16  ;;  %v223_v25 = vadd.f32 %v618_v7, %v152_v17  ;;  %v557_v13 = vld [vmem:[%s1088_s0 + $0x58] sm:$0xff]  }
   0x7   :  { %v224_v26 = vadd.f32 %v618_v7, %v153_v18  ;;  %v225_v27 = vadd.f32 %v618_v7, %v154_v19  ;;  %v226_v31 = vadd.f32 %v618_v7, %v155_v22  ;;  %v227_v32 = vadd.f32 %v618_v7, %v156_v23 }
   0x8   :  { %v284_v29 = vmax.f32 %v220_v20, 0.0  ;;  %v285_v30 = vmax.f32 %v221_v21, 0.0  ;;  %v286_v35 = vmax.f32 %v222_v24, 0.0  ;;  %v287_v36 = vmax.f32 %v223_v25, 0.0 }
   0x9   :  { %v288_v37 = vmax.f32 %v224_v26, 0.0  ;;  %v289_v38 = vmax.f32 %v225_v27, 0.0  ;;  %v290_v40 = vmax.f32 %v226_v31, 0.0  ;;  %v291_v41 = vmax.f32 %v227_v32, 0.0 }
   0xa   :  { %349 = vst.msk [vmem:[%s1091_s3] sm:$0xff] %vm348_vm0, %v284_v29  ;;  %350 = vst.msk [vmem:[%s1091_s3 + $0x8] sm:$0xff] %vm348_vm0, %v285_v30  ;;  %v437_v42 = vunpack.c.l.bf16 %v550_v28  ;;  %v438_v43 = vunpack.c.h.bf16 %v550_v28  ;;  %v441_v44 = vunpack.c.l.bf16 %v551_v33  ;;  %v442_v45 = vunpack.c.h.bf16 %v551_v33 }
   0xb   :  { %351 = vst.msk [vmem:[%s1091_s3 + $0x10] sm:$0xff] %vm348_vm0, %v286_v35  ;;  %352 = vst.msk [vmem:[%s1091_s3 + $0x18] sm:$0xff] %vm348_vm0, %v287_v36  ;;  %v445_v46 = vunpack.c.l.bf16 %v552_v34  ;;  %v446_v47 = vunpack.c.h.bf16 %v552_v34  ;;  %v449_v50 = vunpack.c.l.bf16 %v553_v39  ;;  %v450_v51 = vunpack.c.h.bf16 %v553_v39 }
   0xc   :  { %353 = vst.msk [vmem:[%s1091_s3 + $0x20] sm:$0xff] %vm348_vm0, %v288_v37  ;;  %354 = vst.msk [vmem:[%s1091_s3 + $0x28] sm:$0xff] %vm348_vm0, %v289_v38  ;;  %v157_v48 = vmul.f32 %v437_v42, %v604_v1  ;;  %v158_v49 = vmul.f32 %v438_v43, %v604_v1  ;;  %v159_v52 = vmul.f32 %v441_v44, %v604_v1  ;;  %v453_v16 = vunpack.c.l.bf16 %v554_v0  ;;  %v558_v38 = vld [vmem:[%s1088_s0 + $0x60] sm:$0xff]   ;;  %v559_v43 = vld [vmem:[%s1088_s0 + $0x68] sm:$0xff]  }
   0xd   :  { %355 = vst.msk [vmem:[%s1091_s3 + $0x30] sm:$0xff] %vm348_vm0, %v290_v40  ;;  %356 = vst.msk [vmem:[%s1091_s3 + $0x38] sm:$0xff] %vm348_vm0, %v291_v41  ;;  %v160_v53 = vmul.f32 %v442_v45, %v604_v1  ;;  %v161_v54 = vmul.f32 %v445_v46, %v604_v1  ;;  %v162_v55 = vmul.f32 %v446_v47, %v604_v1  ;;  %v454_v17 = vunpack.c.h.bf16 %v554_v0  ;;  %v560_v44 = vld [vmem:[%s1088_s0 + $0x70] sm:$0xff]  }
   0xe   :  { %v228_v56 = vadd.f32 %v618_v7, %v157_v48  ;;  %v229_v57 = vadd.f32 %v618_v7, %v158_v49  ;;  %v163_v58 = vmul.f32 %v449_v50, %v604_v1  ;;  %v164_v59 = vmul.f32 %v450_v51, %v604_v1  ;;  %v561_v49 = vld [vmem:[%s1088_s0 + $0x78] sm:$0xff]  }
   0xf   :  { %v230_v60 = vadd.f32 %v618_v7, %v159_v52  ;;  %v231_v61 = vadd.f32 %v618_v7, %v160_v53  ;;  %v232_v62 = vadd.f32 %v618_v7, %v161_v54  ;;  %v233_v63 = vadd.f32 %v618_v7, %v162_v55 }
  0x10   :  { %v292_v2 = vmax.f32 %v228_v56, 0.0  ;;  %v293_v3 = vmax.f32 %v229_v57, 0.0  ;;  %v234_v4 = vadd.f32 %v618_v7, %v163_v58  ;;  %v235_v5 = vadd.f32 %v618_v7, %v164_v59 }
  0x11   :  { %v294_v9 = vmax.f32 %v230_v60, 0.0  ;;  %v295_v10 = vmax.f32 %v231_v61, 0.0  ;;  %v296_v11 = vmax.f32 %v232_v62, 0.0  ;;  %v297_v12 = vmax.f32 %v233_v63, 0.0 }
  0x12   :  { %357 = vst.msk [vmem:[%s1091_s3 + $0x40] sm:$0xff] %vm348_vm0, %v292_v2  ;;  %358 = vst.msk [vmem:[%s1091_s3 + $0x48] sm:$0xff] %vm348_vm0, %v293_v3  ;;  %v298_v14 = vmax.f32 %v234_v4, 0.0  ;;  %v299_v15 = vmax.f32 %v235_v5, 0.0  ;;  %v457_v18 = vunpack.c.l.bf16 %v555_v6  ;;  %v458_v19 = vunpack.c.h.bf16 %v555_v6 }
  0x13   :  { %359 = vst.msk [vmem:[%s1091_s3 + $0x50] sm:$0xff] %vm348_vm0, %v294_v9  ;;  %360 = vst.msk [vmem:[%s1091_s3 + $0x58] sm:$0xff] %vm348_vm0, %v295_v10  ;;  %v461_v20 = vunpack.c.l.bf16 %v556_v8  ;;  %v462_v21 = vunpack.c.h.bf16 %v556_v8  ;;  %v165_v22 = vmul.f32 %v453_v16, %v604_v1  ;;  %v166_v23 = vmul.f32 %v454_v17, %v604_v1  ;;  %v563_v17 = vld [vmem:[%s1088_s0 + $0x88] sm:$0xff]  }
  0x14   :  { %361 = vst.msk [vmem:[%s1091_s3 + $0x60] sm:$0xff] %vm348_vm0, %v296_v11  ;;  %362 = vst.msk [vmem:[%s1091_s3 + $0x68] sm:$0xff] %vm348_vm0, %v297_v12  ;;  %v465_v24 = vunpack.c.l.bf16 %v557_v13  ;;  %v466_v25 = vunpack.c.h.bf16 %v557_v13  ;;  %v167_v26 = vmul.f32 %v457_v18, %v604_v1  ;;  %v168_v27 = vmul.f32 %v458_v19, %v604_v1  ;;  %v562_v12 = vld [vmem:[%s1088_s0 + $0x80] sm:$0xff]   ;;  %v564_v18 = vld [vmem:[%s1088_s0 + $0x90] sm:$0xff]  }
  0x15   :  { %363 = vst.msk [vmem:[%s1091_s3 + $0x70] sm:$0xff] %vm348_vm0, %v298_v14  ;;  %364 = vst.msk [vmem:[%s1091_s3 + $0x78] sm:$0xff] %vm348_vm0, %v299_v15  ;;  %v169_v28 = vmul.f32 %v461_v20, %v604_v1  ;;  %v170_v29 = vmul.f32 %v462_v21, %v604_v1  ;;  %v236_v30 = vadd.f32 %v618_v7, %v165_v22  ;;  %v469_v52 = vunpack.c.l.bf16 %v558_v38 }
  0x16   :  { %v237_v31 = vadd.f32 %v618_v7, %v166_v23  ;;  %v171_v32 = vmul.f32 %v465_v24, %v604_v1  ;;  %v172_v33 = vmul.f32 %v466_v25, %v604_v1  ;;  %v238_v34 = vadd.f32 %v618_v7, %v167_v26  ;;  %v565_v23 = vld [vmem:[%s1088_s0 + $0x98] sm:$0xff]  }
  0x17   :  { %v239_v35 = vadd.f32 %v618_v7, %v168_v27  ;;  %v240_v36 = vadd.f32 %v618_v7, %v169_v28  ;;  %v241_v37 = vadd.f32 %v618_v7, %v170_v29  ;;  %v300_v39 = vmax.f32 %v236_v30, 0.0 }
  0x18   :  { %v301_v40 = vmax.f32 %v237_v31, 0.0  ;;  %v242_v41 = vadd.f32 %v618_v7, %v171_v32  ;;  %v243_v42 = vadd.f32 %v618_v7, %v172_v33  ;;  %v302_v45 = vmax.f32 %v238_v34, 0.0 }
  0x19   :  { %v303_v46 = vmax.f32 %v239_v35, 0.0  ;;  %v304_v47 = vmax.f32 %v240_v36, 0.0  ;;  %v305_v48 = vmax.f32 %v241_v37, 0.0  ;;  %365 = vst.msk [vmem:[%s1091_s3 + $0x80] sm:$0xff] %vm348_vm0, %v300_v39  ;;  %v470_v53 = vunpack.c.h.bf16 %v558_v38 }
  0x1a   :  { %366 = vst.msk [vmem:[%s1091_s3 + $0x88] sm:$0xff] %vm348_vm0, %v301_v40  ;;  %v306_v50 = vmax.f32 %v242_v41, 0.0  ;;  %v307_v51 = vmax.f32 %v243_v42, 0.0  ;;  %367 = vst.msk [vmem:[%s1091_s3 + $0x90] sm:$0xff] %vm348_vm0, %v302_v45  ;;  %v473_v54 = vunpack.c.l.bf16 %v559_v43  ;;  %v474_v55 = vunpack.c.h.bf16 %v559_v43 }
  0x1b   :  { %368 = vst.msk [vmem:[%s1091_s3 + $0x98] sm:$0xff] %vm348_vm0, %v303_v46  ;;  %369 = vst.msk [vmem:[%s1091_s3 + $0xa0] sm:$0xff] %vm348_vm0, %v304_v47  ;;  %v477_v56 = vunpack.c.l.bf16 %v560_v44  ;;  %v478_v57 = vunpack.c.h.bf16 %v560_v44  ;;  %v173_v58 = vmul.f32 %v469_v52, %v604_v1  ;;  %v174_v59 = vmul.f32 %v470_v53, %v604_v1  ;;  %v567_v53 = vld [vmem:[%s1088_s0 + $0xa8] sm:$0xff]  }
  0x1c   :  { %370 = vst.msk [vmem:[%s1091_s3 + $0xa8] sm:$0xff] %vm348_vm0, %v305_v48  ;;  %371 = vst.msk [vmem:[%s1091_s3 + $0xb0] sm:$0xff] %vm348_vm0, %v306_v50  ;;  %v481_v60 = vunpack.c.l.bf16 %v561_v49  ;;  %v482_v61 = vunpack.c.h.bf16 %v561_v49  ;;  %v175_v62 = vmul.f32 %v473_v54, %v604_v1  ;;  %v176_v63 = vmul.f32 %v474_v55, %v604_v1  ;;  %v566_v48 = vld [vmem:[%s1088_s0 + $0xa0] sm:$0xff]   ;;  %v568_v54 = vld [vmem:[%s1088_s0 + $0xb0] sm:$0xff]  }
  0x1d   :  { %372 = vst.msk [vmem:[%s1091_s3 + $0xb8] sm:$0xff] %vm348_vm0, %v307_v51  ;;  %v177_v0 = vmul.f32 %v477_v56, %v604_v1  ;;  %v178_v2 = vmul.f32 %v478_v57, %v604_v1  ;;  %v244_v3 = vadd.f32 %v618_v7, %v173_v58  ;;  %v245_v4 = vadd.f32 %v618_v7, %v174_v59  ;;  %v569_v59 = vld [vmem:[%s1088_s0 + $0xb8] sm:$0xff]  }
  0x1e   :  { %v179_v5 = vmul.f32 %v481_v60, %v604_v1  ;;  %v180_v6 = vmul.f32 %v482_v61, %v604_v1  ;;  %v246_v8 = vadd.f32 %v618_v7, %v175_v62  ;;  %v247_v9 = vadd.f32 %v618_v7, %v176_v63 }
  0x1f   :  { %v248_v10 = vadd.f32 %v618_v7, %v177_v0  ;;  %v249_v11 = vadd.f32 %v618_v7, %v178_v2  ;;  %v308_v13 = vmax.f32 %v244_v3, 0.0  ;;  %v309_v14 = vmax.f32 %v245_v4, 0.0 }
  0x20   :  { %v250_v15 = vadd.f32 %v618_v7, %v179_v5  ;;  %v251_v16 = vadd.f32 %v618_v7, %v180_v6  ;;  %v310_v19 = vmax.f32 %v246_v8, 0.0  ;;  %v311_v20 = vmax.f32 %v247_v9, 0.0 }
  0x21   :  { %v312_v21 = vmax.f32 %v248_v10, 0.0  ;;  %v313_v22 = vmax.f32 %v249_v11, 0.0  ;;  %373 = vst.msk [vmem:[%s1091_s3 + $0xc0] sm:$0xff] %vm348_vm0, %v308_v13  ;;  %374 = vst.msk [vmem:[%s1091_s3 + $0xc8] sm:$0xff] %vm348_vm0, %v309_v14  ;;  %v485_v26 = vunpack.c.l.bf16 %v562_v12  ;;  %v486_v27 = vunpack.c.h.bf16 %v562_v12 }
  0x22   :  { %v314_v24 = vmax.f32 %v250_v15, 0.0  ;;  %v315_v25 = vmax.f32 %v251_v16, 0.0  ;;  %375 = vst.msk [vmem:[%s1091_s3 + $0xd0] sm:$0xff] %vm348_vm0, %v310_v19  ;;  %376 = vst.msk [vmem:[%s1091_s3 + $0xd8] sm:$0xff] %vm348_vm0, %v311_v20  ;;  %v489_v28 = vunpack.c.l.bf16 %v563_v17  ;;  %v490_v29 = vunpack.c.h.bf16 %v563_v17 }
  0x23   :  { %377 = vst.msk [vmem:[%s1091_s3 + $0xe0] sm:$0xff] %vm348_vm0, %v312_v21  ;;  %378 = vst.msk [vmem:[%s1091_s3 + $0xe8] sm:$0xff] %vm348_vm0, %v313_v22  ;;  %v493_v30 = vunpack.c.l.bf16 %v564_v18  ;;  %v494_v31 = vunpack.c.h.bf16 %v564_v18  ;;  %v181_v32 = vmul.f32 %v485_v26, %v604_v1  ;;  %v182_v33 = vmul.f32 %v486_v27, %v604_v1  ;;  %v570_v22 = vld [vmem:[%s1088_s0 + $0xc0] sm:$0xff]   ;;  %v571_v27 = vld [vmem:[%s1088_s0 + $0xc8] sm:$0xff]  }
  0x24   :  { %379 = vst.msk [vmem:[%s1091_s3 + $0xf0] sm:$0xff] %vm348_vm0, %v314_v24  ;;  %380 = vst.msk [vmem:[%s1091_s3 + $0xf8] sm:$0xff] %vm348_vm0, %v315_v25  ;;  %v497_v34 = vunpack.c.l.bf16 %v565_v23  ;;  %v498_v35 = vunpack.c.h.bf16 %v565_v23  ;;  %v183_v36 = vmul.f32 %v489_v28, %v604_v1  ;;  %v184_v37 = vmul.f32 %v490_v29, %v604_v1  ;;  %v572_v28 = vld [vmem:[%s1088_s0 + $0xd0] sm:$0xff]  }
  0x25   :  { %v185_v38 = vmul.f32 %v493_v30, %v604_v1  ;;  %v186_v39 = vmul.f32 %v494_v31, %v604_v1  ;;  %v252_v40 = vadd.f32 %v618_v7, %v181_v32  ;;  %v253_v41 = vadd.f32 %v618_v7, %v182_v33  ;;  %v573_v33 = vld [vmem:[%s1088_s0 + $0xd8] sm:$0xff]  }
  0x26   :  { %v187_v42 = vmul.f32 %v497_v34, %v604_v1  ;;  %v188_v43 = vmul.f32 %v498_v35, %v604_v1  ;;  %v254_v44 = vadd.f32 %v618_v7, %v183_v36  ;;  %v255_v45 = vadd.f32 %v618_v7, %v184_v37 }
  0x27   :  { %v256_v46 = vadd.f32 %v618_v7, %v185_v38  ;;  %v257_v47 = vadd.f32 %v618_v7, %v186_v39  ;;  %v316_v49 = vmax.f32 %v252_v40, 0.0  ;;  %v317_v50 = vmax.f32 %v253_v41, 0.0 }
  0x28   :  { %v258_v51 = vadd.f32 %v618_v7, %v187_v42  ;;  %v259_v52 = vadd.f32 %v618_v7, %v188_v43  ;;  %v318_v55 = vmax.f32 %v254_v44, 0.0  ;;  %v319_v56 = vmax.f32 %v255_v45, 0.0 }
  0x29   :  { %v320_v57 = vmax.f32 %v256_v46, 0.0  ;;  %v321_v58 = vmax.f32 %v257_v47, 0.0  ;;  %381 = vst.msk [vmem:[%s1091_s3 + $0x100] sm:$0xff] %vm348_vm0, %v316_v49  ;;  %382 = vst.msk [vmem:[%s1091_s3 + $0x108] sm:$0xff] %vm348_vm0, %v317_v50  ;;  %v501_v62 = vunpack.c.l.bf16 %v566_v48  ;;  %v502_v63 = vunpack.c.h.bf16 %v566_v48 }
  0x2a   :  { %v322_v60 = vmax.f32 %v258_v51, 0.0  ;;  %v323_v61 = vmax.f32 %v259_v52, 0.0  ;;  %383 = vst.msk [vmem:[%s1091_s3 + $0x110] sm:$0xff] %vm348_vm0, %v318_v55  ;;  %384 = vst.msk [vmem:[%s1091_s3 + $0x118] sm:$0xff] %vm348_vm0, %v319_v56  ;;  %v505_v0 = vunpack.c.l.bf16 %v567_v53  ;;  %v506_v2 = vunpack.c.h.bf16 %v567_v53 }
  0x2b   :  { %385 = vst.msk [vmem:[%s1091_s3 + $0x120] sm:$0xff] %vm348_vm0, %v320_v57  ;;  %386 = vst.msk [vmem:[%s1091_s3 + $0x128] sm:$0xff] %vm348_vm0, %v321_v58  ;;  %v509_v3 = vunpack.c.l.bf16 %v568_v54  ;;  %v510_v4 = vunpack.c.h.bf16 %v568_v54  ;;  %v189_v5 = vmul.f32 %v501_v62, %v604_v1  ;;  %v190_v6 = vmul.f32 %v502_v63, %v604_v1  ;;  %v574_v58 = vld [vmem:[%s1088_s0 + $0xe0] sm:$0xff]   ;;  %v575_v63 = vld [vmem:[%s1088_s0 + $0xe8] sm:$0xff]  }
  0x2c   :  { %387 = vst.msk [vmem:[%s1091_s3 + $0x130] sm:$0xff] %vm348_vm0, %v322_v60  ;;  %388 = vst.msk [vmem:[%s1091_s3 + $0x138] sm:$0xff] %vm348_vm0, %v323_v61  ;;  %v513_v8 = vunpack.c.l.bf16 %v569_v59  ;;  %v514_v9 = vunpack.c.h.bf16 %v569_v59  ;;  %v191_v10 = vmul.f32 %v505_v0, %v604_v1  ;;  %v192_v11 = vmul.f32 %v506_v2, %v604_v1  ;;  %v576_v0 = vld [vmem:[%s1088_s0 + $0xf0] sm:$0xff]  }
  0x2d   :  { %v193_v12 = vmul.f32 %v509_v3, %v604_v1  ;;  %v194_v13 = vmul.f32 %v510_v4, %v604_v1  ;;  %v260_v14 = vadd.f32 %v618_v7, %v189_v5  ;;  %v261_v15 = vadd.f32 %v618_v7, %v190_v6  ;;  %v577_v6 = vld [vmem:[%s1088_s0 + $0xf8] sm:$0xff]  }
  0x2e   :  { %v195_v16 = vmul.f32 %v513_v8, %v604_v1  ;;  %v196_v17 = vmul.f32 %v514_v9, %v604_v1  ;;  %v262_v18 = vadd.f32 %v618_v7, %v191_v10  ;;  %v263_v19 = vadd.f32 %v618_v7, %v192_v11 }
  0x2f   :  { %v264_v20 = vadd.f32 %v618_v7, %v193_v12  ;;  %v265_v21 = vadd.f32 %v618_v7, %v194_v13  ;;  %v324_v23 = vmax.f32 %v260_v14, 0.0  ;;  %v325_v24 = vmax.f32 %v261_v15, 0.0 }
  0x30   :  { %v266_v25 = vadd.f32 %v618_v7, %v195_v16  ;;  %v267_v26 = vadd.f32 %v618_v7, %v196_v17  ;;  %v326_v29 = vmax.f32 %v262_v18, 0.0  ;;  %v327_v30 = vmax.f32 %v263_v19, 0.0 }
  0x31   :  { %v328_v31 = vmax.f32 %v264_v20, 0.0  ;;  %v329_v32 = vmax.f32 %v265_v21, 0.0  ;;  %389 = vst.msk [vmem:[%s1091_s3 + $0x140] sm:$0xff] %vm348_vm0, %v324_v23  ;;  %390 = vst.msk [vmem:[%s1091_s3 + $0x148] sm:$0xff] %vm348_vm0, %v325_v24  ;;  %v517_v36 = vunpack.c.l.bf16 %v570_v22  ;;  %v518_v37 = vunpack.c.h.bf16 %v570_v22 }
  0x32   :  { %v330_v34 = vmax.f32 %v266_v25, 0.0  ;;  %v331_v35 = vmax.f32 %v267_v26, 0.0  ;;  %391 = vst.msk [vmem:[%s1091_s3 + $0x150] sm:$0xff] %vm348_vm0, %v326_v29  ;;  %392 = vst.msk [vmem:[%s1091_s3 + $0x158] sm:$0xff] %vm348_vm0, %v327_v30  ;;  %v521_v38 = vunpack.c.l.bf16 %v571_v27  ;;  %v522_v39 = vunpack.c.h.bf16 %v571_v27 }
  0x33   :  { %393 = vst.msk [vmem:[%s1091_s3 + $0x160] sm:$0xff] %vm348_vm0, %v328_v31  ;;  %394 = vst.msk [vmem:[%s1091_s3 + $0x168] sm:$0xff] %vm348_vm0, %v329_v32  ;;  %v525_v40 = vunpack.c.l.bf16 %v572_v28  ;;  %v526_v41 = vunpack.c.h.bf16 %v572_v28  ;;  %v197_v42 = vmul.f32 %v517_v36, %v604_v1  ;;  %v198_v43 = vmul.f32 %v518_v37, %v604_v1 }
  0x34   :  { %395 = vst.msk [vmem:[%s1091_s3 + $0x170] sm:$0xff] %vm348_vm0, %v330_v34  ;;  %396 = vst.msk [vmem:[%s1091_s3 + $0x178] sm:$0xff] %vm348_vm0, %v331_v35  ;;  %v529_v44 = vunpack.c.l.bf16 %v573_v33  ;;  %v530_v45 = vunpack.c.h.bf16 %v573_v33  ;;  %v199_v46 = vmul.f32 %v521_v38, %v604_v1  ;;  %v200_v47 = vmul.f32 %v522_v39, %v604_v1 }
  0x35   :  { %v201_v48 = vmul.f32 %v525_v40, %v604_v1  ;;  %v202_v49 = vmul.f32 %v526_v41, %v604_v1  ;;  %v268_v50 = vadd.f32 %v618_v7, %v197_v42  ;;  %v269_v51 = vadd.f32 %v618_v7, %v198_v43 }
  0x36   :  { %v203_v52 = vmul.f32 %v529_v44, %v604_v1  ;;  %v204_v53 = vmul.f32 %v530_v45, %v604_v1  ;;  %v270_v54 = vadd.f32 %v618_v7, %v199_v46  ;;  %v271_v55 = vadd.f32 %v618_v7, %v200_v47 }
  0x37   :  { %v272_v56 = vadd.f32 %v618_v7, %v201_v48  ;;  %v273_v57 = vadd.f32 %v618_v7, %v202_v49  ;;  %v332_v59 = vmax.f32 %v268_v50, 0.0  ;;  %v333_v60 = vmax.f32 %v269_v51, 0.0 }
  0x38   :  { %v274_v61 = vadd.f32 %v618_v7, %v203_v52  ;;  %v275_v62 = vadd.f32 %v618_v7, %v204_v53  ;;  %v334_v2 = vmax.f32 %v270_v54, 0.0  ;;  %v335_v3 = vmax.f32 %v271_v55, 0.0 }
  0x39   :  { %v336_v4 = vmax.f32 %v272_v56, 0.0  ;;  %v337_v5 = vmax.f32 %v273_v57, 0.0  ;;  %397 = vst.msk [vmem:[%s1091_s3 + $0x180] sm:$0xff] %vm348_vm0, %v332_v59  ;;  %398 = vst.msk [vmem:[%s1091_s3 + $0x188] sm:$0xff] %vm348_vm0, %v333_v60  ;;  %v533_v10 = vunpack.c.l.bf16 %v574_v58  ;;  %v534_v11 = vunpack.c.h.bf16 %v574_v58 }
  0x3a   :  { %v338_v8 = vmax.f32 %v274_v61, 0.0  ;;  %v339_v9 = vmax.f32 %v275_v62, 0.0  ;;  %399 = vst.msk [vmem:[%s1091_s3 + $0x190] sm:$0xff] %vm348_vm0, %v334_v2  ;;  %400 = vst.msk [vmem:[%s1091_s3 + $0x198] sm:$0xff] %vm348_vm0, %v335_v3  ;;  %v537_v12 = vunpack.c.l.bf16 %v575_v63  ;;  %v538_v13 = vunpack.c.h.bf16 %v575_v63 }
  0x3b   :  { %401 = vst.msk [vmem:[%s1091_s3 + $0x1a0] sm:$0xff] %vm348_vm0, %v336_v4  ;;  %402 = vst.msk [vmem:[%s1091_s3 + $0x1a8] sm:$0xff] %vm348_vm0, %v337_v5  ;;  %v541_v14 = vunpack.c.l.bf16 %v576_v0  ;;  %v542_v15 = vunpack.c.h.bf16 %v576_v0  ;;  %v205_v16 = vmul.f32 %v533_v10, %v604_v1  ;;  %v206_v17 = vmul.f32 %v534_v11, %v604_v1 }
  0x3c   :  { %403 = vst.msk [vmem:[%s1091_s3 + $0x1b0] sm:$0xff] %vm348_vm0, %v338_v8  ;;  %404 = vst.msk [vmem:[%s1091_s3 + $0x1b8] sm:$0xff] %vm348_vm0, %v339_v9  ;;  %v545_v18 = vunpack.c.l.bf16 %v577_v6  ;;  %v546_v19 = vunpack.c.h.bf16 %v577_v6  ;;  %v207_v20 = vmul.f32 %v537_v12, %v604_v1  ;;  %v208_v21 = vmul.f32 %v538_v13, %v604_v1 }
  0x3d   :  { %v209_v22 = vmul.f32 %v541_v14, %v604_v1  ;;  %v210_v23 = vmul.f32 %v542_v15, %v604_v1  ;;  %v276_v24 = vadd.f32 %v618_v7, %v205_v16  ;;  %v277_v25 = vadd.f32 %v618_v7, %v206_v17 }
  0x3e   :  { %v211_v26 = vmul.f32 %v545_v18, %v604_v1  ;;  %v212_v27 = vmul.f32 %v546_v19, %v604_v1  ;;  %v278_v28 = vadd.f32 %v618_v7, %v207_v20  ;;  %v279_v29 = vadd.f32 %v618_v7, %v208_v21 }
  0x3f   :  { %v280_v30 = vadd.f32 %v618_v7, %v209_v22  ;;  %v281_v31 = vadd.f32 %v618_v7, %v210_v23  ;;  %v340_v32 = vmax.f32 %v276_v24, 0.0  ;;  %v341_v33 = vmax.f32 %v277_v25, 0.0 }
  0x40   :  { %v282_v34 = vadd.f32 %v618_v7, %v211_v26  ;;  %v283_v35 = vadd.f32 %v618_v7, %v212_v27  ;;  %v342_v36 = vmax.f32 %v278_v28, 0.0  ;;  %v343_v37 = vmax.f32 %v279_v29, 0.0 }
  0x41   :  { %v344_v38 = vmax.f32 %v280_v30, 0.0  ;;  %v345_v39 = vmax.f32 %v281_v31, 0.0  ;;  %405 = vst.msk [vmem:[%s1091_s3 + $0x1c0] sm:$0xff] %vm348_vm0, %v340_v32  ;;  %406 = vst.msk [vmem:[%s1091_s3 + $0x1c8] sm:$0xff] %vm348_vm0, %v341_v33 }
  0x42   :  { %v346_v1 = vmax.f32 %v282_v34, 0.0  ;;  %v347_v40 = vmax.f32 %v283_v35, 0.0  ;;  %407 = vst.msk [vmem:[%s1091_s3 + $0x1d0] sm:$0xff] %vm348_vm0, %v342_v36  ;;  %408 = vst.msk [vmem:[%s1091_s3 + $0x1d8] sm:$0xff] %vm348_vm0, %v343_v37 }
  0x43   :  { %409 = vst.msk [vmem:[%s1091_s3 + $0x1e0] sm:$0xff] %vm348_vm0, %v344_v38  ;;  %410 = vst.msk [vmem:[%s1091_s3 + $0x1e8] sm:$0xff] %vm348_vm0, %v345_v39 }
  0x44   :  { %411 = vst.msk [vmem:[%s1091_s3 + $0x1f0] sm:$0xff] %vm348_vm0, %v346_v1  ;;  %412 = vst.msk [vmem:[%s1091_s3 + $0x1f8] sm:$0xff] %vm348_vm0, %v347_v40 }

// kernel: in_double_conv.4
= control target key start
LH: loop header
LB: loop body
LE: loop exit
PB: predicated region body
PF: predicated region fallthrough
CT: control target
= control target key end

     0   :  { %s2599_s18 = smov 0   ;;  %s2601_s19 = smov 0   ;;  %s3380_s0 = inlined_call_operand.vmem [shape: bf16[32,16,8], index: 0, kind: input, shape index: {}, may-alias: {0,1,2}]   ;;  %s3381_s1 = inlined_call_operand.vmem [shape: bf16[32,16,8], index: 1, kind: input, shape index: {}, may-alias: {0,1,2}]   ;;  %s3382_s2 = inlined_call_operand.vmem [shape: bf16[32,16,8], index: 2, kind: input, shape index: {}, may-alias: {0,1,2}]   ;;  %s3383_s3 = inlined_call_operand.vmem [shape: bf16[72,8], index: 3, kind: input, shape index: {}]   ;;  %s3384_s4 = inlined_call_operand.vmem [shape: bf16[32,16,8], index: 4, kind: output, shape index: {0}]   ;;  %s3385_s5 = inlined_call_operand.vmem [shape: f32[2,8,8], index: 5, kind: output, shape index: {1}]  }
   0x1   :  { %s2603_s20 = smov 0  }
   0x2 LB: > { %s28_s1 = sadd.s32 1, %s2554_s19  ;;  %p2273_p0 = scmp.ge.s32.totalorder %s2558_s20, 1  ;;  %s2558_s20 = sphi %s2603_s20, %s16_s20   ;;  %s2554_s19 = sphi %s2601_s19, %s3389_s19   ;;  %s2550_s18 = sphi %s2599_s18, %s3388_s18  }
   0x3   : > { %p30_p1 = scmp.ge.s32.totalorder %s28_s1, 2  ;;  %p280_p2 = scmp.lt.s32.totalorder %s2558_s20, 3 }
   0x5   : > { %s3391_s1 = smov (%p30_p1, %s28_s1), 0  ;;  %p281_p3 = pnand %p2273_p0, %p280_p2 }
   0x6   : > { %v2560_v0 = vmov (!%p281_p3), 0   ;;  %vm698_vm0 = vcmask (!%p281_p3), 1040384   ;;  %vm699_vm1 = vsmask.f32 (!%p281_p3), 256  ;;  %s2274_s2 = sshll.u32 (!%p281_p3), %s2550_s18, 4  ;;  %vm994_vm3 = vcmask (!%p281_p3), 1046528  }
   0x7   : > { %284 = sbr.rel (%p281_p3) target bundleno = 631 (0x277), region = 36  ;;  %v2296_v1 = vcombine.low (!%p281_p3), %v2560_v0, %v2560_v0  ;;  %p341_p4 = scmp.lt.s32.totalorder (!%p281_p3), %s2274_s2, 31  ;;  %vm2621_vm2 = vmand (!%p281_p3), %vm698_vm0, %vm699_vm1  ;;  %vm737_vm4 = vsmask.f32 (!%p281_p3), 7424  ;;  %v2524_v49 = vld [vmem:[%s3383_s3] sm:$0xff] (!%p281_p3)   ;;  %v2525_v54 = vld [vmem:[%s3383_s3 + $0x8] sm:$0xff] (!%p281_p3)  }
   0x8   : > { %s2561_s25 = smov (!%p281_p3), 16   ;;  %s2562_s26 = smov (!%p281_p3), 8   ;;  %2428 = vmatprep.subr.bf16.mxu0 (!%p281_p3), %v2524_v49  ;;  %2470 = vmatprep.subr.bf16.mxu1 (!%p281_p3), %v2524_v49  ;;  %vm1634_vm5 = vcmask (!%p281_p3), 1043456   ;;  %vm1301_vm6 = vcmask (!%p281_p3), 64512   ;;  %vm1334_vm7 = vcmask (!%p281_p3), 130048   ;;  %vm1367_vm8 = vcmask (!%p281_p3), 195584  }
   0x9   : > { %v537_v2 = vshrl.u32 (!%p281_p3), %v2296_v1, 16  ;;  %v540_v3 = vshll.u32 (!%p281_p3), %v2296_v1, 16  ;;  %s2563_s27 = smov (!%p281_p3), 24   ;;  %s2564_s28 = smov (!%p281_p3), 48   ;;  %2429 = vmatpush3.bf16.msra.mxu0 (!%p281_p3), %v2524_v49  ;;  %v2527_v1 = vld [vmem:[%s3383_s3 + $0x10] sm:$0xff] (!%p281_p3)   ;;  %2475 = vmatpush3.bf16.msra.mxu1 (!%p281_p3), %v2524_v49  ;;  %vm1400_vm9 = vcmask (!%p281_p3), 261120  }
   0xa   : > { %2430 = vmatprep.subr.bf16.mxu0 (!%p281_p3), %v2525_v54  ;;  %2471 = vmatprep.subr.bf16.mxu1 (!%p281_p3), %v2525_v54  ;;  %s2565_s10 = smov (!%p281_p3), 40   ;;  %s2566_s13 = smov (!%p281_p3), 32   ;;  %vm1433_vm10 = vcmask (!%p281_p3), 326656   ;;  %vm1466_vm11 = vcmask (!%p281_p3), 392192   ;;  %vm1532_vm12 = vcmask (!%p281_p3), 523264   ;;  %vm1499_vm13 = vcmask (!%p281_p3), 457728  }
   0xb   : > { %v539_v5 = vrot.slane (!%p281_p3), %v537_v2, 7  ;;  %s2567_s14 = smov (!%p281_p3), 56   ;;  %s2568_s15 = smov (!%p281_p3), 64   ;;  %vm1601_vm14 = vcmask (!%p281_p3), 588800   ;;  %vm1927_vm15 = vcmask (!%p281_p3), 60416   ;;  %vm2132_vm1 = vcmask (!%p281_p3), 1041408  }
   0xc   : > { %p392_p5 = scmp.lt.s32.totalorder (!%p281_p3), %s2550_s18, 1 }
   0xd   : > { %v542_v6 = vor.u32 (!%p281_p3), %v540_v3, %v539_v5  ;;  %v719_v7 = vsel (!%p281_p3), %vm2621_vm2, %v539_v5, 0  ;;  %2431 = vmatpush3.bf16.msra.mxu0 (!%p281_p3), %v2525_v54  ;;  %2476 = vmatpush3.bf16.msra.mxu1 (!%p281_p3), %v2525_v54 }
   0xe   : > { %s3393_s2 = smov (!%p341_p4, %s2274_s2), 31  ;;  %v996_v8 = vrot.slane %v719_v7, 1  ;;  %v746_v9 = vshll.u32 %v719_v7, 16  ;;  %2432 = vmatprep.subr.bf16.mxu0 %v2527_v1  ;;  %2472 = vmatprep.subr.bf16.mxu1 %v2527_v1  ;;  %s3395_s18 = smov (!%p392_p5, %s2550_s18), 1 }
   0xf   : > { %s2369_s21 = sshll.u32 %s3393_s2, 3  ;;  %v2639_v10 = vsel %vm2621_vm2, 0, %v542_v6  ;;  %s2295_s2 = sshll.u32 %s3395_s18, 3 }
  0x10   : > { %s2635_s24 = scalar_lea.vmem %s3380_s0, %s2369_s21  ;;  %v995_v12 = vrot.slane %v2639_v10, 1  ;;  %v739_v13 = vshrl.u32 %v2639_v10, 16  ;;  %v741_v14 = vshll.u32 %v2639_v10, 16  ;;  %v748_v15 = vrot.slane %v746_v9, 1 }
  0x11   : > { %v2515_v11 = vld [vmem:[%s2635_s24 + $0x8] sm:$0xff]   ;;  %v2516_v16 = vld [vmem:[%s2635_s24 + $0x10] sm:$0xff]   ;;  %v2517_v17 = vld [vmem:[%s2635_s24] sm:$0xff]   ;;  %2433 = vmatpush3.bf16.msra.mxu0 %v2527_v1  ;;  %2477 = vmatpush3.bf16.msra.mxu1 %v2527_v1 }
  0x12   : > { %v551_v18 = vshrl.u32 %v2515_v11, 16  ;;  %v554_v19 = vshll.u32 %v2515_v11, 16  ;;  %v2648_v20 = vsel %vm994_vm3, %v995_v12, %v996_v8  ;;  %v743_v21 = vrot.slane %v741_v14, 1  ;;  %v2518_v56 = vld [vmem:[%s2635_s24 + $0x18] sm:$0xff]   ;;  %v2519_v14 = vld [vmem:[%s2635_s24 + $0x20] sm:$0xff]  }
  0x13   : > { %v558_v22 = vshrl.u32 %v2516_v16, 16  ;;  %v561_v23 = vshll.u32 %v2516_v16, 16  ;;  %1043 = vrot.lane.b32.xlu1 %v2648_v20, %s2561_s25  ;;  %v544_v25 = vshrl.u32 %v2517_v17, 16  ;;  %v547_v26 = vshll.u32 %v2517_v17, 16  ;;  %v2528_v8 = vld [vmem:[%s3383_s3 + $0x18] sm:$0xff]  }
  0x14   : > { %v553_v24 = vrot.slane %v551_v18, 7  ;;  %v744_v27 = vor.u32 %v743_v21, %v739_v13  ;;  %v565_v2 = vshrl.u32 %v2518_v56, 16  ;;  %v568_v11 = vshll.u32 %v2518_v56, 16  ;;  %2434 = vmatprep.subr.bf16.mxu0 %v2528_v8  ;;  %2473 = vmatprep.subr.bf16.mxu1 %v2528_v8 }
  0x15   : > { %v560_v28 = vrot.slane %v558_v22, 7  ;;  %v546_v30 = vrot.slane %v544_v25, 7  ;;  %2435 = vmatpush3.bf16.msra.mxu0 %v2528_v8  ;;  %2478 = vmatpush3.bf16.msra.mxu1 %v2528_v8  ;;  %v572_v16 = vshrl.u32 %v2519_v14, 16 }
  0x16   : > { %v556_v29 = vor.u32 %v554_v19, %v553_v24  ;;  %v2653_v31 = vsel %vm737_vm4, %v744_v27, %v748_v15  ;;  %v721_v36 = vsel %vm2621_vm2, %v553_v24, 0  ;;  %v567_v9 = vrot.slane %v565_v2, 7 }
  0x17   : > { %v563_v32 = vor.u32 %v561_v23, %v560_v28  ;;  %930 = vrot.lane.b32.xlu0 %v2653_v31, %s2562_s26  ;;  %v549_v34 = vor.u32 %v547_v26, %v546_v30  ;;  %v720_v35 = vsel %vm2621_vm2, %v546_v30, 0  ;;  %v1002_v44 = vrot.slane %v721_v36, 1 }
  0x18   : > { %v2659_v33 = vsel %vm2621_vm2, 0, %v556_v29  ;;  %v999_v39 = vrot.slane %v720_v35, 1  ;;  %v770_v45 = vshll.u32 %v721_v36, 16  ;;  %v758_v48 = vshll.u32 %v720_v35, 16 }
  0x19   : > { %1078 = vrot.lane.b32.xlu1 %v2659_v33, %s2563_s27  ;;  %v2669_v37 = vsel %vm2621_vm2, 0, %v563_v32  ;;  %v2673_v38 = vsel %vm2621_vm2, 0, %v549_v34  ;;  %v765_v40 = vshll.u32 %v2659_v33, 16  ;;  %v1001_v43 = vrot.slane %v2659_v33, 1 }
  0x1a   : > { %v998_v41 = vrot.slane %v2673_v38, 1  ;;  %v753_v42 = vshll.u32 %v2673_v38, 16  ;;  %v751_v46 = vshrl.u32 %v2673_v38, 16  ;;  %v763_v51 = vshrl.u32 %v2659_v33, 16 }
  0x1b   : > { %1076 = vrot.lane.b32.xlu0 %v2673_v38, %s2563_s27  ;;  %v767_v52 = vrot.slane %v765_v40, 1  ;;  %v777_v53 = vshll.u32 %v2669_v37, 16  ;;  %v2695_v55 = vsel %vm2621_vm2, %v560_v28, 0  ;;  %v2702_v57 = vsel %vm994_vm3, %v1001_v43, %v1002_v44  ;;  %v2529_v28 = vld [vmem:[%s3383_s3 + $0x20] ss:$0 sps:$4 sm:$0xff]   ;;  %v2520_v43 = vld [vmem:[%s2635_s24 + $0x28] sm:$0xff]  }
  0x1c   : > { %v755_v47 = vrot.slane %v753_v42, 1  ;;  %v1000_v50 = vsel %vm994_vm3, %v998_v41, %v999_v39  ;;  %v772_v58 = vrot.slane %v770_v45, 1  ;;  %v760_v60 = vrot.slane %v758_v48, 1  ;;  %2480 = vmatprep.subr.msk.bf16.mxu0 %vm1634_vm5, %v2529_v28  ;;  %2481 = vmatprep.subr.msk.bf16.mxu1 %vm1634_vm5, %v2529_v28 }
  0x1d   : > { %1191 = vrot.lane.b32.xlu1 %v2669_v37, %s2564_s28  ;;  %v768_v61 = vor.u32 %v767_v52, %v763_v51  ;;  %v775_v62 = vshrl.u32 %v2669_v37, 16  ;;  %v779_v63 = vrot.slane %v777_v53, 1  ;;  %v782_v0 = vshll.u32 %v2695_v55, 16 }
  0x1e   : > { %v756_v59 = vor.u32 %v755_v47, %v751_v46  ;;  %v570_v13 = vor.u32 %v568_v11, %v567_v9  ;;  %v1004_v17 = vrot.slane %v2669_v37, 1  ;;  %v1005_v18 = vrot.slane %v2695_v55, 1  ;;  %v2521_v55 = vld [vmem:[%s2635_s24 + $0x30] sm:$0xff]  }
  0x1f   : > { %1189 = vrot.lane.b32.xlu0 %v2659_v33, %s2564_s28  ;;  %v773_v5 = vsel %vm737_vm4, %v768_v61, %v772_v58  ;;  %v780_v6 = vor.u32 %v779_v63, %v775_v62  ;;  %v784_v7 = vrot.slane %v782_v0, 1  ;;  %v723_v21 = vsel %vm2621_vm2, %v567_v9, 0 }
  0x20   : > { %v761_v3 = vsel %vm737_vm4, %v756_v59, %v760_v60  ;;  %v2725_v15 = vsel %vm2621_vm2, 0, %v570_v13  ;;  %v574_v22 = vrot.slane %v572_v16, 7  ;;  %v575_v23 = vshll.u32 %v2519_v14, 16  ;;  %v2522_v16 = vld [vmem:[%s2635_s24 + $0x38] sm:$0xff]  }
  0x21   : > { %1045 = vrot.lane.b32.xlu1 %v1000_v50, %s2561_s25  ;;  %v785_v12 = vsel %vm737_vm4, %v780_v6, %v784_v7  ;;  %v789_v19 = vshll.u32 %v2725_v15, 16  ;;  %v1006_v24 = vsel %vm994_vm3, %v1004_v17, %v1005_v18  ;;  %v787_v25 = vshrl.u32 %v2725_v15, 16 }
  0x22   : > { %v794_v27 = vshll.u32 %v723_v21, 16  ;;  %v577_v29 = vor.u32 %v575_v23, %v574_v22  ;;  %v1008_v35 = vrot.slane %v723_v21, 1  ;;  %v1007_v39 = vrot.slane %v2725_v15, 1 }
  0x23   : > { %1156 = vrot.lane.b32.xlu0 %v1000_v50, %s2565_s10  ;;  %v791_v26 = vrot.slane %v789_v19, 1  ;;  %v1636_v41 = vsel %vm1634_vm5, %v2529_v28, 0  ;;  %v724_v42 = vsel %vm2621_vm2, %v574_v22, 0  ;;  %v579_v48 = vshrl.u32 %v2520_v43, 16 }
  0x24   : > { %v796_v32 = vrot.slane %v794_v27, 1  ;;  %v2746_v34 = vsel %vm2621_vm2, 0, %v577_v29  ;;  %2437 = vmatpush3.bf16.msra.mxu0 %v1636_v41  ;;  %2479 = vmatpush3.bf16.msra.mxu1 %v1636_v41  ;;  %v1009_v44 = vsel %vm994_vm3, %v1007_v39, %v1008_v35  ;;  %v806_v47 = vshll.u32 %v724_v42, 16  ;;  %v2523_v29 = vld [vmem:[%s2635_s24 + $0x40] sm:$0xff]  }
  0x25   : > { %1158 = vrot.lane.b32.xlu1 %v2702_v57, %s2565_s10  ;;  %v792_v30 = vor.u32 %v791_v26, %v787_v25  ;;  %v801_v40 = vshll.u32 %v2746_v34, 16  ;;  %v799_v45 = vshrl.u32 %v2746_v34, 16  ;;  %v581_v51 = vrot.slane %v579_v48, 7 }
  0x26   : > { %v808_v50 = vrot.slane %v806_v47, 1  ;;  %v582_v52 = vshll.u32 %v2520_v43, 16  ;;  %v1010_v58 = vrot.slane %v2746_v34, 1  ;;  %v1011_v59 = vrot.slane %v724_v42, 1 }
  0x27   : > { %932 = vrot.lane.b32.xlu0 %v761_v3, %s2562_s26  ;;  %v797_v36 = vsel %vm737_vm4, %v792_v30, %v796_v32  ;;  %v803_v46 = vrot.slane %v801_v40, 1  ;;  %v725_v61 = vsel %vm2621_vm2, %v581_v51, 0  ;;  %v589_v63 = vshll.u32 %v2521_v55, 16 }
  0x28   : > { %v584_v54 = vor.u32 %v582_v52, %v581_v51  ;;  %v1012_v0 = vsel %vm994_vm3, %v1010_v58, %v1011_v59  ;;  %v593_v22 = vshrl.u32 %v2522_v16, 16  ;;  %v596_v26 = vshll.u32 %v2522_v16, 16 }
  0x29   : > { %1122 = vrot.lane.b32.xlu1 %v773_v5, %s2566_s13  ;;  %v804_v49 = vor.u32 %v803_v46, %v799_v45  ;;  %v600_v32 = vshrl.u32 %v2523_v29, 16  ;;  %v603_v42 = vshll.u32 %v2523_v29, 16 }
  0x2a   : > { %v2775_v56 = vsel %vm2621_vm2, 0, %v584_v54  ;;  %v595_v25 = vrot.slane %v593_v22, 7 }
  0x2b   : > { %1120 = vrot.lane.b32.xlu0 %v761_v3, %s2566_s13  ;;  %v809_v53 = vsel %vm737_vm4, %v804_v49, %v808_v50  ;;  %v813_v60 = vshll.u32 %v2775_v56, 16  ;;  %v811_v1 = vshrl.u32 %v2775_v56, 16  ;;  %v818_v3 = vshll.u32 %v725_v61, 16 }
  0x2c   : > { %v1013_v11 = vrot.slane %v2775_v56, 1  ;;  %v598_v28 = vor.u32 %v596_v26, %v595_v25  ;;  %v727_v40 = vsel %vm2621_vm2, %v595_v25, 0  ;;  %v602_v41 = vrot.slane %v600_v32, 7 }
  0x2d   : > { %1235 = vrot.lane.b32.xlu1 %v785_v12, %s2567_s14  ;;  %v815_v2 = vrot.slane %v813_v60, 1  ;;  %v820_v7 = vrot.slane %v818_v3, 1  ;;  %v842_v46 = vshll.u32 %v727_v40, 16 }
  0x2e   : > { %v2819_v30 = vsel %vm2621_vm2, 0, %v598_v28  ;;  %v605_v47 = vor.u32 %v603_v42, %v602_v41 }
  0x2f   : > { %1233 = vrot.lane.b32.xlu0 %v773_v5, %s2567_s14  ;;  %v816_v6 = vor.u32 %v815_v2, %v811_v1  ;;  %v837_v39 = vshll.u32 %v2819_v30, 16  ;;  %v844_v49 = vrot.slane %v842_v46, 1  ;;  %v1019_v52 = vrot.slane %v2819_v30, 1 }
  0x30   : > { %v2835_v50 = vsel %vm2621_vm2, 0, %v605_v47 }
  0x31   : > { %934 = vrot.lane.b32.xlu1 %v773_v5, %s2562_s26  ;;  %v821_v9 = vsel %vm737_vm4, %v816_v6, %v820_v7  ;;  %v839_v45 = vrot.slane %v837_v39, 1  ;;  %v849_v54 = vshll.u32 %v2835_v50, 16  ;;  %v847_v59 = vshrl.u32 %v2835_v50, 16 }
  0x33   : > { %1269 = vrot.lane.b32.xlu0 %v2702_v57, %s2568_s15  ;;  %v851_v60 = vrot.slane %v849_v54, 1 }
  0x35   : > { %936 = vrot.lane.b32.xlu1 %v785_v12, %s2562_s26 }
  0x37   : > { %1271 = vrot.lane.b32.xlu0 %v1006_v24, %s2568_s15 }
  0x39   : > { %1049 = vrot.lane.b32.xlu1 %v1006_v24, %s2561_s25 }
  0x3b   : > { %1047 = vrot.lane.b32.xlu0 %v2702_v57, %s2561_s25  ;;  %v586_v57 = vshrl.u32 %v2521_v55, 16  ;;  %v728_v55 = vsel %vm2621_vm2, %v602_v41, 0 }
  0x3d   : > { %1082 = vrot.lane.b32.xlu1 %v2725_v15, %s2563_s27  ;;  %v588_v62 = vrot.slane %v586_v57, 7  ;;  %v2526_v57 = vld [vmem:[%s2635_s24 + $0x48] sm:$0xff]  }
  0x3e   : > { %v610_v3 = vshll.u32 %v2526_v57, 16 }
  0x3f   : > { %1080 = vrot.lane.b32.xlu0 %v2669_v37, %s2563_s27  ;;  %v591_v5 = vor.u32 %v589_v63, %v588_v62  ;;  %v726_v14 = vsel %vm2621_vm2, %v588_v62, 0  ;;  %v607_v62 = vshrl.u32 %v2526_v57, 16 }
  0x40   : > { %v830_v21 = vshll.u32 %v726_v14, 16 }
  0x41   : > { %1126 = vrot.lane.b32.xlu1 %v797_v36, %s2566_s13  ;;  %v2791_v8 = vsel %vm2621_vm2, 0, %v591_v5  ;;  %v609_v2 = vrot.slane %v607_v62, 7 }
  0x42   : > { %v825_v13 = vshll.u32 %v2791_v8, 16  ;;  %v823_v18 = vshrl.u32 %v2791_v8, 16  ;;  %v1016_v35 = vrot.slane %v2791_v8, 1 }
  0x43   : > { %1124 = vrot.lane.b32.xlu0 %v785_v12, %s2566_s13  ;;  %v1014_v12 = vrot.slane %v725_v61, 1  ;;  %v854_v61 = vshll.u32 %v728_v55, 16 }
  0x44   : > { %v827_v19 = vrot.slane %v825_v13, 1 }
  0x45   : > { %1162 = vrot.lane.b32.xlu1 %v1009_v44, %s2565_s10  ;;  %v1015_v17 = vsel %vm994_vm3, %v1013_v11, %v1014_v12  ;;  %v856_v1 = vrot.slane %v854_v61, 1  ;;  %v2530_v11 = vld [vmem:[%s2635_s24 + $0x50] sm:$0xff]  }
  0x46   : > { %v828_v23 = vor.u32 %v827_v19, %v823_v18  ;;  %v614_v16 = vshrl.u32 %v2530_v11, 16  ;;  %v1023_v18 = vrot.slane %v728_v55, 1  ;;  %v617_v25 = vshll.u32 %v2530_v11, 16 }
  0x47   : > { %1160 = vrot.lane.b32.xlu0 %v1006_v24, %s2565_s10  ;;  %v832_v24 = vrot.slane %v830_v21, 1 }
  0x49   : > { %1195 = vrot.lane.b32.xlu1 %v2746_v34, %s2564_s28  ;;  %v833_v27 = vsel %vm737_vm4, %v828_v23, %v832_v24  ;;  %v729_v23 = vsel %vm2621_vm2, %v609_v2, 0  ;;  %v616_v24 = vrot.slane %v614_v16, 7 }
  0x4a   : > { %v866_v32 = vshll.u32 %v729_v23, 16 }
  0x4b   : > { %1193 = vrot.lane.b32.xlu0 %v2725_v15, %s2564_s28 }
  0x4c   : > { %v868_v42 = vrot.slane %v866_v32, 1 }
  0x4d   : > { %1239 = vrot.lane.b32.xlu1 %v809_v53, %s2567_s14 }
  0x4f   : > { %1237 = vrot.lane.b32.xlu0 %v797_v36, %s2567_s14 }
  0x51   : > { %938 = vrot.lane.b32.xlu1 %v797_v36, %s2562_s26  ;;  %v1017_v36 = vrot.slane %v726_v14, 1 }
  0x53   : > { %1273 = vrot.lane.b32.xlu0 %v1009_v44, %s2568_s15  ;;  %v1018_v43 = vsel %vm994_vm3, %v1016_v35, %v1017_v36  ;;  %v619_v36 = vor.u32 %v617_v25, %v616_v24 }
  0x55   : > { %940 = vrot.lane.b32.xlu1 %v809_v53, %s2562_s26 }
  0x57   : > { %1275 = vrot.lane.b32.xlu0 %v1012_v0, %s2568_s15 }
  0x59   : > { %1053 = vrot.lane.b32.xlu1 %v1012_v0, %s2561_s25 }
  0x5b   : > { %1051 = vrot.lane.b32.xlu0 %v1009_v44, %s2561_s25  ;;  %v835_v44 = vshrl.u32 %v2819_v30, 16 }
  0x5d   : > { %1086 = vrot.lane.b32.xlu1 %v2775_v56, %s2563_s27  ;;  %v840_v48 = vor.u32 %v839_v45, %v835_v44  ;;  %v2893_v45 = vsel %vm2621_vm2, 0, %v619_v36 }
  0x5e   : > { %v873_v54 = vshll.u32 %v2893_v45, 16 }
  0x5f   : > { %1084 = vrot.lane.b32.xlu0 %v2746_v34, %s2563_s27  ;;  %v845_v51 = vsel %vm737_vm4, %v840_v48, %v844_v49  ;;  %v1026_v49 = vrot.slane %v729_v23, 1 }
  0x61   : > { %1130 = vrot.lane.b32.xlu1 %v821_v9, %s2566_s13 }
  0x63   : > { %1128 = vrot.lane.b32.xlu0 %v809_v53, %s2566_s13  ;;  %v1020_v53 = vrot.slane %v727_v40, 1 }
  0x65   : > { %1166 = vrot.lane.b32.xlu1 %v1015_v17, %s2565_s10  ;;  %v1021_v58 = vsel %vm994_vm3, %v1019_v52, %v1020_v53 }
  0x67   : > { %1164 = vrot.lane.b32.xlu0 %v1012_v0, %s2565_s10  ;;  %v852_v0 = vor.u32 %v851_v60, %v847_v59  ;;  %v2531_v59 = vld [vmem:[%s2635_s24 + $0x58] sm:$0xff]  }
  0x69   : > { %1199 = vrot.lane.b32.xlu1 %v2791_v8, %s2564_s28  ;;  %v2857_v6 = vsel %vm737_vm4, %v852_v0, %v856_v1  ;;  %v871_v0 = vshrl.u32 %v2893_v45, 16  ;;  %v875_v1 = vrot.slane %v873_v54, 1 }
  0x6b   : > { %1197 = vrot.lane.b32.xlu0 %v2775_v56, %s2564_s28  ;;  %v876_v16 = vor.u32 %v875_v1, %v871_v0 }
  0x6d   : > { %1243 = vrot.lane.b32.xlu1 %v833_v27, %s2567_s14 }
  0x6f   : > { %1241 = vrot.lane.b32.xlu0 %v821_v9, %s2567_s14 }
  0x71   : > { %942 = vrot.lane.b32.xlu1 %v821_v9, %s2562_s26  ;;  %v612_v9 = vor.u32 %v610_v3, %v609_v2 }
  0x73   : > { %1277 = vrot.lane.b32.xlu0 %v1015_v17, %s2568_s15  ;;  %v2868_v14 = vsel %vm2621_vm2, 0, %v612_v9 }
  0x74   : > { %v861_v21 = vshll.u32 %v2868_v14, 16  ;;  %v859_v28 = vshrl.u32 %v2868_v14, 16  ;;  %v1025_v48 = vrot.slane %v2868_v14, 1 }
  0x75   : > { %944 = vrot.lane.b32.xlu1 %v833_v27, %s2562_s26 }
  0x76   : > { %v863_v29 = vrot.slane %v861_v21, 1 }
  0x77   : > { %1279 = vrot.lane.b32.xlu0 %v1018_v43, %s2568_s15 }
  0x78   : > { %v864_v41 = vor.u32 %v863_v29, %v859_v28  ;;  %v2532_v29 = vld [vmem:[%s2635_s24 + $0x60] sm:$0xff]  }
  0x79   : > { %1057 = vrot.lane.b32.xlu1 %v1018_v43, %s2561_s25  ;;  %v628_v36 = vshrl.u32 %v2532_v29, 16 }
  0x7a   : > { %v869_v53 = vsel %vm737_vm4, %v864_v41, %v868_v42 }
  0x7b   : > { %1055 = vrot.lane.b32.xlu0 %v1015_v17, %s2561_s25  ;;  %v1022_v17 = vrot.slane %v2835_v50, 1 }
  0x7d   : > { %1090 = vrot.lane.b32.xlu1 %v2819_v30, %s2563_s27  ;;  %v2880_v26 = vsel %vm994_vm3, %v1022_v17, %v1023_v18 }
  0x7f   : > { %1088 = vrot.lane.b32.xlu0 %v2791_v8, %s2563_s27 }
  0x81   : > { %1134 = vrot.lane.b32.xlu1 %v845_v51, %s2566_s13 }
  0x83   : > { %1132 = vrot.lane.b32.xlu0 %v833_v27, %s2566_s13 }
  0x85   : > { %1170 = vrot.lane.b32.xlu1 %v1021_v58, %s2565_s10  ;;  %v1044_v63 = vpop.permute.xlu1 %1043 }
  0x87   : > { %1168 = vrot.lane.b32.xlu0 %v1018_v43, %s2565_s10 }
  0x89   : > { %1203 = vrot.lane.b32.xlu1 %v2835_v50, %s2564_s28  ;;  %v931_v5 = vpop.permute.xlu0 %930 }
  0x8a   : > { %v1303_v39 = vsel %vm1301_vm6, %v2639_v10, %v931_v5 }
  0x8b   : > { %v1079_v7 = vpop.permute.xlu1 %1078  ;;  %1201 = vrot.lane.b32.xlu0 %v2819_v30, %s2564_s28  ;;  %v1336_v47 = vsel %vm1334_vm7, %v1303_v39, %v1044_v63  ;;  %v2915_v63 = vsel %vm994_vm3, %v1025_v48, %v1026_v49  ;;  %v1028_v39 = vrot.slane %v2893_v45, 1 }
  0x8d   : > { %1247 = vrot.lane.b32.xlu1 %v2857_v6, %s2567_s14  ;;  %v1077_v12 = vpop.permute.xlu0 %1076 }
  0x8f   : > { %v2864_v13 = vpop.permute.xlu1 %1191  ;;  %1245 = vrot.lane.b32.xlu0 %v845_v51, %s2567_s14 }
  0x91   : > { %946 = vrot.lane.b32.xlu1 %v845_v51, %s2562_s26  ;;  %v1190_v19 = vpop.permute.xlu0 %1189 }
  0x93   : > { %v1046_v22 = vpop.permute.xlu1 %1045  ;;  %1281 = vrot.lane.b32.xlu0 %v1021_v58, %s2568_s15 }
  0x95   : > { %948 = vrot.lane.b32.xlu1 %v2857_v6, %s2562_s26  ;;  %v1157_v27 = vpop.permute.xlu0 %1156 }
  0x97   : > { %v1159_v35 = vpop.permute.xlu1 %1158  ;;  %1283 = vrot.lane.b32.xlu0 %v2880_v26, %s2568_s15 }
  0x99   : > { %1061 = vrot.lane.b32.xlu1 %v2880_v26, %s2561_s25  ;;  %v933_v40 = vpop.permute.xlu0 %932 }
  0x9a   : > { %v1305_v44 = vsel %vm1301_vm6, %v2673_v38, %v933_v40  ;;  %v1369_v38 = vsel %vm1367_vm8, %v1336_v47, %v1077_v12  ;;  %v631_v47 = vshll.u32 %v2532_v29, 16 }
  0x9b   : > { %v1123_v43 = vpop.permute.xlu1 %1122  ;;  %v1338_v46 = vsel %vm1334_vm7, %v1305_v44, %v1046_v22  ;;  %1059 = vrot.lane.b32.xlu0 %v1021_v58, %s2561_s25  ;;  %v730_v58 = vsel %vm2621_vm2, %v616_v24, 0 }
  0x9c   : > { %v1371_v51 = vsel %vm1367_vm8, %v1338_v46, %v1079_v7  ;;  %v878_v2 = vshll.u32 %v730_v58, 16  ;;  %v621_v7 = vshrl.u32 %v2531_v59, 16  ;;  %v1029_v40 = vrot.slane %v730_v58, 1 }
  0x9d   : > { %1094 = vrot.lane.b32.xlu1 %v2868_v14, %s2563_s27  ;;  %v1121_v52 = vpop.permute.xlu0 %1120  ;;  %v1404_v61 = vsel %vm1400_vm9, %v1371_v51, %v1123_v43  ;;  %v630_v46 = vrot.slane %v628_v36, 7 }
  0x9e   : > { %v1402_v57 = vsel %vm1400_vm9, %v1369_v38, %v1121_v52  ;;  %v1437_v9 = vsel %vm1433_vm10, %v1404_v61, %v1159_v35  ;;  %v880_v17 = vrot.slane %v878_v2, 1  ;;  %v623_v22 = vrot.slane %v621_v7, 7 }
  0x9f   : > { %v1236_v55 = vpop.permute.xlu1 %1235  ;;  %v1435_v60 = vsel %vm1433_vm10, %v1402_v57, %v1157_v27  ;;  %1092 = vrot.lane.b32.xlu0 %v2835_v50, %s2563_s27  ;;  %v1470_v18 = vsel %vm1466_vm11, %v1437_v9, %v2864_v13  ;;  %v1030_v48 = vsel %vm994_vm3, %v1028_v39, %v1029_v40  ;;  %v633_v54 = vor.u32 %v631_v47, %v630_v46  ;;  %v2533_v9 = vld [vmem:[%s2635_s24 + $0x68] sm:$0xff]  }
  0xa0   : > { %v1468_v5 = vsel %vm1466_vm11, %v1435_v60, %v1190_v19  ;;  %v1503_v23 = vsel %vm1499_vm13, %v1470_v18, %v1236_v55  ;;  %v2937_v25 = vsel %vm737_vm4, %v876_v16, %v880_v17  ;;  %v731_v44 = vsel %vm2621_vm2, %v623_v22, 0 }
  0xa1   : > { %1138 = vrot.lane.b32.xlu1 %v869_v53, %s2566_s13  ;;  %v1234_v62 = vpop.permute.xlu0 %1233  ;;  %v890_v52 = vshll.u32 %v731_v44, 16  ;;  %v2966_v60 = vsel %vm2621_vm2, 0, %v633_v54  ;;  %v2977_v7 = vsel %vm2621_vm2, %v630_v46, 0 }
  0xa2   : > { %v1501_v11 = vsel %vm1499_vm13, %v1468_v5, %v1234_v62  ;;  %v1032_v62 = vrot.slane %v731_v44, 1  ;;  %v897_v2 = vshll.u32 %v2966_v60, 16 }
  0xa3   : > { %v2918_v3 = vpop.permute.xlu1 %934  ;;  %1136 = vrot.lane.b32.xlu0 %v2857_v6, %s2566_s13  ;;  %v624_v6 = vshll.u32 %v2531_v59, 16  ;;  %v892_v58 = vrot.slane %v890_v52, 1 }
  0xa5   : > { %1174 = vrot.lane.b32.xlu1 %v2915_v63, %s2565_s10  ;;  %v1270_v12 = vpop.permute.xlu0 %1269  ;;  %v626_v28 = vor.u32 %v624_v6, %v623_v22  ;;  %v899_v22 = vrot.slane %v897_v2, 1  ;;  %v635_v6 = vshrl.u32 %v2533_v9, 16 }
  0xa6   : > { %v1534_v21 = vsel %vm1532_vm12, %v1501_v11, %v1270_v12 }
  0xa7   : > { %v937_v19 = vpop.permute.xlu1 %936  ;;  %1172 = vrot.lane.b32.xlu0 %v2880_v26, %s2565_s10  ;;  %2438 = vmatprep.mubr.msk.bf16.mxu0 %vm1601_vm14, %v1534_v21  ;;  %v2948_v35 = vsel %vm2621_vm2, 0, %v626_v28  ;;  %v895_v21 = vshrl.u32 %v2966_v60, 16 }
  0xa8   : > { %v885_v42 = vshll.u32 %v2948_v35, 16  ;;  %v883_v38 = vshrl.u32 %v2948_v35, 16  ;;  %v1031_v61 = vrot.slane %v2948_v35, 1  ;;  %v1309_v11 = vsel %vm1301_vm6, %v2669_v37, %v937_v19 }
  0xa9   : > { %1207 = vrot.lane.b32.xlu1 %v2893_v45, %s2564_s28  ;;  %v1272_v24 = vpop.permute.xlu0 %1271  ;;  %v900_v29 = vor.u32 %v899_v22, %v895_v21 }
  0xaa   : > { %v1536_v27 = vsel %vm1532_vm12, %v1503_v23, %v1272_v24  ;;  %v887_v51 = vrot.slane %v885_v42, 1  ;;  %v2990_v16 = vsel %vm994_vm3, %v1031_v61, %v1032_v62 }
  0xab   : > { %v1050_v13 = vpop.permute.xlu1 %1049  ;;  %1205 = vrot.lane.b32.xlu0 %v2868_v14, %s2564_s28  ;;  %2439 = vmatmul.mubr.msk.bf16.vlgmr.msra.gmra.mrb[0].mxu0 %vm1601_vm14, %v1536_v27 }
  0xac   : > { %v888_v57 = vor.u32 %v887_v51, %v883_v38  ;;  %v1342_v37 = vsel %vm1334_vm7, %v1309_v11, %v1050_v13  ;;  %v2534_v51 = vld [vmem:[%s2635_s24 + $0x70] sm:$0xff]  }
  0xad   : > { %1251 = vrot.lane.b32.xlu1 %v2937_v25, %s2567_s14  ;;  %v1048_v26 = vpop.permute.xlu0 %1047  ;;  %v642_v54 = vshrl.u32 %v2534_v51, 16  ;;  %v645_v2 = vshll.u32 %v2534_v51, 16 }
  0xae   : > { %v893_v1 = vsel %vm737_vm4, %v888_v57, %v892_v58  ;;  %v1035_v57 = vrot.slane %v2977_v7, 1 }
  0xaf   : > { %v1083_v32 = vpop.permute.xlu1 %1082  ;;  %1249 = vrot.lane.b32.xlu0 %v869_v53, %s2567_s14 }
  0xb0   : > { %v1375_v27 = vsel %vm1367_vm8, %v1342_v37, %v1083_v32 }
  0xb1   : > { %950 = vrot.lane.b32.xlu1 %v869_v53, %s2562_s26  ;;  %v1081_v41 = vpop.permute.xlu0 %1080 }
  0xb3   : > { %v1127_v43 = vpop.permute.xlu1 %1126  ;;  %1285 = vrot.lane.b32.xlu0 %v2915_v63, %s2568_s15 }
  0xb4   : > { %v1408_v36 = vsel %vm1400_vm9, %v1375_v27, %v1127_v43 }
  0xb5   : > { %952 = vrot.lane.b32.xlu1 %v2937_v25, %s2562_s26  ;;  %v1125_v49 = vpop.permute.xlu0 %1124 }
  0xb7   : > { %v1163_v53 = vpop.permute.xlu1 %1162  ;;  %1287 = vrot.lane.b32.xlu0 %v1030_v48, %s2568_s15 }
  0xb8   : > { %v1441_v42 = vsel %vm1433_vm10, %v1408_v36, %v1163_v53 }
  0xb9   : > { %1065 = vrot.lane.b32.xlu1 %v1030_v48, %s2561_s25  ;;  %v1161_v55 = vpop.permute.xlu0 %1160 }
  0xbb   : > { %v1196_v59 = vpop.permute.xlu1 %1195  ;;  %1063 = vrot.lane.b32.xlu0 %v2915_v63, %s2561_s25  ;;  %v1307_v63 = vsel %vm1301_vm6, %v2659_v33, %v2918_v3  ;;  %v902_v33 = vshll.u32 %v2977_v7, 16 }
  0xbc   : > { %v1340_v12 = vsel %vm1334_vm7, %v1307_v63, %v1048_v26  ;;  %v1474_v32 = vsel %vm1466_vm11, %v1441_v42, %v1196_v59 }
  0xbd   : > { %1098 = vrot.lane.b32.xlu1 %v2948_v35, %s2563_s27  ;;  %v1194_v0 = vpop.permute.xlu0 %1193  ;;  %v1373_v17 = vsel %vm1367_vm8, %v1340_v12, %v1081_v41  ;;  %v904_v26 = vrot.slane %v902_v33, 1  ;;  %v637_v41 = vrot.slane %v635_v6, 7 }
  0xbe   : > { %v1406_v3 = vsel %vm1400_vm9, %v1373_v17, %v1125_v49 }
  0xbf   : > { %v1240_v5 = vpop.permute.xlu1 %1239  ;;  %1096 = vrot.lane.b32.xlu0 %v2893_v45, %s2563_s27  ;;  %v1439_v23 = vsel %vm1433_vm10, %v1406_v3, %v1161_v55  ;;  %v3017_v46 = vsel %vm737_vm4, %v900_v29, %v904_v26  ;;  %v1034_v55 = vrot.slane %v2966_v60, 1  ;;  %v733_v62 = vsel %vm2621_vm2, %v637_v41, 0 }
  0xc0   : > { %v1472_v24 = vsel %vm1466_vm11, %v1439_v23, %v1194_v0  ;;  %v1507_v44 = vsel %vm1499_vm13, %v1474_v32, %v1240_v5  ;;  %v644_v0 = vrot.slane %v642_v54, 7  ;;  %v914_v63 = vshll.u32 %v733_v62, 16 }
  0xc1   : > { %1142 = vrot.lane.b32.xlu1 %v893_v1, %s2566_s13  ;;  %v1238_v18 = vpop.permute.xlu0 %1237  ;;  %v1038_v3 = vrot.slane %v733_v62, 1 }
  0xc2   : > { %v1505_v28 = vsel %vm1499_vm13, %v1472_v24, %v1238_v18  ;;  %v647_v12 = vor.u32 %v645_v2, %v644_v0  ;;  %v916_v21 = vrot.slane %v914_v63, 1 }
  0xc3   : > { %v2997_v19 = vpop.permute.xlu1 %938  ;;  %1140 = vrot.lane.b32.xlu0 %v2937_v25, %s2566_s13  ;;  %v638_v25 = vshll.u32 %v2533_v9, 16 }
  0xc4   : > { %v3047_v33 = vsel %vm2621_vm2, 0, %v647_v12 }
  0xc5   : > { %1178 = vrot.lane.b32.xlu1 %v2990_v16, %s2565_s10  ;;  %v1274_v13 = vpop.permute.xlu0 %1273  ;;  %v640_v38 = vor.u32 %v638_v25, %v637_v41  ;;  %v921_v24 = vshll.u32 %v3047_v33, 16  ;;  %v919_v25 = vshrl.u32 %v3047_v33, 16 }
  0xc6   : > { %v1538_v40 = vsel %vm1532_vm12, %v1505_v28, %v1274_v13  ;;  %v734_v28 = vsel %vm2621_vm2, %v644_v0, 0  ;;  %v2535_v13 = vld [vmem:[%s2635_s24 + $0x78] sm:$0xff]   ;;  %s3220_s24 = scalar_lea.vmem %s3384_s4, %s2369_s21 }
  0xc7   : > { %v941_v39 = vpop.permute.xlu1 %940  ;;  %1176 = vrot.lane.b32.xlu0 %v1030_v48, %s2565_s10  ;;  %2442 = vmatprep.mubr.msk.bf16.mxu0 %vm1601_vm14, %v1538_v40  ;;  %v3028_v53 = vsel %vm2621_vm2, 0, %v640_v38  ;;  %v923_v42 = vrot.slane %v921_v24, 1  ;;  %v926_v32 = vshll.u32 %v734_v28, 16  ;;  %v1041_v12 = vrot.slane %v734_v28, 1 }
  0xc8   : > { %v909_v59 = vshll.u32 %v3028_v53, 16  ;;  %v907_v7 = vshrl.u32 %v3028_v53, 16  ;;  %v1037_v37 = vrot.slane %v3028_v53, 1  ;;  %v1313_v29 = vsel %vm1301_vm6, %v2746_v34, %v941_v39 }
  0xc9   : > { %1211 = vrot.lane.b32.xlu1 %v2966_v60, %s2564_s28  ;;  %v1276_v43 = vpop.permute.xlu0 %1275  ;;  %v649_v39 = vshrl.u32 %v2535_v13, 16 }
  0xca   : > { %v1540_v49 = vsel %vm1532_vm12, %v1507_v44, %v1276_v43  ;;  %v911_v9 = vrot.slane %v909_v59, 1  ;;  %v1039_v36 = vsel %vm994_vm3, %v1037_v37, %v1038_v3  ;;  %v652_v59 = vshll.u32 %v2535_v13, 16 }
  0xcb   : > { %v1054_v47 = vpop.permute.xlu1 %1053  ;;  %1209 = vrot.lane.b32.xlu0 %v2948_v35, %s2564_s28  ;;  %2443 = vmatmul.mubr.msk.bf16.gmra.mrb[4].mxu0 %vm1601_vm14, %v1540_v49 }
  0xcc   : > { %v912_v18 = vor.u32 %v911_v9, %v907_v7 }
  0xcd   : > { %1255 = vrot.lane.b32.xlu1 %v3017_v46, %s2567_s14  ;;  %v1052_v48 = vpop.permute.xlu0 %1051 }
  0xce   : > { %v917_v23 = vsel %vm737_vm4, %v912_v18, %v916_v21 }
  0xcf   : > { %v1087_v52 = vpop.permute.xlu1 %1086  ;;  %1253 = vrot.lane.b32.xlu0 %v893_v1, %s2567_s14 }
  0xd1   : > { %954 = vrot.lane.b32.xlu1 %v893_v1, %s2562_s26  ;;  %v1085_v58 = vpop.permute.xlu0 %1084  ;;  %v1036_v1 = vsel %vm994_vm3, %v1034_v55, %v1035_v57 }
  0xd3   : > { %v1131_v61 = vpop.permute.xlu1 %1130  ;;  %1289 = vrot.lane.b32.xlu0 %v2990_v16, %s2568_s15 }
  0xd5   : > { %956 = vrot.lane.b32.xlu1 %v3017_v46, %s2562_s26  ;;  %v1129_v5 = vpop.permute.xlu0 %1128 }
  0xd7   : > { %v1167_v11 = vpop.permute.xlu1 %1166  ;;  %1291 = vrot.lane.b32.xlu0 %v1036_v1, %s2568_s15 }
  0xd9   : > { %1069 = vrot.lane.b32.xlu1 %v1036_v1, %s2561_s25  ;;  %v1165_v17 = vpop.permute.xlu0 %1164 }
  0xdb   : > { %v1200_v22 = vpop.permute.xlu1 %1199  ;;  %1067 = vrot.lane.b32.xlu0 %v2990_v16, %s2561_s25  ;;  %v1311_v16 = vsel %vm1301_vm6, %v2725_v15, %v2997_v19  ;;  %v1346_v15 = vsel %vm1334_vm7, %v1313_v29, %v1054_v47  ;;  %v924_v47 = vor.u32 %v923_v42, %v919_v25 }
  0xdc   : > { %v1344_v26 = vsel %vm1334_vm7, %v1311_v16, %v1052_v48  ;;  %v1379_v49 = vsel %vm1367_vm8, %v1346_v15, %v1087_v52  ;;  %v928_v48 = vrot.slane %v926_v32, 1 }
  0xdd   : > { %1102 = vrot.lane.b32.xlu1 %v3028_v53, %s2563_s27  ;;  %v1198_v6 = vpop.permute.xlu0 %1197  ;;  %v1377_v40 = vsel %vm1367_vm8, %v1344_v26, %v1085_v58  ;;  %v1412_v54 = vsel %vm1400_vm9, %v1379_v49, %v1131_v61  ;;  %v651_v58 = vrot.slane %v649_v39, 7 }
  0xde   : > { %v1410_v34 = vsel %vm1400_vm9, %v1377_v40, %v1129_v5  ;;  %v929_v61 = vsel %vm737_vm4, %v924_v47, %v928_v48 }
  0xdf   : > { %v1244_v27 = vpop.permute.xlu1 %1243  ;;  %1100 = vrot.lane.b32.xlu0 %v2966_v60, %s2563_s27  ;;  %v1443_v44 = vsel %vm1433_vm10, %v1410_v34, %v1165_v17  ;;  %v654_v7 = vor.u32 %v652_v59, %v651_v58 }
  0xe0   : > { %v1476_v43 = vsel %vm1466_vm11, %v1443_v44, %v1198_v6 }
  0xe1   : > { %1146 = vrot.lane.b32.xlu1 %v917_v23, %s2566_s13  ;;  %v1242_v41 = vpop.permute.xlu0 %1241  ;;  %v717_v63 = vsel %vm2621_vm2, 0, %v654_v7 }
  0xe2   : > { %v1509_v38 = vsel %vm1499_vm13, %v1476_v43, %v1242_v41  ;;  %v1111_v18 = vshll.u32 %v717_v63, 16  ;;  %v1109_v6 = vshrl.u32 %v717_v63, 16  ;;  %v1153_v40 = vrot.slane %v717_v63, 1 }
  0xe3   : > { %v3073_v19 = vpop.permute.xlu1 %942  ;;  %1144 = vrot.lane.b32.xlu0 %v3017_v46, %s2566_s13  ;;  %v1445_v46 = vsel %vm1433_vm10, %v1412_v54, %v1167_v11  ;;  %v1040_v11 = vrot.slane %v3047_v33, 1 }
  0xe4   : > { %v1478_v52 = vsel %vm1466_vm11, %v1445_v46, %v1200_v22  ;;  %v735_v22 = vsel %vm2621_vm2, %v651_v58, 0  ;;  %v1113_v24 = vrot.slane %v1111_v18, 1  ;;  %v1315_v42 = vsel %vm1301_vm6, %v2775_v56, %v3073_v19 }
  0xe5   : > { %1182 = vrot.lane.b32.xlu1 %v1039_v36, %s2565_s10  ;;  %v1278_v51 = vpop.permute.xlu0 %1277  ;;  %v1511_v62 = vsel %vm1499_vm13, %v1478_v52, %v1244_v27  ;;  %v1042_v37 = vsel %vm994_vm3, %v1040_v11, %v1041_v12  ;;  %v1116_v27 = vshll.u32 %v735_v22, 16  ;;  %v1154_v41 = vrot.slane %v735_v22, 1 }
  0xe6   : > { %v1542_v57 = vsel %vm1532_vm12, %v1509_v38, %v1278_v51  ;;  %v1114_v13 = vor.u32 %v1113_v24, %v1109_v6 }
  0xe7   : > { %v945_v55 = vpop.permute.xlu1 %944  ;;  %1180 = vrot.lane.b32.xlu0 %v1036_v1, %s2565_s10  ;;  %2446 = vmatprep.mubr.msk.bf16.mxu0 %vm1601_vm14, %v1542_v57  ;;  %v1118_v16 = vrot.slane %v1116_v27, 1  ;;  %v1155_v39 = vsel %vm994_vm3, %v1153_v40, %v1154_v41 }
  0xe8   : > { %v1317_v32 = vsel %vm1301_vm6, %v2791_v8, %v945_v55 }
  0xe9   : > { %1215 = vrot.lane.b32.xlu1 %v3047_v33, %s2564_s28  ;;  %v1280_v0 = vpop.permute.xlu0 %1279  ;;  %v1119_v26 = vsel %vm737_vm4, %v1114_v13, %v1118_v16 }
  0xea   : > { %v1544_v5 = vsel %vm1532_vm12, %v1511_v62, %v1280_v0 }
  0xeb   : > { %v1058_v2 = vpop.permute.xlu1 %1057  ;;  %1213 = vrot.lane.b32.xlu0 %v3028_v53, %s2564_s28  ;;  %2447 = vmatmul.mubr.msk.bf16.gmra.mrb[8].mxu0 %vm1601_vm14, %v1544_v5 }
  0xec   : > { %v1350_v44 = vsel %vm1334_vm7, %v1317_v32, %v1058_v2 }
  0xed   : > { %1259 = vrot.lane.b32.xlu1 %v929_v61, %s2567_s14  ;;  %v1056_v1 = vpop.permute.xlu0 %1055 }
  0xef   : > { %v1091_v9 = vpop.permute.xlu1 %1090  ;;  %1257 = vrot.lane.b32.xlu0 %v917_v23, %s2567_s14 }
  0xf0   : > { %v1383_v49 = vsel %vm1367_vm8, %v1350_v44, %v1091_v9 }
  0xf1   : > { %958 = vrot.lane.b32.xlu1 %v917_v23, %s2562_s26  ;;  %v1089_v17 = vpop.permute.xlu0 %1088 }
  0xf3   : > { %v1135_v21 = vpop.permute.xlu1 %1134  ;;  %1293 = vrot.lane.b32.xlu0 %v1039_v36, %s2568_s15 }
  0xf4   : > { %v1416_v47 = vsel %vm1400_vm9, %v1383_v49, %v1135_v21 }
  0xf5   : > { %960 = vrot.lane.b32.xlu1 %v929_v61, %s2562_s26  ;;  %v1133_v3 = vpop.permute.xlu0 %1132  ;;  %s395_s26 = scalar_lea.vmem %s3385_s5, %s2295_s2 }
  0xf7   : > { %v1171_v23 = vpop.permute.xlu1 %1170  ;;  %1295 = vrot.lane.b32.xlu0 %v1042_v37, %s2568_s15 }
  0xf8   : > { %v1449_v55 = vsel %vm1433_vm10, %v1416_v47, %v1171_v23 }
  0xf9   : > { %1073 = vrot.lane.b32.xlu1 %v1042_v37, %s2561_s25  ;;  %v1169_v28 = vpop.permute.xlu0 %1168 }
  0xfb   : > { %v1204_v4 = vpop.permute.xlu1 %1203  ;;  %1071 = vrot.lane.b32.xlu0 %v1039_v36, %s2561_s25  ;;  %v1348_v36 = vsel %vm1334_vm7, %v1315_v42, %v1056_v1 }
  0xfc   : > { %v1381_v15 = vsel %vm1367_vm8, %v1348_v36, %v1089_v17  ;;  %v1482_v57 = vsel %vm1466_vm11, %v1449_v55, %v1204_v4 }
  0xfd   : > { %1106 = vrot.lane.b32.xlu1 %v717_v63, %s2563_s27  ;;  %v1202_v29 = vpop.permute.xlu0 %1201  ;;  %v1414_v43 = vsel %vm1400_vm9, %v1381_v15, %v1133_v3 }
  0xfe   : > { %v1447_v19 = vsel %vm1433_vm10, %v1414_v43, %v1169_v28 }
  0xff   : > { %v1248_v25 = vpop.permute.xlu1 %1247  ;;  %1104 = vrot.lane.b32.xlu0 %v3047_v33, %s2563_s27  ;;  %v1480_v8 = vsel %vm1466_vm11, %v1447_v19, %v1202_v29 }
 0x100   : > { %v1515_v58 = vsel %vm1499_vm13, %v1482_v57, %v1248_v25 }
 0x101   : > { %1150 = vrot.lane.b32.xlu1 %v1119_v26, %s2566_s13  ;;  %v1246_v34 = vpop.permute.xlu0 %1245 }
 0x102   : > { %v1513_v38 = vsel %vm1499_vm13, %v1480_v8, %v1246_v34 }
 0x103   : > { %v947_v56 = vpop.permute.xlu1 %946  ;;  %1148 = vrot.lane.b32.xlu0 %v929_v61, %s2566_s13 }
 0x105   : > { %1186 = vrot.lane.b32.xlu1 %v1155_v39, %s2565_s10  ;;  %v1282_v51 = vpop.permute.xlu0 %1281 }
 0x106   : > { %v1546_v54 = vsel %vm1532_vm12, %v1513_v38, %v1282_v51 }
 0x107   : > { %v949_v48 = vpop.permute.xlu1 %948  ;;  %1184 = vrot.lane.b32.xlu0 %v1042_v37, %s2565_s10  ;;  %2450 = vmatprep.mubr.msk.bf16.mxu0 %vm1601_vm14, %v1546_v54 }
 0x108   : > { %v1321_v11 = vsel %vm1301_vm6, %v2835_v50, %v949_v48 }
 0x109   : > { %1219 = vrot.lane.b32.xlu1 %v2639_v10, %s2564_s28  ;;  %v1284_v59 = vpop.permute.xlu0 %1283 }
 0x10a   : > { %v1548_v52 = vsel %vm1532_vm12, %v1515_v58, %v1284_v59 }
 0x10b   : > { %v1062_v46 = vpop.permute.xlu1 %1061  ;;  %1217 = vrot.lane.b32.xlu0 %v717_v63, %s2564_s28  ;;  %2451 = vmatmul.mubr.msk.bf16.gmra.mrb[12].mxu0 %vm1601_vm14, %v1548_v52 }
 0x10c   : > { %v1354_v18 = vsel %vm1334_vm7, %v1321_v11, %v1062_v46 }
 0x10d   : > { %1263 = vrot.lane.b32.xlu1 %v2653_v31, %s2567_s14  ;;  %v1060_v62 = vpop.permute.xlu0 %1059  ;;  %v1319_v31 = vsel %vm1301_vm6, %v2819_v30, %v947_v56 }
 0x10e   : > { %v1352_v12 = vsel %vm1334_vm7, %v1319_v31, %v1060_v62 }
 0x10f   : > { %v1095_v0 = vpop.permute.xlu1 %1094  ;;  %1261 = vrot.lane.b32.xlu0 %v1119_v26, %s2567_s14 }
 0x110   : > { %v1387_v6 = vsel %vm1367_vm8, %v1354_v18, %v1095_v0 }
 0x111   : > { %1299 = vrot.lane.b32.xlu1 %v2648_v20, %s2568_s15  ;;  %v1093_v10 = vpop.permute.xlu0 %1092 }
 0x112   : > { %v1385_v20 = vsel %vm1367_vm8, %v1352_v12, %v1093_v10 }
 0x113   : > { %v1139_v61 = vpop.permute.xlu1 %1138  ;;  %1297 = vrot.lane.b32.xlu0 %v1155_v39, %s2568_s15 }
 0x114   : > { %v1420_v50 = vsel %vm1400_vm9, %v1387_v6, %v1139_v61 }
 0x115   : > { %v1137_v2 = vpop.permute.xlu0 %1136 }
 0x116   : > { %v1418_v21 = vsel %vm1400_vm9, %v1385_v20, %v1137_v2 }
 0x117   : > { %v1175_v5 = vpop.permute.xlu1 %1174 }
 0x118   : > { %v1453_v28 = vsel %vm1433_vm10, %v1420_v50, %v1175_v5 }
 0x119   : > { %v1173_v7 = vpop.permute.xlu0 %1172 }
 0x11a   : > { %v1451_v37 = vsel %vm1433_vm10, %v1418_v21, %v1173_v7 }
 0x11b   : > { %v1208_v1 = vpop.permute.xlu1 %1207 }
 0x11c   : > { %v1486_v13 = vsel %vm1466_vm11, %v1453_v28, %v1208_v1 }
 0x11d   : > { %v1206_v9 = vpop.permute.xlu0 %1205 }
 0x11e   : > { %v1484_v3 = vsel %vm1466_vm11, %v1451_v37, %v1206_v9 }
 0x11f   : > { %v1252_v63 = vpop.permute.xlu1 %1251 }
 0x120   : > { %v1519_v16 = vsel %vm1499_vm13, %v1486_v13, %v1252_v63 }
 0x121   : > { %v1250_v17 = vpop.permute.xlu0 %1249 }
 0x122   : > { %v1517_v30 = vsel %vm1499_vm13, %v1484_v3, %v1250_v17 }
 0x123   : > { %v951_v22 = vpop.permute.xlu1 %950 }
 0x124   : > { %v1323_v43 = vsel %vm1301_vm6, %v2868_v14, %v951_v22 }
 0x125   : > { %v1286_v24 = vpop.permute.xlu0 %1285 }
 0x126   : > { %v1550_v23 = vsel %vm1532_vm12, %v1517_v30, %v1286_v24 }
 0x127   : > { %v953_v27 = vpop.permute.xlu1 %952  ;;  %2454 = vmatprep.mubr.msk.bf16.mxu1 %vm1601_vm14, %v1550_v23 }
 0x128   : > { %v1325_v56 = vsel %vm1301_vm6, %v2893_v45, %v953_v27 }
 0x129   : > { %v1288_v4 = vpop.permute.xlu0 %1287 }
 0x12a   : > { %v1552_v26 = vsel %vm1532_vm12, %v1519_v16, %v1288_v4 }
 0x12b   : > { %v1066_v29 = vpop.permute.xlu1 %1065  ;;  %2455 = vmatmul.mubr.msk.bf16.vlgmr.msra.gmra.mrb[0].mxu1 %vm1601_vm14, %v1552_v26 }
 0x12c   : > { %v1358_v38 = vsel %vm1334_vm7, %v1325_v56, %v1066_v29 }
 0x12d   : > { %v1064_v40 = vpop.permute.xlu0 %1063 }
 0x12e   : > { %v1356_v19 = vsel %vm1334_vm7, %v1323_v43, %v1064_v40 }
 0x12f   : > { %v1099_v41 = vpop.permute.xlu1 %1098 }
 0x130   : > { %v1391_v55 = vsel %vm1367_vm8, %v1358_v38, %v1099_v41 }
 0x131   : > { %v1097_v25 = vpop.permute.xlu0 %1096 }
 0x132   : > { %v1389_v8 = vsel %vm1367_vm8, %v1356_v19, %v1097_v25 }
 0x133   : > { %v1143_v42 = vpop.permute.xlu1 %1142 }
 0x134   : > { %v1424_v45 = vsel %vm1400_vm9, %v1391_v55, %v1143_v42 }
 0x135   : > { %v1141_v32 = vpop.permute.xlu0 %1140 }
 0x136   : > { %v1422_v51 = vsel %vm1400_vm9, %v1389_v8, %v1141_v32 }
 0x137   : > { %v1179_v36 = vpop.permute.xlu1 %1178 }
 0x138   : > { %v1457_v46 = vsel %vm1433_vm10, %v1424_v45, %v1179_v36 }
 0x139   : > { %v1177_v15 = vpop.permute.xlu0 %1176 }
 0x13a   : > { %v1455_v48 = vsel %vm1433_vm10, %v1422_v51, %v1177_v15 }
 0x13b   : > { %v1212_v34 = vpop.permute.xlu1 %1211 }
 0x13c   : > { %v1490_v52 = vsel %vm1466_vm11, %v1457_v46, %v1212_v34 }
 0x13d   : > { %v1210_v39 = vpop.permute.xlu0 %1209 }
 0x13e   : > { %v1488_v54 = vsel %vm1466_vm11, %v1455_v48, %v1210_v39 }
 0x13f   : > { %v1256_v44 = vpop.permute.xlu1 %1255 }
 0x140   : > { %v1523_v62 = vsel %vm1499_vm13, %v1490_v52, %v1256_v44 }
 0x141   : > { %v1254_v49 = vpop.permute.xlu0 %1253 }
 0x142   : > { %v1521_v14 = vsel %vm1499_vm13, %v1488_v54, %v1254_v49 }
 0x143   : > { %v955_v47 = vpop.permute.xlu1 %954 }
 0x144   : > { %v1327_v17 = vsel %vm1301_vm6, %v2948_v35, %v955_v47 }
 0x145   : > { %v1290_v57 = vpop.permute.xlu0 %1289 }
 0x146   : > { %v1554_v59 = vsel %vm1532_vm12, %v1521_v14, %v1290_v57 }
 0x147   : > { %v957_v58 = vpop.permute.xlu1 %956  ;;  %2458 = vmatprep.mubr.msk.bf16.mxu1 %vm1601_vm14, %v1554_v59 }
 0x148   : > { %v1329_v18 = vsel %vm1301_vm6, %v2966_v60, %v957_v58 }
 0x149   : > { %v1292_v0 = vpop.permute.xlu0 %1291 }
 0x14a   : > { %v1556_v61 = vsel %vm1532_vm12, %v1523_v62, %v1292_v0 }
 0x14b   : > { %v1070_v10 = vpop.permute.xlu1 %1069  ;;  %2459 = vmatmul.mubr.msk.bf16.gmra.mrb[4].mxu1 %vm1601_vm14, %v1556_v61 }
 0x14c   : > { %v1362_v3 = vsel %vm1334_vm7, %v1329_v18, %v1070_v10 }
 0x14d   : > { %v1068_v2 = vpop.permute.xlu0 %1067 }
 0x14e   : > { %v1360_v21 = vsel %vm1334_vm7, %v1327_v17, %v1068_v2 }
 0x14f   : > { %v1103_v5 = vpop.permute.xlu1 %1102 }
 0x150   : > { %v1395_v27 = vsel %vm1367_vm8, %v1362_v3, %v1103_v5 }
 0x151   : > { %v1101_v7 = vpop.permute.xlu0 %1100 }
 0x152   : > { %v1393_v22 = vsel %vm1367_vm8, %v1360_v21, %v1101_v7 }
 0x153   : > { %v1147_v1 = vpop.permute.xlu1 %1146 }
 0x154   : > { %v1428_v60 = vsel %vm1400_vm9, %v1395_v27, %v1147_v1 }
 0x155   : > { %v1145_v9 = vpop.permute.xlu0 %1144 }
 0x156   : > { %v1426_v6 = vsel %vm1400_vm9, %v1393_v22, %v1145_v9 }
 0x157   : > { %v1183_v63 = vpop.permute.xlu1 %1182 }
 0x158   : > { %v1461_v16 = vsel %vm1433_vm10, %v1428_v60, %v1183_v63 }
 0x159   : > { %v1181_v31 = vpop.permute.xlu0 %1180 }
 0x15a   : > { %v1459_v24 = vsel %vm1433_vm10, %v1426_v6, %v1181_v31 }
 0x15b   : > { %v1216_v11 = vpop.permute.xlu1 %1215 }
 0x15c   : > { %v1494_v4 = vsel %vm1466_vm11, %v1461_v16, %v1216_v11 }
 0x15d   : > { %v1214_v12 = vpop.permute.xlu0 %1213 }
 0x15e   : > { %v1492_v50 = vsel %vm1466_vm11, %v1459_v24, %v1214_v12 }
 0x15f   : > { %v1260_v20 = vpop.permute.xlu1 %1259 }
 0x160   : > { %v1527_v29 = vsel %vm1499_vm13, %v1494_v4, %v1260_v20 }
 0x161   : > { %v1258_v37 = vpop.permute.xlu0 %1257 }
 0x162   : > { %v1525_v35 = vsel %vm1499_vm13, %v1492_v50, %v1258_v37 }
 0x163   : > { %v959_v30 = vpop.permute.xlu1 %958 }
 0x164   : > { %v1331_v56 = vsel %vm1301_vm6, %v3028_v53, %v959_v30 }
 0x165   : > { %v1294_v23 = vpop.permute.xlu0 %1293 }
 0x166   : > { %v1558_v13 = vsel %vm1532_vm12, %v1525_v35, %v1294_v23 }
 0x167   : > { %v961_v28 = vpop.permute.xlu1 %960  ;;  %2462 = vmatprep.mubr.msk.bf16.mxu1 %vm1601_vm14, %v1558_v13 }
 0x168   : > { %v1333_v44 = vsel %vm1301_vm6, %v3047_v33, %v961_v28 }
 0x169   : > { %v1296_v26 = vpop.permute.xlu0 %1295 }
 0x16a   : > { %v1560_v41 = vsel %vm1532_vm12, %v1527_v29, %v1296_v26 }
 0x16b   : > { %v1074_v40 = vpop.permute.xlu1 %1073  ;;  %2463 = vmatmul.mubr.msk.bf16.gmra.mrb[8].mxu1 %vm1601_vm14, %v1560_v41 }
 0x16c   : > { %v1366_v19 = vsel %vm1334_vm7, %v1333_v44, %v1074_v40 }
 0x16d   : > { %v1072_v25 = vpop.permute.xlu0 %1071 }
 0x16e   : > { %v1364_v49 = vsel %vm1334_vm7, %v1331_v56, %v1072_v25 }
 0x16f   : > { %v1107_v42 = vpop.permute.xlu1 %1106 }
 0x170   : > { %v1399_v48 = vsel %vm1367_vm8, %v1366_v19, %v1107_v42 }
 0x171   : > { %v1105_v32 = vpop.permute.xlu0 %1104 }
 0x172   : > { %v1397_v33 = vsel %vm1367_vm8, %v1364_v49, %v1105_v32 }
 0x173   : > { %v1151_v36 = vpop.permute.xlu1 %1150 }
 0x174   : > { %v1432_v45 = vsel %vm1400_vm9, %v1399_v48, %v1151_v36 }
 0x175   : > { %v1149_v15 = vpop.permute.xlu0 %1148 }
 0x176   : > { %v1430_v54 = vsel %vm1400_vm9, %v1397_v33, %v1149_v15 }
 0x177   : > { %v1187_v34 = vpop.permute.xlu1 %1186 }
 0x178   : > { %v1465_v5 = vsel %vm1433_vm10, %v1432_v45, %v1187_v34 }
 0x179   : > { %v1185_v39 = vpop.permute.xlu0 %1184 }
 0x17a   : > { %v1463_v58 = vsel %vm1433_vm10, %v1430_v54, %v1185_v39 }
 0x17b   : > { %v1220_v43 = vpop.permute.xlu1 %1219 }
 0x17c   : > { %v1498_v20 = vsel %vm1466_vm11, %v1465_v5, %v1220_v43 }
 0x17d   : > { %v1218_v8 = vpop.permute.xlu0 %1217 }
 0x17e   : > { %v2440_v51 = vpop.f32.mrb[0].mxu0  ;;  %v1496_v7 = vsel %vm1466_vm11, %v1463_v58, %v1218_v8 }
 0x17f   : > { %v1264_v38 = vpop.permute.xlu1 %1263  ;;  %v2377_v47 = vpack.c.bf16 %v2440_v51, %v2440_v51  ;;  %v1672_v53 = vpop.f32.mrb[1].mxu0  ;;  %v2031_v59 = vmul.f32 %v2440_v51, %v2440_v51  ;;  %v1963_v9 = vsel %vm1301_vm6, %v2440_v51, 0.0 }
 0x180   : > { %v2375_v55 = vpack.c.bf16 %v1672_v53, %v1672_v53  ;;  %v2029_v14 = vmul.f32 %v1672_v53, %v1672_v53  ;;  %v2441_v57 = vpop.f32.mrb[2].mxu0  ;;  %v1960_v0 = vsel %vm1301_vm6, %v1672_v53, 0.0  ;;  %v1531_v37 = vsel %vm1499_vm13, %v1498_v20, %v1264_v38 }
 0x181   : > { %1930 = vst.msk [vmem:[%s3220_s24 + $0x8] sm:$0xf] %vm1927_vm15, %v2377_v47  ;;  %v2378_v46 = vpack.c.bf16 %v2441_v57, %v2441_v57  ;;  %v1675_v52 = vpop.f32.mrb[3].mxu0  ;;  %v1262_v62 = vpop.permute.xlu0 %1261  ;;  %v2032_v31 = vmul.f32 %v2441_v57, %v2441_v57  ;;  %v2064_v3 = vsel %vm1301_vm6, %v2031_v59, 0.0  ;;  %v1965_v6 = vsel %vm1301_vm6, %v2441_v57, 0.0 }
 0x182   : > { %1928 = vst.msk [vmem:[%s3220_s24] sm:$0xf] %vm1927_vm15, %v2375_v55  ;;  %v2376_v10 = vpack.c.bf16 %v1675_v52, %v1675_v52  ;;  %v1961_v61 = vsel %vm1301_vm6, %v1675_v52, 0.0  ;;  %v2030_v2 = vmul.f32 %v1675_v52, %v1675_v52  ;;  %v2061_v63 = vsel %vm1301_vm6, %v2029_v14, 0.0 }
 0x183   : > { %1931 = vst.msk [vmem:[%s3220_s24 + $0xc] sm:$0xf] %vm1927_vm15, %v2378_v46  ;;  %v1962_v1 = vadd.f32 %v1961_v61, %v1960_v0  ;;  %v1300_v11 = vpop.permute.xlu1 %1299  ;;  %v1529_v21 = vsel %vm1499_vm13, %v1496_v7, %v1262_v62  ;;  %v2066_v35 = vsel %vm1301_vm6, %v2032_v31, 0.0 }
 0x184   : > { %1929 = vst.msk [vmem:[%s3220_s24 + $0x4] sm:$0xf] %vm1927_vm15, %v2376_v10  ;;  %v2062_v12 = vsel %vm1301_vm6, %v2030_v2, 0.0  ;;  %v1564_v24 = vsel %vm1532_vm12, %v1531_v37, %v1300_v11 }
 0x185   : > { %v1964_v17 = vadd.f32 %v1963_v9, %v1962_v1  ;;  %v2063_v18 = vadd.f32 %v2062_v12, %v2061_v63  ;;  %v1298_v22 = vpop.permute.xlu0 %1297 }
 0x186   : > { %v1562_v30 = vsel %vm1532_vm12, %v1529_v21, %v1298_v22 }
 0x187   : > { %v2065_v50 = vadd.f32 %v2064_v3, %v2063_v18  ;;  %2466 = vmatprep.mubr.msk.bf16.mxu1 %vm1601_vm14, %v1562_v30  ;;  %v1966_v27 = vadd.f32 %v1965_v6, %v1964_v17 }
 0x188   : > { %2467 = vmatmul.mubr.msk.bf16.gmra.mrb[12].mxu1 %vm1601_vm14, %v1564_v24 }
 0x189   : > { %v2067_v23 = vadd.f32 %v2066_v35, %v2065_v50 }
 0x19e   : > { %v2444_v60 = vpop.f32.mrb[4].mxu0 }
 0x19f   : > { %v2381_v28 = vpack.c.bf16 %v2444_v60, %v2444_v60  ;;  %v1688_v13 = vpop.f32.mrb[5].mxu0  ;;  %v2035_v15 = vmul.f32 %v2444_v60, %v2444_v60  ;;  %v1971_v43 = vsel %vm1301_vm6, %v2444_v60, 0.0 }
 0x1a0   : > { %v2379_v16 = vpack.c.bf16 %v1688_v13, %v1688_v13  ;;  %v1967_v4 = vsel %vm1301_vm6, %v1688_v13, 0.0  ;;  %v2033_v29 = vmul.f32 %v1688_v13, %v1688_v13  ;;  %v2445_v26 = vpop.f32.mrb[6].mxu0 }
 0x1a1   : > { %1934 = vst.msk [vmem:[%s3220_s24 + $0x18] sm:$0xf] %vm1927_vm15, %v2381_v28  ;;  %v1968_v40 = vadd.f32 %v1967_v4, %v1966_v27  ;;  %v2382_v41 = vpack.c.bf16 %v2445_v26, %v2445_v26  ;;  %v1691_v25 = vpop.f32.mrb[7].mxu0  ;;  %v2036_v56 = vmul.f32 %v2445_v26, %v2445_v26  ;;  %v1973_v49 = vsel %vm1301_vm6, %v2445_v26, 0.0 }
 0x1a2   : > { %1932 = vst.msk [vmem:[%s3220_s24 + $0x10] sm:$0xf] %vm1927_vm15, %v2379_v16  ;;  %v2068_v42 = vsel %vm1301_vm6, %v2033_v29, 0.0  ;;  %v2380_v32 = vpack.c.bf16 %v1691_v25, %v1691_v25  ;;  %v1969_v36 = vsel %vm1301_vm6, %v1691_v25, 0.0  ;;  %v2034_v44 = vmul.f32 %v1691_v25, %v1691_v25 }
 0x1a3   : > { %v2069_v34 = vadd.f32 %v2068_v42, %v2067_v23  ;;  %1935 = vst.msk [vmem:[%s3220_s24 + $0x1c] sm:$0xf] %vm1927_vm15, %v2382_v41  ;;  %v1970_v39 = vadd.f32 %v1969_v36, %v1968_v40  ;;  %v2072_v51 = vsel %vm1301_vm6, %v2035_v15, 0.0  ;;  %v2074_v53 = vsel %vm1301_vm6, %v2036_v56, 0.0 }
 0x1a4   : > { %1933 = vst.msk [vmem:[%s3220_s24 + $0x14] sm:$0xf] %vm1927_vm15, %v2380_v32  ;;  %v2070_v8 = vsel %vm1301_vm6, %v2034_v44, 0.0 }
 0x1a5   : > { %v1972_v19 = vadd.f32 %v1971_v43, %v1970_v39  ;;  %v2071_v38 = vadd.f32 %v2070_v8, %v2069_v34 }
 0x1a7   : > { %v1974_v33 = vadd.f32 %v1973_v49, %v1972_v19  ;;  %v2073_v47 = vadd.f32 %v2072_v51, %v2071_v38 }
 0x1a9   : > { %v2075_v48 = vadd.f32 %v2074_v53, %v2073_v47 }
 0x1be   : > { %v2448_v54 = vpop.f32.mrb[8].mxu0 }
 0x1bf   : > { %v2385_v55 = vpack.c.bf16 %v2448_v54, %v2448_v54  ;;  %v1704_v14 = vpop.f32.mrb[9].mxu0  ;;  %v2039_v2 = vmul.f32 %v2448_v54, %v2448_v54  ;;  %v1979_v9 = vsel %vm1301_vm6, %v2448_v54, 0.0 }
 0x1c0   : > { %v2383_v57 = vpack.c.bf16 %v1704_v14, %v1704_v14  ;;  %v1975_v45 = vsel %vm1301_vm6, %v1704_v14, 0.0  ;;  %v2037_v58 = vmul.f32 %v1704_v14, %v1704_v14  ;;  %v2449_v59 = vpop.f32.mrb[10].mxu0 }
 0x1c1   : > { %1938 = vst.msk [vmem:[%s3220_s24 + $0x28] sm:$0xf] %vm1927_vm15, %v2385_v55  ;;  %v1976_v46 = vadd.f32 %v1975_v45, %v1974_v33  ;;  %v2386_v52 = vpack.c.bf16 %v2449_v59, %v2449_v59  ;;  %v1707_v62 = vpop.f32.mrb[11].mxu0  ;;  %v2040_v63 = vmul.f32 %v2449_v59, %v2449_v59  ;;  %v1981_v12 = vsel %vm1301_vm6, %v2449_v59, 0.0 }
 0x1c2   : > { %1936 = vst.msk [vmem:[%s3220_s24 + $0x20] sm:$0xf] %vm1927_vm15, %v2383_v57  ;;  %v2076_v0 = vsel %vm1301_vm6, %v2037_v58, 0.0  ;;  %v2384_v10 = vpack.c.bf16 %v1707_v62, %v1707_v62  ;;  %v1977_v61 = vsel %vm1301_vm6, %v1707_v62, 0.0  ;;  %v2038_v1 = vmul.f32 %v1707_v62, %v1707_v62 }
 0x1c3   : > { %v2077_v5 = vadd.f32 %v2076_v0, %v2075_v48  ;;  %1939 = vst.msk [vmem:[%s3220_s24 + $0x2c] sm:$0xf] %vm1927_vm15, %v2386_v52  ;;  %v1978_v7 = vadd.f32 %v1977_v61, %v1976_v46  ;;  %v2080_v17 = vsel %vm1301_vm6, %v2039_v2, 0.0  ;;  %v2082_v22 = vsel %vm1301_vm6, %v2040_v63, 0.0 }
 0x1c4   : > { %1937 = vst.msk [vmem:[%s3220_s24 + $0x24] sm:$0xf] %vm1927_vm15, %v2384_v10  ;;  %v2078_v11 = vsel %vm1301_vm6, %v2038_v1, 0.0 }
 0x1c5   : > { %v1980_v31 = vadd.f32 %v1979_v9, %v1978_v7  ;;  %v2079_v20 = vadd.f32 %v2078_v11, %v2077_v5 }
 0x1c7   : > { %v1982_v18 = vadd.f32 %v1981_v12, %v1980_v31  ;;  %v2081_v21 = vadd.f32 %v2080_v17, %v2079_v20 }
 0x1c9   : > { %v2083_v37 = vadd.f32 %v2082_v22, %v2081_v21 }
 0x1de   : > { %v2452_v3 = vpop.f32.mrb[12].mxu0 }
 0x1df   : > { %v2389_v6 = vpack.c.bf16 %v2452_v3, %v2452_v3  ;;  %v1720_v30 = vpop.f32.mrb[13].mxu0  ;;  %v2043_v29 = vmul.f32 %v2452_v3, %v2452_v3  ;;  %v1987_v25 = vsel %vm1301_vm6, %v2452_v3, 0.0 }
 0x1e0   : > { %v2387_v24 = vpack.c.bf16 %v1720_v30, %v1720_v30  ;;  %v1983_v50 = vsel %vm1301_vm6, %v1720_v30, 0.0  ;;  %v2041_v27 = vmul.f32 %v1720_v30, %v1720_v30  ;;  %v2453_v35 = vpop.f32.mrb[14].mxu0 }
 0x1e1   : > { %1942 = vst.msk [vmem:[%s3220_s24 + $0x38] sm:$0xf] %vm1927_vm15, %v2389_v6  ;;  %v1984_v23 = vadd.f32 %v1983_v50, %v1982_v18  ;;  %v2390_v60 = vpack.c.bf16 %v2453_v35, %v2453_v35  ;;  %v1723_v28 = vpop.f32.mrb[15].mxu0  ;;  %v2044_v42 = vmul.f32 %v2453_v35, %v2453_v35  ;;  %v1989_v15 = vsel %vm1301_vm6, %v2453_v35, 0.0 }
 0x1e2   : > { %1940 = vst.msk [vmem:[%s3220_s24 + $0x30] sm:$0xf] %vm1927_vm15, %v2387_v24  ;;  %v2084_v13 = vsel %vm1301_vm6, %v2041_v27, 0.0  ;;  %v2388_v16 = vpack.c.bf16 %v1723_v28, %v1723_v28  ;;  %v1985_v4 = vsel %vm1301_vm6, %v1723_v28, 0.0  ;;  %v2042_v41 = vmul.f32 %v1723_v28, %v1723_v28 }
 0x1e3   : > { %v2085_v26 = vadd.f32 %v2084_v13, %v2083_v37  ;;  %1943 = vst.msk [vmem:[%s3220_s24 + $0x3c] sm:$0xf] %vm1927_vm15, %v2390_v60  ;;  %v1986_v40 = vadd.f32 %v1985_v4, %v1984_v23  ;;  %v2088_v39 = vsel %vm1301_vm6, %v2043_v29, 0.0  ;;  %v2090_v56 = vsel %vm1301_vm6, %v2044_v42, 0.0 }
 0x1e4   : > { %1941 = vst.msk [vmem:[%s3220_s24 + $0x34] sm:$0xf] %vm1927_vm15, %v2388_v16  ;;  %v2086_v36 = vsel %vm1301_vm6, %v2042_v41, 0.0 }
 0x1e5   : > { %v1988_v32 = vadd.f32 %v1987_v25, %v1986_v40  ;;  %v2087_v34 = vadd.f32 %v2086_v36, %v2085_v26 }
 0x1e7   : > { %v1990_v44 = vadd.f32 %v1989_v15, %v1988_v32  ;;  %v2089_v43 = vadd.f32 %v2088_v39, %v2087_v34 }
 0x1e9   : > { %v2091_v19 = vadd.f32 %v2090_v56, %v2089_v43 }
 0x1fe   : > { %v2456_v8 = vpop.f32.mrb[0].mxu1 }
 0x1ff   : > { %v2393_v49 = vpack.c.bf16 %v2456_v8, %v2456_v8  ;;  %v1736_v38 = vpop.f32.mrb[1].mxu1  ;;  %v2047_v58 = vmul.f32 %v2456_v8, %v2456_v8  ;;  %v1995_v62 = vsel %vm1301_vm6, %v2456_v8, 0.0 }
 0x200   : > { %v2391_v51 = vpack.c.bf16 %v1736_v38, %v1736_v38  ;;  %v1991_v33 = vsel %vm1301_vm6, %v1736_v38, 0.0  ;;  %v2045_v47 = vmul.f32 %v1736_v38, %v1736_v38  ;;  %v2457_v53 = vpop.f32.mrb[2].mxu1 }
 0x201   : > { %1946 = vst.msk [vmem:[%s3220_s24 + $0x48] sm:$0xf] %vm1927_vm15, %v2393_v49  ;;  %v1992_v48 = vadd.f32 %v1991_v33, %v1990_v44  ;;  %v2394_v54 = vpack.c.bf16 %v2457_v53, %v2457_v53  ;;  %v1739_v55 = vpop.f32.mrb[3].mxu1  ;;  %v2048_v0 = vmul.f32 %v2457_v53, %v2457_v53  ;;  %v1997_v2 = vsel %vm1301_vm6, %v2457_v53, 0.0 }
 0x202   : > { %1944 = vst.msk [vmem:[%s3220_s24 + $0x40] sm:$0xf] %vm1927_vm15, %v2391_v51  ;;  %v2092_v14 = vsel %vm1301_vm6, %v2045_v47, 0.0  ;;  %v2392_v57 = vpack.c.bf16 %v1739_v55, %v1739_v55  ;;  %v1993_v45 = vsel %vm1301_vm6, %v1739_v55, 0.0  ;;  %v2046_v52 = vmul.f32 %v1739_v55, %v1739_v55 }
 0x203   : > { %v2093_v59 = vadd.f32 %v2092_v14, %v2091_v19  ;;  %1947 = vst.msk [vmem:[%s3220_s24 + $0x4c] sm:$0xf] %vm1927_vm15, %v2394_v54  ;;  %v1994_v46 = vadd.f32 %v1993_v45, %v1992_v48  ;;  %v2096_v7 = vsel %vm1301_vm6, %v2047_v58, 0.0  ;;  %v2098_v63 = vsel %vm1301_vm6, %v2048_v0, 0.0 }
 0x204   : > { %1945 = vst.msk [vmem:[%s3220_s24 + $0x44] sm:$0xf] %vm1927_vm15, %v2392_v57  ;;  %v2094_v61 = vsel %vm1301_vm6, %v2046_v52, 0.0 }
 0x205   : > { %v1996_v10 = vadd.f32 %v1995_v62, %v1994_v46  ;;  %v2095_v5 = vadd.f32 %v2094_v61, %v2093_v59 }
 0x207   : > { %v1998_v1 = vadd.f32 %v1997_v2, %v1996_v10  ;;  %v2097_v9 = vadd.f32 %v2096_v7, %v2095_v5 }
 0x209   : > { %v2099_v31 = vadd.f32 %v2098_v63, %v2097_v9 }
 0x21e   : > { %v2460_v11 = vpop.f32.mrb[4].mxu1 }
 0x21f   : > { %v2397_v12 = vpack.c.bf16 %v2460_v11, %v2460_v11  ;;  %v1752_v20 = vpop.f32.mrb[5].mxu1  ;;  %v2051_v27 = vmul.f32 %v2460_v11, %v2460_v11  ;;  %v2003_v28 = vsel %vm1301_vm6, %v2460_v11, 0.0 }
 0x220   : > { %v2395_v17 = vpack.c.bf16 %v1752_v20, %v1752_v20  ;;  %v1999_v18 = vsel %vm1301_vm6, %v1752_v20, 0.0  ;;  %v2049_v21 = vmul.f32 %v1752_v20, %v1752_v20  ;;  %v2461_v22 = vpop.f32.mrb[6].mxu1 }
 0x221   : > { %1950 = vst.msk [vmem:[%s3220_s24 + $0x58] sm:$0xf] %vm1927_vm15, %v2397_v12  ;;  %v2000_v37 = vadd.f32 %v1999_v18, %v1998_v1  ;;  %v2398_v3 = vpack.c.bf16 %v2461_v22, %v2461_v22  ;;  %v1755_v6 = vpop.f32.mrb[7].mxu1  ;;  %v2052_v13 = vmul.f32 %v2461_v22, %v2461_v22  ;;  %v2005_v29 = vsel %vm1301_vm6, %v2461_v22, 0.0 }
 0x222   : > { %1948 = vst.msk [vmem:[%s3220_s24 + $0x50] sm:$0xf] %vm1927_vm15, %v2395_v17  ;;  %v2100_v30 = vsel %vm1301_vm6, %v2049_v21, 0.0  ;;  %v2396_v24 = vpack.c.bf16 %v1755_v6, %v1755_v6  ;;  %v2001_v50 = vsel %vm1301_vm6, %v1755_v6, 0.0  ;;  %v2050_v60 = vmul.f32 %v1755_v6, %v1755_v6 }
 0x223   : > { %v2101_v35 = vadd.f32 %v2100_v30, %v2099_v31  ;;  %1951 = vst.msk [vmem:[%s3220_s24 + $0x5c] sm:$0xf] %vm1927_vm15, %v2398_v3  ;;  %v2002_v23 = vadd.f32 %v2001_v50, %v2000_v37  ;;  %v2104_v40 = vsel %vm1301_vm6, %v2051_v27, 0.0  ;;  %v2106_v42 = vsel %vm1301_vm6, %v2052_v13, 0.0 }
 0x224   : > { %1949 = vst.msk [vmem:[%s3220_s24 + $0x54] sm:$0xf] %vm1927_vm15, %v2396_v24  ;;  %v2102_v4 = vsel %vm1301_vm6, %v2050_v60, 0.0 }
 0x225   : > { %v2004_v16 = vadd.f32 %v2003_v28, %v2002_v23  ;;  %v2103_v26 = vadd.f32 %v2102_v4, %v2101_v35 }
 0x227   : > { %v2006_v41 = vadd.f32 %v2005_v29, %v2004_v16  ;;  %v2105_v25 = vadd.f32 %v2104_v40, %v2103_v26 }
 0x229   : > { %v2107_v32 = vadd.f32 %v2106_v42, %v2105_v25 }
 0x23e   : > { %v2464_v36 = vpop.f32.mrb[8].mxu1 }
 0x23f   : > { %v2401_v15 = vpack.c.bf16 %v2464_v36, %v2464_v36  ;;  %v1768_v34 = vpop.f32.mrb[9].mxu1  ;;  %v2055_v47 = vmul.f32 %v2464_v36, %v2464_v36  ;;  %v2011_v55 = vsel %vm1301_vm6, %v2464_v36, 0.0 }
 0x240   : > { %v2399_v39 = vpack.c.bf16 %v1768_v34, %v1768_v34  ;;  %v2007_v44 = vsel %vm1301_vm6, %v1768_v34, 0.0  ;;  %v2053_v43 = vmul.f32 %v1768_v34, %v1768_v34  ;;  %v2465_v56 = vpop.f32.mrb[10].mxu1 }
 0x241   : > { %1954 = vst.msk [vmem:[%s3220_s24 + $0x68] sm:$0xf] %vm1927_vm15, %v2401_v15  ;;  %v2008_v19 = vadd.f32 %v2007_v44, %v2006_v41  ;;  %v2402_v8 = vpack.c.bf16 %v2465_v56, %v2465_v56  ;;  %v1771_v49 = vpop.f32.mrb[11].mxu1  ;;  %v2056_v14 = vmul.f32 %v2465_v56, %v2465_v56  ;;  %v2013_v58 = vsel %vm1301_vm6, %v2465_v56, 0.0 }
 0x242   : > { %1952 = vst.msk [vmem:[%s3220_s24 + $0x60] sm:$0xf] %vm1927_vm15, %v2399_v39  ;;  %v2108_v38 = vsel %vm1301_vm6, %v2053_v43, 0.0  ;;  %v2400_v51 = vpack.c.bf16 %v1771_v49, %v1771_v49  ;;  %v2009_v33 = vsel %vm1301_vm6, %v1771_v49, 0.0  ;;  %v2054_v54 = vmul.f32 %v1771_v49, %v1771_v49 }
 0x243   : > { %v2109_v53 = vadd.f32 %v2108_v38, %v2107_v32  ;;  %1955 = vst.msk [vmem:[%s3220_s24 + $0x6c] sm:$0xf] %vm1927_vm15, %v2402_v8  ;;  %v2010_v48 = vadd.f32 %v2009_v33, %v2008_v19  ;;  %v2112_v46 = vsel %vm1301_vm6, %v2055_v47, 0.0  ;;  %v2114_v0 = vsel %vm1301_vm6, %v2056_v14, 0.0 }
 0x244   : > { %1953 = vst.msk [vmem:[%s3220_s24 + $0x64] sm:$0xf] %vm1927_vm15, %v2400_v51  ;;  %v2110_v45 = vsel %vm1301_vm6, %v2054_v54, 0.0 }
 0x245   : > { %v2012_v57 = vadd.f32 %v2011_v55, %v2010_v48  ;;  %v2111_v59 = vadd.f32 %v2110_v45, %v2109_v53 }
 0x247   : > { %v2014_v52 = vadd.f32 %v2013_v58, %v2012_v57  ;;  %v2113_v62 = vadd.f32 %v2112_v46, %v2111_v59 }
 0x249   : > { %v2115_v10 = vadd.f32 %v2114_v0, %v2113_v62 }
 0x25b   : > { %v2468_v61 = vpop.f32.mrb[12].mxu1 }
 0x25c   : > { %v2405_v2 = vpack.c.bf16 %v2468_v61, %v2468_v61  ;;  %v1784_v5 = vpop.f32.mrb[13].mxu1  ;;  %v2059_v21 = vmul.f32 %v2468_v61, %v2468_v61  ;;  %v2019_v6 = vsel %vm1301_vm6, %v2468_v61, 0.0 }
 0x25d   : > { %v2403_v7 = vpack.c.bf16 %v1784_v5, %v1784_v5  ;;  %v2015_v1 = vsel %vm1301_vm6, %v1784_v5, 0.0  ;;  %v2057_v9 = vmul.f32 %v1784_v5, %v1784_v5  ;;  %v2469_v63 = vpop.f32.mrb[14].mxu1 }
 0x25e   : > { %1958 = vst.msk [vmem:[%s3220_s24 + $0x78] sm:$0xf] %vm1927_vm15, %v2405_v2  ;;  %v2016_v31 = vadd.f32 %v2015_v1, %v2014_v52  ;;  %v2406_v11 = vpack.c.bf16 %v2469_v63, %v2469_v63  ;;  %v1787_v12 = vpop.f32.mrb[15].mxu1  ;;  %v2060_v30 = vmul.f32 %v2469_v63, %v2469_v63  ;;  %v2021_v27 = vsel %vm1301_vm6, %v2469_v63, 0.0 }
 0x25f   : > { %1956 = vst.msk [vmem:[%s3220_s24 + $0x70] sm:$0xf] %vm1927_vm15, %v2403_v7  ;;  %v2116_v20 = vsel %vm1301_vm6, %v2057_v9, 0.0  ;;  %v2404_v17 = vpack.c.bf16 %v1787_v12, %v1787_v12  ;;  %v2017_v18 = vsel %vm1301_vm6, %v1787_v12, 0.0  ;;  %v2058_v3 = vmul.f32 %v1787_v12, %v1787_v12 }
 0x260   : > { %v2117_v22 = vadd.f32 %v2116_v20, %v2115_v10  ;;  %1959 = vst.msk [vmem:[%s3220_s24 + $0x7c] sm:$0xf] %vm1927_vm15, %v2406_v11  ;;  %v2018_v37 = vadd.f32 %v2017_v18, %v2016_v31  ;;  %v2120_v23 = vsel %vm1301_vm6, %v2059_v21, 0.0  ;;  %v2122_v13 = vsel %vm1301_vm6, %v2060_v30, 0.0 }
 0x261   : > { %1957 = vst.msk [vmem:[%s3220_s24 + $0x74] sm:$0xf] %vm1927_vm15, %v2404_v17  ;;  %v2118_v50 = vsel %vm1301_vm6, %v2058_v3, 0.0 }
 0x262   : > { %v2020_v24 = vadd.f32 %v2019_v6, %v2018_v37  ;;  %v2119_v35 = vadd.f32 %v2118_v50, %v2117_v22 }
 0x264   : > { %v2022_v60 = vadd.f32 %v2021_v27, %v2020_v24  ;;  %v2121_v28 = vadd.f32 %v2120_v23, %v2119_v35 }
 0x266   : > { %v2023_v16 = vrot.slane %v2022_v60, 4  ;;  %v2123_v4 = vadd.f32 %v2122_v13, %v2121_v28 }
 0x268   : > { %v2024_v29 = vadd.f32 %v2023_v16, %v2022_v60  ;;  %v2124_v26 = vrot.slane %v2123_v4, 4 }
 0x26a   : > { %v2025_v40 = vrot.slane %v2024_v29, 2  ;;  %v2125_v41 = vadd.f32 %v2124_v26, %v2123_v4 }
 0x26c   : > { %v2026_v25 = vadd.f32 %v2025_v40, %v2024_v29  ;;  %v2126_v42 = vrot.slane %v2125_v41, 2 }
 0x26e   : > { %v2027_v32 = vrot.slane %v2026_v25, 1  ;;  %v2127_v36 = vadd.f32 %v2126_v42, %v2125_v41 }
 0x270   : > { %v2128_v15 = vrot.slane %v2127_v36, 1  ;;  %v2028_v34 = vadd.f32 %v2027_v32, %v2026_v25 }
 0x272   : > { %v2129_v39 = vadd.f32 %v2128_v15, %v2127_v36 }
 0x274   : > { %v2131_v44 = vsel %vm698_vm0, %v2028_v34, %v2129_v39 }
 0x275   : > { %v2133_v43 = vsel %vm2132_vm1, %v2131_v44, 0.0 }
 0x276   : > { %2134 = vst.msk [vmem:[%s395_s26] sm:$0xff] %vm1301_vm6, %v2133_v43 }
 0x277 PF: > { %s16_s20 = sadd.s32 1, %s2558_s20   ;;  %s3388_s18 = smov %s2554_s19 }
 0x278   : > { %p13_p6 = scmp.ge.s32.totalorder %s16_s20, 4   ;;  %s3389_s19 = smov %s3391_s1 }
 0x27a   :  { %15 = sbr.rel (!%p13_p6) target bundleno = 2 (0x2), region = 84 }

</bundles_post_ra>
